<compile_context>
chip_gen: v7x
topology: tpu7x:2x2x1
jax: 0.10.0
libtpu: 0.0.40
codegen_flags: <defaults>
</compile_context>

<pallas_src>
import functools

import jax
import jax.numpy as jnp
from jax.experimental import pallas as pl
from jax.experimental.pallas import tpu as pltpu


def _doble_conv_kernel(x_ref, w1_ref, b1_ref, w2_ref, b2_ref, o_ref,
                       xpad_ref, p1_ref, hpad_ref, p2_ref, *, H, W):
    """Fused DobleConv for one image.

    x_ref   : (H, W, Cin)        NHWC input tile (batch dim squeezed by grid)
    w1_ref  : (9*Cin, Cmid)      conv1 weight, rows ordered (dy, dx, cin)
    b1_ref  : (1, Cmid)
    w2_ref  : (9*Cmid, Cout)     conv2 weight, rows ordered (dy, dx, cmid)
    b2_ref  : (1, Cout)
    o_ref   : (H, W, Cout)       output tile
    xpad_ref: (H+2, W+2, Cin)    VMEM scratch: zero-padded input
    p1_ref  : (H*W, 9*Cin)       VMEM scratch: im2col matrix for conv1
    hpad_ref: (H+2, W+2, Cmid)   VMEM scratch: zero-padded mid activation
    p2_ref  : (H*W, 9*Cmid)      VMEM scratch: im2col matrix for conv2
    """
    cin = x_ref.shape[-1]
    cmid = w1_ref.shape[-1]
    cout = w2_ref.shape[-1]
    hw = H * W

    # ---- conv1: in-kernel zero padding + im2col + single MXU matmul + ReLU
    xpad_ref[...] = jnp.zeros_like(xpad_ref)
    xpad_ref[1:H + 1, 1:W + 1, :] = x_ref[...]
    k = 0
    for dy in range(3):
        for dx in range(3):
            # merge-leading-dims reshape (last dim untouched) -> cheap relayout
            p1_ref[:, k * cin:(k + 1) * cin] = (
                xpad_ref[dy:dy + H, dx:dx + W, :].reshape(hw, cin))
            k += 1
    y1 = jnp.dot(p1_ref[...], w1_ref[...], preferred_element_type=jnp.float32)
    y1 = jnp.maximum(y1 + b1_ref[...], 0.0)                       # (HW, Cmid)

    # ---- conv2: mid activation stays in VMEM (no HBM round-trip)
    hpad_ref[...] = jnp.zeros_like(hpad_ref)
    hpad_ref[1:H + 1, 1:W + 1, :] = y1.reshape(H, W, cmid)
    k = 0
    for dy in range(3):
        for dx in range(3):
            p2_ref[:, k * cmid:(k + 1) * cmid] = (
                hpad_ref[dy:dy + H, dx:dx + W, :].reshape(hw, cmid))
            k += 1
    y2 = jnp.dot(p2_ref[...], w2_ref[...], preferred_element_type=jnp.float32)
    y2 = jnp.maximum(y2 + b2_ref[...], 0.0)                       # (HW, Cout)

    o_ref[...] = y2.reshape(H, W, cout)


@jax.jit
def doble_conv(x_nchw, w1, b1, w2, b2):
    """DobleConv forward. x_nchw: (B, Cin, H, W); weights in PyTorch OIHW layout."""
    B, Cin, H, W = x_nchw.shape
    Cmid = w1.shape[0]
    Cout = w2.shape[0]

    # NCHW -> NHWC once at the boundary (tiny).
    x = jnp.transpose(x_nchw, (0, 2, 3, 1)).astype(jnp.float32)

    # OIHW (Cout, Cin, 3, 3) -> (3, 3, Cin, Cout) -> (9*Cin, Cout): row index
    # (dy*3+dx)*Cin + cin matches the im2col column order built in the kernel.
    w1m = jnp.transpose(w1, (2, 3, 1, 0)).reshape(9 * Cin, Cmid).astype(jnp.float32)
    w2m = jnp.transpose(w2, (2, 3, 1, 0)).reshape(9 * Cmid, Cout).astype(jnp.float32)
    b1m = b1.reshape(1, Cmid).astype(jnp.float32)
    b2m = b2.reshape(1, Cout).astype(jnp.float32)

    out_nhwc = pl.pallas_call(
        functools.partial(_doble_conv_kernel, H=H, W=W),
        out_shape=jax.ShapeDtypeStruct((B, H, W, Cout), jnp.float32),
        grid=(B,),
        in_specs=[
            pl.BlockSpec((None, H, W, Cin), lambda i: (i, 0, 0, 0)),
            pl.BlockSpec((9 * Cin, Cmid), lambda i: (0, 0)),   # resident weights
            pl.BlockSpec((1, Cmid), lambda i: (0, 0)),
            pl.BlockSpec((9 * Cmid, Cout), lambda i: (0, 0)),
            pl.BlockSpec((1, Cout), lambda i: (0, 0)),
        ],
        out_specs=pl.BlockSpec((None, H, W, Cout), lambda i: (i, 0, 0, 0)),
        scratch_shapes=[
            pltpu.VMEM((H + 2, W + 2, Cin), jnp.float32),
            pltpu.VMEM((H * W, 9 * Cin), jnp.float32),
            pltpu.VMEM((H + 2, W + 2, Cmid), jnp.float32),
            pltpu.VMEM((H * W, 9 * Cmid), jnp.float32),
        ],
        compiler_params=pltpu.CompilerParams(
            dimension_semantics=("parallel",)),   # v7x: shard batch over 2 TCs
    )(x, w1m, b1m, w2m, b2m)

    return jnp.transpose(out_nhwc, (0, 3, 1, 2))                  # NHWC -> NCHW


def doble_conv_ref(x, w1, b1, w2, b2):
    """Pure-JAX reference: nn.Conv2d(3x3, padding=1)+ReLU, twice (BN=False)."""
    dn = ("NCHW", "OIHW", "NCHW")
    y = jax.lax.conv_general_dilated(
        x, w1, (1, 1), "SAME", dimension_numbers=dn,
        precision=jax.lax.Precision.HIGHEST)
    y = jax.nn.relu(y + b1[None, :, None, None])
    y = jax.lax.conv_general_dilated(
        y, w2, (1, 1), "SAME", dimension_numbers=dn,
        precision=jax.lax.Precision.HIGHEST)
    return jax.nn.relu(y + b2[None, :, None, None])


if __name__ == "__main__":
    key = jax.random.PRNGKey(0)
    kx, kw1, kb1, kw2, kb2 = jax.random.split(key, 5)

    B, Cin, Cmid, Cout, H, W = 2, 4, 16, 4, 16, 16
    x = jax.random.uniform(kx, (B, Cin, H, W), dtype=jnp.float32)
    w1 = 0.1 * jax.random.normal(kw1, (Cmid, Cin, 3, 3), jnp.float32)
    b1 = 0.1 * jax.random.normal(kb1, (Cmid,), jnp.float32)
    w2 = 0.1 * jax.random.normal(kw2, (Cout, Cmid, 3, 3), jnp.float32)
    b2 = 0.1 * jax.random.normal(kb2, (Cout,), jnp.float32)

    y = doble_conv(x, w1, b1, w2, b2)
    y = jax.block_until_ready(y)

    assert y.shape == (B, Cout, H, W)
    assert bool(jnp.all(jnp.isfinite(y)))

    y_ref = doble_conv_ref(x, w1, b1, w2, b2)
    max_err = float(jnp.max(jnp.abs(y - y_ref)))
    assert max_err < 1e-4, f"mismatch vs reference: max abs err {max_err}"

    print("KERNEL_OK")
</pallas_src>

<mosaic_0001>
module attributes {stable_mosaic.version = 11 : i64} {
  func.func @_doble_conv_kernel(%arg0: i32, %arg1: memref<1x16x16x4xf32, #tpu.memory_space<vmem>>, %arg2: memref<36x16xf32, #tpu.memory_space<vmem>>, %arg3: memref<1x16xf32, #tpu.memory_space<vmem>>, %arg4: memref<144x4xf32, #tpu.memory_space<vmem>>, %arg5: memref<1x4xf32, #tpu.memory_space<vmem>>, %arg6: memref<1x16x16x4xf32, #tpu.memory_space<vmem>>, %arg7: memref<18x18x4xf32, #tpu.memory_space<vmem>>, %arg8: memref<256x36xf32, #tpu.memory_space<vmem>>, %arg9: memref<18x18x16xf32, #tpu.memory_space<vmem>>, %arg10: memref<256x144xf32, #tpu.memory_space<vmem>>) attributes {dimension_semantics = [#tpu.dimension_semantics<parallel>], iteration_bounds = array<i64: 2>, scalar_prefetch = 0 : i64, scratch_operands = 4 : i64, tpu.core_type = #tpu.core_type<tc>, window_params = [{transform_indices = @transform_0, window_bounds = array<i64: 1, 16, 16, 4>}, {pipeline_mode = #tpu.pipeline_mode<synchronous>, transform_indices = @transform_1, window_bounds = array<i64: 36, 16>}, {pipeline_mode = #tpu.pipeline_mode<synchronous>, transform_indices = @transform_2, window_bounds = array<i64: 1, 16>}, {pipeline_mode = #tpu.pipeline_mode<synchronous>, transform_indices = @transform_3, window_bounds = array<i64: 144, 4>}, {pipeline_mode = #tpu.pipeline_mode<synchronous>, transform_indices = @transform_4, window_bounds = array<i64: 1, 4>}, {transform_indices = @transform_5, window_bounds = array<i64: 1, 16, 16, 4>}]} {
    %cst = arith.constant 0.000000e+00 : f32
    %0 = vector.broadcast %cst : f32 to vector<18x18x4xf32>
    %c0 = arith.constant 0 : index
    %c0_0 = arith.constant 0 : index
    %c0_1 = arith.constant 0 : index
    %1 = vector.load %arg7[%c0, %c0_0, %c0_1] : memref<18x18x4xf32, #tpu.memory_space<vmem>>, vector<18x18x4xf32>
    tpu.vector_store %arg7[%c0, %c0_0, %c0_1], %0 {strides = array<i32>} : memref<18x18x4xf32, #tpu.memory_space<vmem>>, vector<18x18x4xf32>,
    %c0_2 = arith.constant 0 : index
    %c0_3 = arith.constant 0 : index
    %c0_4 = arith.constant 0 : index
    %c0_5 = arith.constant 0 : index
    %2 = vector.load %arg1[%c0_2, %c0_3, %c0_4, %c0_5] : memref<1x16x16x4xf32, #tpu.memory_space<vmem>>, vector<1x16x16x4xf32>
    %3 = vector.shape_cast %2 : vector<1x16x16x4xf32> to vector<16x16x4xf32>
    %c1 = arith.constant 1 : index
    %c1_6 = arith.constant 1 : index
    %c0_7 = arith.constant 0 : index
    %4 = vector.load %arg7[%c1, %c1_6, %c0_7] : memref<18x18x4xf32, #tpu.memory_space<vmem>>, vector<16x16x4xf32>
    tpu.vector_store %arg7[%c1, %c1_6, %c0_7], %3 {strides = array<i32>} : memref<18x18x4xf32, #tpu.memory_space<vmem>>, vector<16x16x4xf32>,
    %c0_8 = arith.constant 0 : index
    %c0_9 = arith.constant 0 : index
    %c0_10 = arith.constant 0 : index
    %5 = vector.load %arg7[%c0_8, %c0_9, %c0_10] : memref<18x18x4xf32, #tpu.memory_space<vmem>>, vector<16x16x4xf32>
    %6 = vector.shape_cast %5 : vector<16x16x4xf32> to vector<256x4xf32>
    %c0_11 = arith.constant 0 : index
    %c0_12 = arith.constant 0 : index
    %7 = vector.load %arg8[%c0_11, %c0_12] : memref<256x36xf32, #tpu.memory_space<vmem>>, vector<256x4xf32>
    tpu.vector_store %arg8[%c0_11, %c0_12], %6 {strides = array<i32>} : memref<256x36xf32, #tpu.memory_space<vmem>>, vector<256x4xf32>,
    %c0_13 = arith.constant 0 : index
    %c1_14 = arith.constant 1 : index
    %c0_15 = arith.constant 0 : index
    %8 = vector.load %arg7[%c0_13, %c1_14, %c0_15] : memref<18x18x4xf32, #tpu.memory_space<vmem>>, vector<16x16x4xf32>
    %9 = vector.shape_cast %8 : vector<16x16x4xf32> to vector<256x4xf32>
    %c0_16 = arith.constant 0 : index
    %c4 = arith.constant 4 : index
    %10 = vector.load %arg8[%c0_16, %c4] : memref<256x36xf32, #tpu.memory_space<vmem>>, vector<256x4xf32>
    tpu.vector_store %arg8[%c0_16, %c4], %9 {strides = array<i32>} : memref<256x36xf32, #tpu.memory_space<vmem>>, vector<256x4xf32>,
    %c0_17 = arith.constant 0 : index
    %c2 = arith.constant 2 : index
    %c0_18 = arith.constant 0 : index
    %11 = vector.load %arg7[%c0_17, %c2, %c0_18] : memref<18x18x4xf32, #tpu.memory_space<vmem>>, vector<16x16x4xf32>
    %12 = vector.shape_cast %11 : vector<16x16x4xf32> to vector<256x4xf32>
    %c0_19 = arith.constant 0 : index
    %c8 = arith.constant 8 : index
    %13 = vector.load %arg8[%c0_19, %c8] : memref<256x36xf32, #tpu.memory_space<vmem>>, vector<256x4xf32>
    tpu.vector_store %arg8[%c0_19, %c8], %12 {strides = array<i32>} : memref<256x36xf32, #tpu.memory_space<vmem>>, vector<256x4xf32>,
    %c1_20 = arith.constant 1 : index
    %c0_21 = arith.constant 0 : index
    %c0_22 = arith.constant 0 : index
    %14 = vector.load %arg7[%c1_20, %c0_21, %c0_22] : memref<18x18x4xf32, #tpu.memory_space<vmem>>, vector<16x16x4xf32>
    %15 = vector.shape_cast %14 : vector<16x16x4xf32> to vector<256x4xf32>
    %c0_23 = arith.constant 0 : index
    %c12 = arith.constant 12 : index
    %16 = vector.load %arg8[%c0_23, %c12] : memref<256x36xf32, #tpu.memory_space<vmem>>, vector<256x4xf32>
    tpu.vector_store %arg8[%c0_23, %c12], %15 {strides = array<i32>} : memref<256x36xf32, #tpu.memory_space<vmem>>, vector<256x4xf32>,
    %c1_24 = arith.constant 1 : index
    %c1_25 = arith.constant 1 : index
    %c0_26 = arith.constant 0 : index
    %17 = vector.load %arg7[%c1_24, %c1_25, %c0_26] : memref<18x18x4xf32, #tpu.memory_space<vmem>>, vector<16x16x4xf32>
    %18 = vector.shape_cast %17 : vector<16x16x4xf32> to vector<256x4xf32>
    %c0_27 = arith.constant 0 : index
    %c16 = arith.constant 16 : index
    %19 = vector.load %arg8[%c0_27, %c16] : memref<256x36xf32, #tpu.memory_space<vmem>>, vector<256x4xf32>
    tpu.vector_store %arg8[%c0_27, %c16], %18 {strides = array<i32>} : memref<256x36xf32, #tpu.memory_space<vmem>>, vector<256x4xf32>,
    %c1_28 = arith.constant 1 : index
    %c2_29 = arith.constant 2 : index
    %c0_30 = arith.constant 0 : index
    %20 = vector.load %arg7[%c1_28, %c2_29, %c0_30] : memref<18x18x4xf32, #tpu.memory_space<vmem>>, vector<16x16x4xf32>
    %21 = vector.shape_cast %20 : vector<16x16x4xf32> to vector<256x4xf32>
    %c0_31 = arith.constant 0 : index
    %c20 = arith.constant 20 : index
    %22 = vector.load %arg8[%c0_31, %c20] : memref<256x36xf32, #tpu.memory_space<vmem>>, vector<256x4xf32>
    tpu.vector_store %arg8[%c0_31, %c20], %21 {strides = array<i32>} : memref<256x36xf32, #tpu.memory_space<vmem>>, vector<256x4xf32>,
    %c2_32 = arith.constant 2 : index
    %c0_33 = arith.constant 0 : index
    %c0_34 = arith.constant 0 : index
    %23 = vector.load %arg7[%c2_32, %c0_33, %c0_34] : memref<18x18x4xf32, #tpu.memory_space<vmem>>, vector<16x16x4xf32>
    %24 = vector.shape_cast %23 : vector<16x16x4xf32> to vector<256x4xf32>
    %c0_35 = arith.constant 0 : index
    %c24 = arith.constant 24 : index
    %25 = vector.load %arg8[%c0_35, %c24] : memref<256x36xf32, #tpu.memory_space<vmem>>, vector<256x4xf32>
    tpu.vector_store %arg8[%c0_35, %c24], %24 {strides = array<i32>} : memref<256x36xf32, #tpu.memory_space<vmem>>, vector<256x4xf32>,
    %c2_36 = arith.constant 2 : index
    %c1_37 = arith.constant 1 : index
    %c0_38 = arith.constant 0 : index
    %26 = vector.load %arg7[%c2_36, %c1_37, %c0_38] : memref<18x18x4xf32, #tpu.memory_space<vmem>>, vector<16x16x4xf32>
    %27 = vector.shape_cast %26 : vector<16x16x4xf32> to vector<256x4xf32>
    %c0_39 = arith.constant 0 : index
    %c28 = arith.constant 28 : index
    %28 = vector.load %arg8[%c0_39, %c28] : memref<256x36xf32, #tpu.memory_space<vmem>>, vector<256x4xf32>
    tpu.vector_store %arg8[%c0_39, %c28], %27 {strides = array<i32>} : memref<256x36xf32, #tpu.memory_space<vmem>>, vector<256x4xf32>,
    %c2_40 = arith.constant 2 : index
    %c2_41 = arith.constant 2 : index
    %c0_42 = arith.constant 0 : index
    %29 = vector.load %arg7[%c2_40, %c2_41, %c0_42] : memref<18x18x4xf32, #tpu.memory_space<vmem>>, vector<16x16x4xf32>
    %30 = vector.shape_cast %29 : vector<16x16x4xf32> to vector<256x4xf32>
    %c0_43 = arith.constant 0 : index
    %c32 = arith.constant 32 : index
    %31 = vector.load %arg8[%c0_43, %c32] : memref<256x36xf32, #tpu.memory_space<vmem>>, vector<256x4xf32>
    tpu.vector_store %arg8[%c0_43, %c32], %30 {strides = array<i32>} : memref<256x36xf32, #tpu.memory_space<vmem>>, vector<256x4xf32>,
    %c0_44 = arith.constant 0 : index
    %c0_45 = arith.constant 0 : index
    %32 = vector.load %arg8[%c0_44, %c0_45] : memref<256x36xf32, #tpu.memory_space<vmem>>, vector<256x36xf32>
    %c0_46 = arith.constant 0 : index
    %c0_47 = arith.constant 0 : index
    %33 = vector.load %arg2[%c0_46, %c0_47] : memref<36x16xf32, #tpu.memory_space<vmem>>, vector<36x16xf32>
    %cst_48 = arith.constant dense<0.000000e+00> : vector<256x16xf32>
    %34 = tpu.matmul %32, %33, %cst_48 {dimension_numbers = #tpu.dot_dimension_numbers<[1], [0], [0], [1], [0, 0, 1, 1], [], []>} : vector<256x36xf32>, vector<36x16xf32>, vector<256x16xf32> -> vector<256x16xf32>
    %c0_49 = arith.constant 0 : index
    %c0_50 = arith.constant 0 : index
    %35 = vector.load %arg3[%c0_49, %c0_50] : memref<1x16xf32, #tpu.memory_space<vmem>>, vector<1x16xf32>
    %36 = vector.broadcast %35 : vector<1x16xf32> to vector<256x16xf32>
    %37 = arith.addf %34, %36 : vector<256x16xf32>
    %cst_51 = arith.constant 0.000000e+00 : f32
    %38 = vector.broadcast %cst_51 : f32 to vector<256x16xf32>
    %39 = arith.maximumf %37, %38 : vector<256x16xf32>
    %cst_52 = arith.constant 0.000000e+00 : f32
    %40 = vector.broadcast %cst_52 : f32 to vector<18x18x16xf32>
    %c0_53 = arith.constant 0 : index
    %c0_54 = arith.constant 0 : index
    %c0_55 = arith.constant 0 : index
    %41 = vector.load %arg9[%c0_53, %c0_54, %c0_55] : memref<18x18x16xf32, #tpu.memory_space<vmem>>, vector<18x18x16xf32>
    tpu.vector_store %arg9[%c0_53, %c0_54, %c0_55], %40 {strides = array<i32>} : memref<18x18x16xf32, #tpu.memory_space<vmem>>, vector<18x18x16xf32>,
    %42 = vector.shape_cast %39 : vector<256x16xf32> to vector<16x16x16xf32>
    %c1_56 = arith.constant 1 : index
    %c1_57 = arith.constant 1 : index
    %c0_58 = arith.constant 0 : index
    %43 = vector.load %arg9[%c1_56, %c1_57, %c0_58] : memref<18x18x16xf32, #tpu.memory_space<vmem>>, vector<16x16x16xf32>
    tpu.vector_store %arg9[%c1_56, %c1_57, %c0_58], %42 {strides = array<i32>} : memref<18x18x16xf32, #tpu.memory_space<vmem>>, vector<16x16x16xf32>,
    %c0_59 = arith.constant 0 : index
    %c0_60 = arith.constant 0 : index
    %c0_61 = arith.constant 0 : index
    %44 = vector.load %arg9[%c0_59, %c0_60, %c0_61] : memref<18x18x16xf32, #tpu.memory_space<vmem>>, vector<16x16x16xf32>
    %45 = vector.shape_cast %44 : vector<16x16x16xf32> to vector<256x16xf32>
    %c0_62 = arith.constant 0 : index
    %c0_63 = arith.constant 0 : index
    %46 = vector.load %arg10[%c0_62, %c0_63] : memref<256x144xf32, #tpu.memory_space<vmem>>, vector<256x16xf32>
    tpu.vector_store %arg10[%c0_62, %c0_63], %45 {strides = array<i32>} : memref<256x144xf32, #tpu.memory_space<vmem>>, vector<256x16xf32>,
    %c0_64 = arith.constant 0 : index
    %c1_65 = arith.constant 1 : index
    %c0_66 = arith.constant 0 : index
    %47 = vector.load %arg9[%c0_64, %c1_65, %c0_66] : memref<18x18x16xf32, #tpu.memory_space<vmem>>, vector<16x16x16xf32>
    %48 = vector.shape_cast %47 : vector<16x16x16xf32> to vector<256x16xf32>
    %c0_67 = arith.constant 0 : index
    %c16_68 = arith.constant 16 : index
    %49 = vector.load %arg10[%c0_67, %c16_68] : memref<256x144xf32, #tpu.memory_space<vmem>>, vector<256x16xf32>
    tpu.vector_store %arg10[%c0_67, %c16_68], %48 {strides = array<i32>} : memref<256x144xf32, #tpu.memory_space<vmem>>, vector<256x16xf32>,
    %c0_69 = arith.constant 0 : index
    %c2_70 = arith.constant 2 : index
    %c0_71 = arith.constant 0 : index
    %50 = vector.load %arg9[%c0_69, %c2_70, %c0_71] : memref<18x18x16xf32, #tpu.memory_space<vmem>>, vector<16x16x16xf32>
    %51 = vector.shape_cast %50 : vector<16x16x16xf32> to vector<256x16xf32>
    %c0_72 = arith.constant 0 : index
    %c32_73 = arith.constant 32 : index
    %52 = vector.load %arg10[%c0_72, %c32_73] : memref<256x144xf32, #tpu.memory_space<vmem>>, vector<256x16xf32>
    tpu.vector_store %arg10[%c0_72, %c32_73], %51 {strides = array<i32>} : memref<256x144xf32, #tpu.memory_space<vmem>>, vector<256x16xf32>,
    %c1_74 = arith.constant 1 : index
    %c0_75 = arith.constant 0 : index
    %c0_76 = arith.constant 0 : index
    %53 = vector.load %arg9[%c1_74, %c0_75, %c0_76] : memref<18x18x16xf32, #tpu.memory_space<vmem>>, vector<16x16x16xf32>
    %54 = vector.shape_cast %53 : vector<16x16x16xf32> to vector<256x16xf32>
    %c0_77 = arith.constant 0 : index
    %c48 = arith.constant 48 : index
    %55 = vector.load %arg10[%c0_77, %c48] : memref<256x144xf32, #tpu.memory_space<vmem>>, vector<256x16xf32>
    tpu.vector_store %arg10[%c0_77, %c48], %54 {strides = array<i32>} : memref<256x144xf32, #tpu.memory_space<vmem>>, vector<256x16xf32>,
    %c1_78 = arith.constant 1 : index
    %c1_79 = arith.constant 1 : index
    %c0_80 = arith.constant 0 : index
    %56 = vector.load %arg9[%c1_78, %c1_79, %c0_80] : memref<18x18x16xf32, #tpu.memory_space<vmem>>, vector<16x16x16xf32>
    %57 = vector.shape_cast %56 : vector<16x16x16xf32> to vector<256x16xf32>
    %c0_81 = arith.constant 0 : index
    %c64 = arith.constant 64 : index
    %58 = vector.load %arg10[%c0_81, %c64] : memref<256x144xf32, #tpu.memory_space<vmem>>, vector<256x16xf32>
    tpu.vector_store %arg10[%c0_81, %c64], %57 {strides = array<i32>} : memref<256x144xf32, #tpu.memory_space<vmem>>, vector<256x16xf32>,
    %c1_82 = arith.constant 1 : index
    %c2_83 = arith.constant 2 : index
    %c0_84 = arith.constant 0 : index
    %59 = vector.load %arg9[%c1_82, %c2_83, %c0_84] : memref<18x18x16xf32, #tpu.memory_space<vmem>>, vector<16x16x16xf32>
    %60 = vector.shape_cast %59 : vector<16x16x16xf32> to vector<256x16xf32>
    %c0_85 = arith.constant 0 : index
    %c80 = arith.constant 80 : index
    %61 = vector.load %arg10[%c0_85, %c80] : memref<256x144xf32, #tpu.memory_space<vmem>>, vector<256x16xf32>
    tpu.vector_store %arg10[%c0_85, %c80], %60 {strides = array<i32>} : memref<256x144xf32, #tpu.memory_space<vmem>>, vector<256x16xf32>,
    %c2_86 = arith.constant 2 : index
    %c0_87 = arith.constant 0 : index
    %c0_88 = arith.constant 0 : index
    %62 = vector.load %arg9[%c2_86, %c0_87, %c0_88] : memref<18x18x16xf32, #tpu.memory_space<vmem>>, vector<16x16x16xf32>
    %63 = vector.shape_cast %62 : vector<16x16x16xf32> to vector<256x16xf32>
    %c0_89 = arith.constant 0 : index
    %c96 = arith.constant 96 : index
    %64 = vector.load %arg10[%c0_89, %c96] : memref<256x144xf32, #tpu.memory_space<vmem>>, vector<256x16xf32>
    tpu.vector_store %arg10[%c0_89, %c96], %63 {strides = array<i32>} : memref<256x144xf32, #tpu.memory_space<vmem>>, vector<256x16xf32>,
    %c2_90 = arith.constant 2 : index
    %c1_91 = arith.constant 1 : index
    %c0_92 = arith.constant 0 : index
    %65 = vector.load %arg9[%c2_90, %c1_91, %c0_92] : memref<18x18x16xf32, #tpu.memory_space<vmem>>, vector<16x16x16xf32>
    %66 = vector.shape_cast %65 : vector<16x16x16xf32> to vector<256x16xf32>
    %c0_93 = arith.constant 0 : index
    %c112 = arith.constant 112 : index
    %67 = vector.load %arg10[%c0_93, %c112] : memref<256x144xf32, #tpu.memory_space<vmem>>, vector<256x16xf32>
    tpu.vector_store %arg10[%c0_93, %c112], %66 {strides = array<i32>} : memref<256x144xf32, #tpu.memory_space<vmem>>, vector<256x16xf32>,
    %c2_94 = arith.constant 2 : index
    %c2_95 = arith.constant 2 : index
    %c0_96 = arith.constant 0 : index
    %68 = vector.load %arg9[%c2_94, %c2_95, %c0_96] : memref<18x18x16xf32, #tpu.memory_space<vmem>>, vector<16x16x16xf32>
    %69 = vector.shape_cast %68 : vector<16x16x16xf32> to vector<256x16xf32>
    %c0_97 = arith.constant 0 : index
    %c128 = arith.constant 128 : index
    %70 = vector.load %arg10[%c0_97, %c128] : memref<256x144xf32, #tpu.memory_space<vmem>>, vector<256x16xf32>
    tpu.vector_store %arg10[%c0_97, %c128], %69 {strides = array<i32>} : memref<256x144xf32, #tpu.memory_space<vmem>>, vector<256x16xf32>,
    %c0_98 = arith.constant 0 : index
    %c0_99 = arith.constant 0 : index
    %71 = vector.load %arg10[%c0_98, %c0_99] : memref<256x144xf32, #tpu.memory_space<vmem>>, vector<256x144xf32>
    %c0_100 = arith.constant 0 : index
    %c0_101 = arith.constant 0 : index
    %72 = vector.load %arg4[%c0_100, %c0_101] : memref<144x4xf32, #tpu.memory_space<vmem>>, vector<144x4xf32>
    %cst_102 = arith.constant dense<0.000000e+00> : vector<256x4xf32>
    %73 = tpu.matmul %71, %72, %cst_102 {dimension_numbers = #tpu.dot_dimension_numbers<[1], [0], [0], [1], [0, 0, 1, 1], [], []>} : vector<256x144xf32>, vector<144x4xf32>, vector<256x4xf32> -> vector<256x4xf32>
    %c0_103 = arith.constant 0 : index
    %c0_104 = arith.constant 0 : index
    %74 = vector.load %arg5[%c0_103, %c0_104] : memref<1x4xf32, #tpu.memory_space<vmem>>, vector<1x4xf32>
    %75 = vector.broadcast %74 : vector<1x4xf32> to vector<256x4xf32>
    %76 = arith.addf %73, %75 : vector<256x4xf32>
    %cst_105 = arith.constant 0.000000e+00 : f32
    %77 = vector.broadcast %cst_105 : f32 to vector<256x4xf32>
    %78 = arith.maximumf %76, %77 : vector<256x4xf32>
    %79 = vector.shape_cast %78 : vector<256x4xf32> to vector<16x16x4xf32>
    %c0_106 = arith.constant 0 : index
    %c0_107 = arith.constant 0 : index
    %c0_108 = arith.constant 0 : index
    %c0_109 = arith.constant 0 : index
    %80 = vector.load %arg6[%c0_106, %c0_107, %c0_108, %c0_109] : memref<1x16x16x4xf32, #tpu.memory_space<vmem>>, vector<1x16x16x4xf32>
    %81 = vector.shape_cast %80 : vector<1x16x16x4xf32> to vector<16x16x4xf32>
    %82 = vector.shape_cast %79 : vector<16x16x4xf32> to vector<1x16x16x4xf32>
    tpu.vector_store %arg6[%c0_106, %c0_107, %c0_108, %c0_109], %82 {strides = array<i32>} : memref<1x16x16x4xf32, #tpu.memory_space<vmem>>, vector<1x16x16x4xf32>,
    return
  }
  func.func @transform_0(%arg0: i32) -> (i32, i32, i32, i32) {
    %c0_i32 = arith.constant 0 : i32
    %c0_i32_0 = arith.constant 0 : i32
    %c0_i32_1 = arith.constant 0 : i32
    %c0_i32_2 = arith.constant 0 : i32
    return %arg0, %c0_i32, %c0_i32_0, %c0_i32_1 : i32, i32, i32, i32
  }
  func.func @transform_1(%arg0: i32) -> (i32, i32) {
    %c0_i32 = arith.constant 0 : i32
    %c0_i32_0 = arith.constant 0 : i32
    %c0_i32_1 = arith.constant 0 : i32
    return %c0_i32, %c0_i32_0 : i32, i32
  }
  func.func @transform_2(%arg0: i32) -> (i32, i32) {
    %c0_i32 = arith.constant 0 : i32
    %c0_i32_0 = arith.constant 0 : i32
    %c0_i32_1 = arith.constant 0 : i32
    return %c0_i32, %c0_i32_0 : i32, i32
  }
  func.func @transform_3(%arg0: i32) -> (i32, i32) {
    %c0_i32 = arith.constant 0 : i32
    %c0_i32_0 = arith.constant 0 : i32
    %c0_i32_1 = arith.constant 0 : i32
    return %c0_i32, %c0_i32_0 : i32, i32
  }
  func.func @transform_4(%arg0: i32) -> (i32, i32) {
    %c0_i32 = arith.constant 0 : i32
    %c0_i32_0 = arith.constant 0 : i32
    %c0_i32_1 = arith.constant 0 : i32
    return %c0_i32, %c0_i32_0 : i32, i32
  }
  func.func @transform_5(%arg0: i32) -> (i32, i32, i32, i32) {
    %c0_i32 = arith.constant 0 : i32
    %c0_i32_0 = arith.constant 0 : i32
    %c0_i32_1 = arith.constant 0 : i32
    %c0_i32_2 = arith.constant 0 : i32
    return %arg0, %c0_i32, %c0_i32_0, %c0_i32_1 : i32, i32, i32, i32
  }
}

</mosaic_0001>

<bundles_post_ra>
// kernel: doble_conv.1
= control target key start
LH: loop header
LB: loop body
LE: loop exit
PB: predicated region body
PF: predicated region fallthrough
CT: control target
= control target key end

     0   :  { %s4760_s18 = smov 0   ;;  %s7103_s0 = inlined_call_operand.vmem [shape: f32[2,16,16,4], index: 0, kind: input, shape index: {}]   ;;  %s7104_s1 = inlined_call_operand.vmem [shape: f32[36,16], index: 1, kind: input, shape index: {}]   ;;  %s7105_s2 = inlined_call_operand.vmem [shape: f32[1,16], index: 2, kind: input, shape index: {}]   ;;  %s7106_s3 = inlined_call_operand.vmem [shape: f32[144,4], index: 3, kind: input, shape index: {}]   ;;  %s7107_s4 = inlined_call_operand.vmem [shape: f32[1,4], index: 4, kind: input, shape index: {}]   ;;  %s7108_s5 = inlined_call_operand.vmem [shape: f32[2,16,16,4], index: 5, kind: output, shape index: {}]  }
   0x1 LB: > { %s4455_s19 = sadd.s32 4294967295, %s4713_s18   ;;  %p4459_p0 = scmp.ge.s32.totalorder %s4713_s18, 1  ;;  %s4713_s18 = sphi %s4760_s18, %s15_s18  }
   0x2   : > { %p187_p1 = scmp.lt.s32.totalorder %s4713_s18, 3 }
   0x4   : > { %p188_p2 = pnand %p4459_p0, %p187_p1 }
   0x6   : > { %191 = sbr.rel (%p188_p2) target bundleno = 1613 (0x64d), region = 40 }
   0xd   : > { %vm225_vm0 = vcmask 31744   ;;  %p4770_p3 = scmp.lt.s32.totalorder %s4455_s19, 1  ;;  %vm228_vm1 = vcmask 25600   ;;  %v7109_v0 = vmov 0.0   ;;  %s4716_s25 = smov 4   ;;  %vm570_vm2 = vcmask 64544  }
   0xe   : > { %226 = vst.msk [vmem:[#allocation2] sm:$0xff] %vm225_vm0, %v7109_v0  ;;  %227 = vst.msk [vmem:[#allocation2 + $0x8] sm:$0xff] %vm225_vm0, %v7109_v0  ;;  %s4717_s26 = smov 8   ;;  %s4718_s27 = smov 12   ;;  %vm763_vm3 = vcmask 97344   ;;  %vm956_vm4 = vcmask 130144  }
   0xf   : > { %230 = vst.msk [vmem:[#allocation2 + $0x18] sm:$0xff] %vm225_vm0, %v7109_v0  ;;  %231 = vst.msk [vmem:[#allocation2 + $0x20] sm:$0xff] %vm225_vm0, %v7109_v0  ;;  %s7209_s19 = smov (!%p4770_p3, %s4455_s19), 1  ;;  %s4719_s28 = smov 16   ;;  %vm2096_vm5 = vcmask 1043456   ;;  %vm1149_vm6 = vcmask 162944  }
  0x10   : > { %233 = vst.msk [vmem:[#allocation2 + $0x30] sm:$0xff] %vm225_vm0, %v7109_v0  ;;  %234 = vst.msk [vmem:[#allocation2 + $0x38] sm:$0xff] %vm225_vm0, %v7109_v0  ;;  %s4533_s21 = sshll.u32 %s7209_s19, 8  ;;  %s4720_s29 = smov 20   ;;  %vm1342_vm7 = vcmask 195744   ;;  %vm1536_vm8 = vcmask 228544  }
  0x11   : > { %236 = vst.msk [vmem:[#allocation2 + $0x48] sm:$0xff] %vm225_vm0, %v7109_v0  ;;  %237 = vst.msk [vmem:[#allocation2 + $0x50] sm:$0xff] %vm225_vm0, %v7109_v0  ;;  %s4894_s24 = scalar_lea.vmem %s7103_s0, %s4533_s21  ;;  %s4721_s9 = smov 24   ;;  %vm1729_vm9 = vcmask 261344   ;;  %vm1922_vm10 = vcmask 294144   ;;  %vm1999_vm11 = vcmask 293888  }
  0x12   : > { %239 = vst.msk [vmem:[#allocation2 + $0x60] sm:$0xff] %vm225_vm0, %v7109_v0  ;;  %240 = vst.msk [vmem:[#allocation2 + $0x68] sm:$0xff] %vm225_vm0, %v7109_v0  ;;  %v281_v1 = vld [vmem:[%s4894_s24] sm:$0xff]  ;;  %v282_v2 = vld [vmem:[%s4894_s24 + $0x8] sm:$0xff]  ;;  %s4722_s14 = smov 28   ;;  %s4723_s17 = smov 32  }
  0x13   : > { %242 = vst.msk [vmem:[#allocation2 + $0x78] sm:$0xff] %vm225_vm0, %v7109_v0  ;;  %243 = vst.msk [vmem:[#allocation2 + $0x80] sm:$0xff] %vm225_vm0, %v7109_v0  ;;  %v283_v3 = vld [vmem:[%s4894_s24 + $0x10] sm:$0xff]  ;;  %v284_v4 = vld [vmem:[%s4894_s24 + $0x18] sm:$0xff]  ;;  %vm2357_vm12 = vcmask 130048   ;;  %vm2360_vm13 = vcmask 123904  }
  0x14   : > { %245 = vst.msk [vmem:[#allocation2 + $0x90] sm:$0xff] %vm225_vm0, %v7109_v0  ;;  %246 = vst.msk [vmem:[#allocation2 + $0x98] sm:$0xff] %vm225_vm0, %v7109_v0  ;;  %v285_v5 = vld [vmem:[%s4894_s24 + $0x20] sm:$0xff]  ;;  %v286_v6 = vld [vmem:[%s4894_s24 + $0x28] sm:$0xff]  ;;  %vm2670_vm14 = vcmask 261248   ;;  %s4726_s10 = smov 48  }
  0x15   : > { %248 = vst.msk [vmem:[#allocation2 + $0xa8] sm:$0xff] %vm225_vm0, %v7109_v0  ;;  %249 = vst.msk [vmem:[#allocation2 + $0xb0] sm:$0xff] %vm225_vm0, %v7109_v0  ;;  %v410_v7 = vld [vmem:[#allocation2 + $0x1] sm:$0xff]  ;;  %v287_v9 = vld [vmem:[%s4894_s24 + $0x30] sm:$0xff]  ;;  %s4727_s15 = smov 80   ;;  %s4728_s16 = smov 96  }
  0x16   : > { %251 = vst.msk [vmem:[#allocation2 + $0xc0] sm:$0xff] %vm225_vm0, %v7109_v0  ;;  %252 = vst.msk [vmem:[#allocation2 + $0xc8] sm:$0xff] %vm225_vm0, %v7109_v0  ;;  %474 = vrot.lane.b32.xlu0 %v410_v7, %s4716_s25  ;;  %v288_v10 = vld [vmem:[%s4894_s24 + $0x38] sm:$0xff]  ;;  %v289_v11 = vld [vmem:[%s4894_s24 + $0x40] sm:$0xff]  ;;  %s4729_s20 = smov 112   ;;  %vm2863_vm15 = vcmask 392448  }
  0x17   : > { %254 = vst.msk [vmem:[#allocation2 + $0xd8] sm:$0xff] %vm225_vm0, %v7109_v0  ;;  %255 = vst.msk [vmem:[#allocation2 + $0xe0] sm:$0xff] %vm225_vm0, %v7109_v0  ;;  %v290_v12 = vld [vmem:[%s4894_s24 + $0x48] sm:$0xff]  ;;  %v291_v13 = vld [vmem:[%s4894_s24 + $0x50] sm:$0xff] }
  0x18   : > { %257 = vst.msk [vmem:[#allocation2 + $0xf0] sm:$0xff] %vm225_vm0, %v7109_v0  ;;  %258 = vst.msk [vmem:[#allocation2 + $0xf8] sm:$0xff] %vm225_vm0, %v7109_v0  ;;  %v292_v14 = vld [vmem:[%s4894_s24 + $0x58] sm:$0xff]  ;;  %v293_v15 = vld [vmem:[%s4894_s24 + $0x60] sm:$0xff] }
  0x19   : > { %260 = vst.msk [vmem:[#allocation2 + $0x108] sm:$0xff] %vm225_vm0, %v7109_v0  ;;  %261 = vst.msk [vmem:[#allocation2 + $0x110] sm:$0xff] %vm225_vm0, %v7109_v0  ;;  %v294_v16 = vld [vmem:[%s4894_s24 + $0x68] sm:$0xff]  ;;  %v295_v17 = vld [vmem:[%s4894_s24 + $0x70] sm:$0xff] }
  0x1a   : > { %263 = vst.msk [vmem:[#allocation2 + $0x120] sm:$0xff] %vm225_vm0, %v7109_v0  ;;  %264 = vst.msk [vmem:[#allocation2 + $0x128] sm:$0xff] %vm225_vm0, %v7109_v0  ;;  %v296_v18 = vld [vmem:[%s4894_s24 + $0x78] sm:$0xff]  ;;  %v297_v19 = vld [vmem:[%s4894_s24 + $0x80] sm:$0xff] }
  0x1b   : > { %266 = vst.msk [vmem:[#allocation2 + $0x138] sm:$0xff] %vm225_vm0, %v7109_v0  ;;  %267 = vst.msk [vmem:[#allocation2 + $0x140] sm:$0xff] %vm225_vm0, %v7109_v0  ;;  %v298_v20 = vld [vmem:[%s4894_s24 + $0x88] sm:$0xff]  ;;  %v299_v21 = vld [vmem:[%s4894_s24 + $0x90] sm:$0xff] }
  0x1c   : > { %269 = vst.msk [vmem:[#allocation2 + $0x150] sm:$0xff] %vm225_vm0, %v7109_v0  ;;  %270 = vst.msk [vmem:[#allocation2 + $0x158] sm:$0xff] %vm225_vm0, %v7109_v0  ;;  %v300_v22 = vld [vmem:[%s4894_s24 + $0x98] sm:$0xff]  ;;  %v301_v23 = vld [vmem:[%s4894_s24 + $0xa0] sm:$0xff] }
  0x1d   : > { %272 = vst.msk [vmem:[#allocation2 + $0x168] sm:$0xff] %vm225_vm0, %v7109_v0  ;;  %273 = vst.msk [vmem:[#allocation2 + $0x170] sm:$0xff] %vm225_vm0, %v7109_v0  ;;  %v302_v24 = vld [vmem:[%s4894_s24 + $0xa8] sm:$0xff]  ;;  %v303_v28 = vld [vmem:[%s4894_s24 + $0xb0] sm:$0xff] }
  0x1e   : > { %275 = vst.msk [vmem:[#allocation2 + $0x180] sm:$0xff] %vm225_vm0, %v7109_v0  ;;  %276 = vst.msk [vmem:[#allocation2 + $0x188] sm:$0xff] %vm225_vm0, %v7109_v0  ;;  %v304_v29 = vld [vmem:[%s4894_s24 + $0xb8] sm:$0xff]  ;;  %v305_v33 = vld [vmem:[%s4894_s24 + $0xc0] sm:$0xff] }
  0x1f   : > { %278 = vst.msk [vmem:[#allocation2 + $0x198] sm:$0xff] %vm225_vm0, %v7109_v0  ;;  %279 = vst.msk [vmem:[#allocation2 + $0x1a0] sm:$0xff] %vm225_vm0, %v7109_v0  ;;  %v306_v34 = vld [vmem:[%s4894_s24 + $0xc8] sm:$0xff]  ;;  %v307_v35 = vld [vmem:[%s4894_s24 + $0xd0] sm:$0xff] }
  0x20   : > { %229 = vst.msk [vmem:[#allocation2 + $0x10] sm:$0x3] %vm228_vm1, %v7109_v0  ;;  %232 = vst.msk [vmem:[#allocation2 + $0x28] sm:$0x3] %vm228_vm1, %v7109_v0  ;;  %v308_v36 = vld [vmem:[%s4894_s24 + $0xd8] sm:$0xff]  ;;  %v309_v37 = vld [vmem:[%s4894_s24 + $0xe0] sm:$0xff] }
  0x21   : > { %235 = vst.msk [vmem:[#allocation2 + $0x40] sm:$0x3] %vm228_vm1, %v7109_v0  ;;  %238 = vst.msk [vmem:[#allocation2 + $0x58] sm:$0x3] %vm228_vm1, %v7109_v0  ;;  %v310_v38 = vld [vmem:[%s4894_s24 + $0xe8] sm:$0xff]  ;;  %v346_v45 = vld [vmem:[#allocation2] sm:$0xff] }
  0x22   : > { %241 = vst.msk [vmem:[#allocation2 + $0x70] sm:$0x3] %vm228_vm1, %v7109_v0  ;;  %244 = vst.msk [vmem:[#allocation2 + $0x88] sm:$0x3] %vm228_vm1, %v7109_v0  ;;  %v347_v48 = vld [vmem:[#allocation2 + $0x8] sm:$0xff] }
  0x23   : > { %247 = vst.msk [vmem:[#allocation2 + $0xa0] sm:$0x3] %vm228_vm1, %v7109_v0  ;;  %250 = vst.msk [vmem:[#allocation2 + $0xb8] sm:$0x3] %vm228_vm1, %v7109_v0 }
  0x24   : > { %253 = vst.msk [vmem:[#allocation2 + $0xd0] sm:$0x3] %vm228_vm1, %v7109_v0  ;;  %256 = vst.msk [vmem:[#allocation2 + $0xe8] sm:$0x3] %vm228_vm1, %v7109_v0 }
  0x25   : > { %259 = vst.msk [vmem:[#allocation2 + $0x100] sm:$0x3] %vm228_vm1, %v7109_v0  ;;  %262 = vst.msk [vmem:[#allocation2 + $0x118] sm:$0x3] %vm228_vm1, %v7109_v0 }
  0x26   : > { %265 = vst.msk [vmem:[#allocation2 + $0x130] sm:$0x3] %vm228_vm1, %v7109_v0  ;;  %268 = vst.msk [vmem:[#allocation2 + $0x148] sm:$0x3] %vm228_vm1, %v7109_v0 }
  0x27   : > { %271 = vst.msk [vmem:[#allocation2 + $0x160] sm:$0x3] %vm228_vm1, %v7109_v0  ;;  %274 = vst.msk [vmem:[#allocation2 + $0x178] sm:$0x3] %vm228_vm1, %v7109_v0  ;;  %v411_v8 = vld [vmem:[#allocation2 + $0x9] sm:$0xff] }
  0x28   : > { %277 = vst.msk [vmem:[#allocation2 + $0x190] sm:$0x3] %vm228_vm1, %v7109_v0  ;;  %280 = vst.msk [vmem:[#allocation2 + $0x1a8] sm:$0x3] %vm228_vm1, %v7109_v0  ;;  %476 = vrot.lane.b32.xlu0 %v411_v8, %s4716_s25  ;;  %vm3056_vm1 = vcmask 523648  }
  0x29   : > { %314 = vst.msk [vmem:[#allocation2 + $0x19] sm:$0xff] %vm225_vm0, %v281_v1  ;;  %315 = vst.msk [vmem:[#allocation2 + $0x21] sm:$0xff] %vm225_vm0, %v282_v2 }
  0x2a   : > { %316 = vst.msk [vmem:[#allocation2 + $0x31] sm:$0xff] %vm225_vm0, %v283_v3  ;;  %317 = vst.msk [vmem:[#allocation2 + $0x39] sm:$0xff] %vm225_vm0, %v284_v4 }
  0x2b   : > { %318 = vst.msk [vmem:[#allocation2 + $0x49] sm:$0xff] %vm225_vm0, %v285_v5  ;;  %319 = vst.msk [vmem:[#allocation2 + $0x51] sm:$0xff] %vm225_vm0, %v286_v6 }
  0x2c   : > { %320 = vst.msk [vmem:[#allocation2 + $0x61] sm:$0xff] %vm225_vm0, %v287_v9  ;;  %321 = vst.msk [vmem:[#allocation2 + $0x69] sm:$0xff] %vm225_vm0, %v288_v10 }
  0x2d   : > { %322 = vst.msk [vmem:[#allocation2 + $0x79] sm:$0xff] %vm225_vm0, %v289_v11  ;;  %323 = vst.msk [vmem:[#allocation2 + $0x81] sm:$0xff] %vm225_vm0, %v290_v12 }
  0x2e   : > { %324 = vst.msk [vmem:[#allocation2 + $0x91] sm:$0xff] %vm225_vm0, %v291_v13  ;;  %325 = vst.msk [vmem:[#allocation2 + $0x99] sm:$0xff] %vm225_vm0, %v292_v14 }
  0x2f   : > { %326 = vst.msk [vmem:[#allocation2 + $0xa9] sm:$0xff] %vm225_vm0, %v293_v15  ;;  %327 = vst.msk [vmem:[#allocation2 + $0xb1] sm:$0xff] %vm225_vm0, %v294_v16 }
  0x30   : > { %328 = vst.msk [vmem:[#allocation2 + $0xc1] sm:$0xff] %vm225_vm0, %v295_v17  ;;  %329 = vst.msk [vmem:[#allocation2 + $0xc9] sm:$0xff] %vm225_vm0, %v296_v18  ;;  %v4939_v25 = vld [vmem:[#allocation2 + $0x19] sm:$0xff]  ;;  %v4948_v27 = vld [vmem:[#allocation2 + $0x21] sm:$0xff] }
  0x31   : > { %330 = vst.msk [vmem:[#allocation2 + $0xd9] sm:$0xff] %vm225_vm0, %v297_v19  ;;  %331 = vst.msk [vmem:[#allocation2 + $0xe1] sm:$0xff] %vm225_vm0, %v298_v20  ;;  %v4941_v26 = vld [vmem:[#allocation2 + $0x31] sm:$0xff]  ;;  %478 = vrot.lane.b32.xlu1 %v4939_v25, %s4716_s25  ;;  %v4960_v31 = vld [vmem:[#allocation2 + $0x39] sm:$0xff] }
  0x32   : > { %332 = vst.msk [vmem:[#allocation2 + $0xf1] sm:$0xff] %vm225_vm0, %v299_v21  ;;  %333 = vst.msk [vmem:[#allocation2 + $0xf9] sm:$0xff] %vm225_vm0, %v300_v22  ;;  %482 = vrot.lane.b32.xlu0 %v4941_v26, %s4716_s25  ;;  %v4956_v30 = vld [vmem:[#allocation2 + $0x49] sm:$0xff]  ;;  %v4977_v39 = vld [vmem:[#allocation2 + $0x51] sm:$0xff] }
  0x33   : > { %334 = vst.msk [vmem:[#allocation2 + $0x109] sm:$0xff] %vm225_vm0, %v301_v23  ;;  %335 = vst.msk [vmem:[#allocation2 + $0x111] sm:$0xff] %vm225_vm0, %v302_v24  ;;  %v4964_v32 = vld [vmem:[#allocation2 + $0x61] sm:$0xff]  ;;  %v4988_v41 = vld [vmem:[#allocation2 + $0x69] sm:$0xff] }
  0x34   : > { %336 = vst.msk [vmem:[#allocation2 + $0x121] sm:$0xff] %vm225_vm0, %v303_v28  ;;  %337 = vst.msk [vmem:[#allocation2 + $0x129] sm:$0xff] %vm225_vm0, %v304_v29  ;;  %v4984_v40 = vld [vmem:[#allocation2 + $0x79] sm:$0xff]  ;;  %v4996_v43 = vld [vmem:[#allocation2 + $0x81] sm:$0xff] }
  0x35   : > { %480 = vrot.lane.b32.xlu1 %v4948_v27, %s4716_s25  ;;  %338 = vst.msk [vmem:[#allocation2 + $0x139] sm:$0xff] %vm225_vm0, %v305_v33  ;;  %339 = vst.msk [vmem:[#allocation2 + $0x141] sm:$0xff] %vm225_vm0, %v306_v34  ;;  %v4992_v42 = vld [vmem:[#allocation2 + $0x91] sm:$0xff]  ;;  %v5004_v46 = vld [vmem:[#allocation2 + $0x99] sm:$0xff] }
  0x36   : > { %486 = vrot.lane.b32.xlu0 %v4956_v30, %s4716_s25  ;;  %340 = vst.msk [vmem:[#allocation2 + $0x151] sm:$0xff] %vm225_vm0, %v307_v35  ;;  %341 = vst.msk [vmem:[#allocation2 + $0x159] sm:$0xff] %vm225_vm0, %v308_v36  ;;  %v5000_v44 = vld [vmem:[#allocation2 + $0xa9] sm:$0xff]  ;;  %v5007_v47 = vld [vmem:[#allocation2 + $0x18] sm:$0xff] }
  0x37   : > { %342 = vst.msk [vmem:[#allocation2 + $0x169] sm:$0xff] %vm225_vm0, %v309_v37  ;;  %343 = vst.msk [vmem:[#allocation2 + $0x171] sm:$0xff] %vm225_vm0, %v310_v38  ;;  %v5014_v49 = vld [vmem:[#allocation2 + $0x20] sm:$0xff]  ;;  %v5016_v50 = vld [vmem:[#allocation2 + $0x30] sm:$0xff] }
  0x38   : > { %378 = vst.msk [vmem:[#allocation3] sm:$0xff] %vm225_vm0, %v346_v45  ;;  %380 = vst.msk [vmem:[#allocation3 + $0x10] sm:$0xff] %vm225_vm0, %v5007_v47  ;;  %v5018_v51 = vld [vmem:[#allocation2 + $0xc1] sm:$0xff]  ;;  %v5024_v52 = vld [vmem:[#allocation2 + $0x38] sm:$0xff] }
  0x39   : > { %484 = vrot.lane.b32.xlu1 %v4960_v31, %s4716_s25  ;;  %379 = vst.msk [vmem:[#allocation3 + $0x8] sm:$0xff] %vm225_vm0, %v347_v48  ;;  %381 = vst.msk [vmem:[#allocation3 + $0x18] sm:$0xff] %vm225_vm0, %v5014_v49  ;;  %v5028_v53 = vld [vmem:[#allocation2 + $0xb1] sm:$0xff]  ;;  %v5032_v54 = vld [vmem:[#allocation2 + $0x48] sm:$0xff] }
  0x3a   : > { %490 = vrot.lane.b32.xlu0 %v4964_v32, %s4716_s25  ;;  %382 = vst.msk [vmem:[#allocation3 + $0x20] sm:$0xff] %vm225_vm0, %v5016_v50  ;;  %383 = vst.msk [vmem:[#allocation3 + $0x28] sm:$0xff] %vm225_vm0, %v5024_v52  ;;  %v5034_v55 = vld [vmem:[#allocation2 + $0x50] sm:$0xff]  ;;  %v5036_v56 = vld [vmem:[#allocation2 + $0xd9] sm:$0xff] }
  0x3b   : > { %384 = vst.msk [vmem:[#allocation3 + $0x30] sm:$0xff] %vm225_vm0, %v5032_v54  ;;  %385 = vst.msk [vmem:[#allocation3 + $0x38] sm:$0xff] %vm225_vm0, %v5034_v55  ;;  %v5042_v57 = vld [vmem:[#allocation2 + $0x60] sm:$0xff]  ;;  %v5044_v58 = vld [vmem:[#allocation2 + $0x68] sm:$0xff] }
  0x3c   : > { %v5046_v59 = vld [vmem:[#allocation2 + $0x78] sm:$0xff]  ;;  %386 = vst.msk [vmem:[#allocation3 + $0x40] sm:$0xff] %vm225_vm0, %v5042_v57  ;;  %387 = vst.msk [vmem:[#allocation3 + $0x48] sm:$0xff] %vm225_vm0, %v5044_v58  ;;  %v5056_v60 = vld [vmem:[#allocation2 + $0x80] sm:$0xff] }
  0x3d   : > { %488 = vrot.lane.b32.xlu1 %v4977_v39, %s4716_s25  ;;  %388 = vst.msk [vmem:[#allocation3 + $0x50] sm:$0xff] %vm225_vm0, %v5046_v59  ;;  %v5058_v61 = vld [vmem:[#allocation2 + $0x90] sm:$0xff]  ;;  %v5060_v62 = vld [vmem:[#allocation2 + $0x98] sm:$0xff]  ;;  %389 = vst.msk [vmem:[#allocation3 + $0x58] sm:$0xff] %vm225_vm0, %v5056_v60 }
  0x3e   : > { %494 = vrot.lane.b32.xlu0 %v4984_v40, %s4716_s25  ;;  %v5062_v63 = vld [vmem:[#allocation2 + $0xc9] sm:$0xff]  ;;  %390 = vst.msk [vmem:[#allocation3 + $0x60] sm:$0xff] %vm225_vm0, %v5058_v61  ;;  %391 = vst.msk [vmem:[#allocation3 + $0x68] sm:$0xff] %vm225_vm0, %v5060_v62  ;;  %v5074_v3 = vld [vmem:[#allocation2 + $0xc0] sm:$0xff] }
  0x3f   : > { %v5070_v1 = vld [vmem:[#allocation2 + $0xa8] sm:$0xff]  ;;  %v5072_v2 = vld [vmem:[#allocation2 + $0xb0] sm:$0xff]  ;;  %394 = vst.msk [vmem:[#allocation3 + $0x80] sm:$0xff] %vm225_vm0, %v5074_v3  ;;  %v5086_v5 = vld [vmem:[#allocation2 + $0xd8] sm:$0xff] }
  0x40   : > { %392 = vst.msk [vmem:[#allocation3 + $0x70] sm:$0xff] %vm225_vm0, %v5070_v1  ;;  %393 = vst.msk [vmem:[#allocation3 + $0x78] sm:$0xff] %vm225_vm0, %v5072_v2  ;;  %v5084_v4 = vld [vmem:[#allocation2 + $0xc8] sm:$0xff]  ;;  %v5088_v6 = vld [vmem:[#allocation2 + $0xe0] sm:$0xff] }
  0x41   : > { %492 = vrot.lane.b32.xlu1 %v4988_v41, %s4716_s25  ;;  %395 = vst.msk [vmem:[#allocation3 + $0x88] sm:$0xff] %vm225_vm0, %v5084_v4  ;;  %396 = vst.msk [vmem:[#allocation3 + $0x90] sm:$0xff] %vm225_vm0, %v5086_v5  ;;  %v5096_v7 = vld [vmem:[#allocation2 + $0xf0] sm:$0xff]  ;;  %v5098_v8 = vld [vmem:[#allocation2 + $0xf8] sm:$0xff] }
  0x42   : > { %498 = vrot.lane.b32.xlu0 %v4992_v42, %s4716_s25  ;;  %397 = vst.msk [vmem:[#allocation3 + $0x98] sm:$0xff] %vm225_vm0, %v5088_v6  ;;  %v5100_v9 = vld [vmem:[#allocation2 + $0x108] sm:$0xff]  ;;  %398 = vst.msk [vmem:[#allocation3 + $0xa0] sm:$0xff] %vm225_vm0, %v5096_v7  ;;  %v5110_v10 = vld [vmem:[#allocation2 + $0x110] sm:$0xff] }
  0x43   : > { %399 = vst.msk [vmem:[#allocation3 + $0xa8] sm:$0xff] %vm225_vm0, %v5098_v8  ;;  %400 = vst.msk [vmem:[#allocation3 + $0xb0] sm:$0xff] %vm225_vm0, %v5100_v9  ;;  %v5112_v11 = vld [vmem:[#allocation2 + $0xf1] sm:$0xff]  ;;  %v5116_v12 = vld [vmem:[#allocation2 + $0x120] sm:$0xff] }
  0x44   : > { %401 = vst.msk [vmem:[#allocation3 + $0xb8] sm:$0xff] %vm225_vm0, %v5110_v10  ;;  %402 = vst.msk [vmem:[#allocation3 + $0xc0] sm:$0xff] %vm225_vm0, %v5116_v12  ;;  %v5122_v13 = vld [vmem:[#allocation2 + $0x128] sm:$0xff]  ;;  %v5132_v16 = vld [vmem:[#allocation2 + $0x138] sm:$0xff] }
  0x45   : > { %496 = vrot.lane.b32.xlu1 %v4996_v43, %s4716_s25  ;;  %v5124_v14 = vld [vmem:[#allocation2 + $0xe1] sm:$0xff]  ;;  %403 = vst.msk [vmem:[#allocation3 + $0xc8] sm:$0xff] %vm225_vm0, %v5122_v13  ;;  %v5130_v15 = vld [vmem:[#allocation2 + $0x109] sm:$0xff]  ;;  %404 = vst.msk [vmem:[#allocation3 + $0xd0] sm:$0xff] %vm225_vm0, %v5132_v16 }
  0x46   : > { %502 = vrot.lane.b32.xlu0 %v5000_v44, %s4716_s25  ;;  %v5138_v17 = vld [vmem:[#allocation2 + $0x140] sm:$0xff]  ;;  %v5148_v20 = vld [vmem:[#allocation2 + $0x150] sm:$0xff]  ;;  %v5154_v21 = vld [vmem:[#allocation2 + $0x158] sm:$0xff] }
  0x47   : > { %v5140_v18 = vld [vmem:[#allocation2 + $0xf9] sm:$0xff]  ;;  %405 = vst.msk [vmem:[#allocation3 + $0xd8] sm:$0xff] %vm225_vm0, %v5138_v17  ;;  %v5146_v19 = vld [vmem:[#allocation2 + $0x121] sm:$0xff]  ;;  %406 = vst.msk [vmem:[#allocation3 + $0xe0] sm:$0xff] %vm225_vm0, %v5148_v20 }
  0x48   : > { %v5156_v22 = vld [vmem:[#allocation2 + $0x111] sm:$0xff]  ;;  %407 = vst.msk [vmem:[#allocation3 + $0xe8] sm:$0xff] %vm225_vm0, %v5154_v21  ;;  %v5162_v23 = vld [vmem:[#allocation2 + $0x139] sm:$0xff]  ;;  %v5164_v24 = vld [vmem:[#allocation2 + $0x168] sm:$0xff] }
  0x49   : > { %500 = vrot.lane.b32.xlu1 %v5004_v46, %s4716_s25  ;;  %408 = vst.msk [vmem:[#allocation3 + $0xf0] sm:$0xff] %vm225_vm0, %v5164_v24  ;;  %v5170_v28 = vld [vmem:[#allocation2 + $0x170] sm:$0xff]  ;;  %v5182_v34 = vld [vmem:[#allocation2 + $0x141] sm:$0xff]  ;;  %v312_v37 = vld [vmem:[%s4894_s24 + $0xf8] sm:$0xff] }
  0x4a   : > { %506 = vrot.lane.b32.xlu0 %v5018_v51, %s4716_s25  ;;  %v5172_v29 = vld [vmem:[#allocation2 + $0x129] sm:$0xff]  ;;  %409 = vst.msk [vmem:[#allocation3 + $0xf8] sm:$0xff] %vm225_vm0, %v5170_v28  ;;  %v5178_v33 = vld [vmem:[#allocation2 + $0x151] sm:$0xff]  ;;  %7153 = vst [vmem:[#allocation7_spill] sm:$0xff] %v5182_v34 }
  0x4b   : > { %7152 = vst [vmem:[#allocation6_spill] sm:$0xff] %v5178_v33  ;;  %v311_v35 = vld [vmem:[%s4894_s24 + $0xf0] sm:$0xff]  ;;  %345 = vst.msk [vmem:[#allocation2 + $0x189] sm:$0xff] %vm225_vm0, %v312_v37  ;;  %v5194_v38 = vld [vmem:[#allocation2 + $0x159] sm:$0xff] }
  0x4c   : > { %344 = vst.msk [vmem:[#allocation2 + $0x181] sm:$0xff] %vm225_vm0, %v311_v35  ;;  %v5188_v36 = vld [vmem:[#allocation2 + $0x169] sm:$0xff]  ;;  %7155 = vst [vmem:[#allocation9_spill] sm:$0xff] %v5194_v38  ;;  %v5200_v48 = vld [vmem:[#allocation2 + $0x171] sm:$0xff] }
  0x4d   : > { %504 = vrot.lane.b32.xlu1 %v5028_v53, %s4716_s25  ;;  %7154 = vst [vmem:[#allocation8_spill] sm:$0xff] %v5188_v36  ;;  %v603_v45 = vld [vmem:[#allocation2 + $0x2] sm:$0xff]  ;;  %7156 = vst [vmem:[#allocation10_spill] sm:$0xff] %v5200_v48  ;;  %v5203_v35 = vld [vmem:[#allocation2 + $0x1a] sm:$0xff] }
  0x4e   : > { %510 = vrot.lane.b32.xlu0 %v5036_v56, %s4716_s25  ;;  %7157 = vst [vmem:[#allocation11_spill] sm:$0xff] %v5203_v35  ;;  %v604_v37 = vld [vmem:[#allocation2 + $0xa] sm:$0xff]  ;;  %v5209_v0 = vld [vmem:[#allocation2 + $0x32] sm:$0xff] }
  0x4f   : > { %7158 = vst [vmem:[#allocation12_spill] sm:$0xff] %v5209_v0 }
  0x51   : > { %508 = vrot.lane.b32.xlu1 %v5062_v63, %s4716_s25 }
  0x52   : > { %514 = vrot.lane.b32.xlu0 %v5112_v11, %s4716_s25 }
  0x55   : > { %512 = vrot.lane.b32.xlu1 %v5124_v14, %s4716_s25 }
  0x56   : > { %518 = vrot.lane.b32.xlu0 %v5130_v15, %s4716_s25 }
  0x59   : > { %516 = vrot.lane.b32.xlu1 %v5140_v18, %s4716_s25 }
  0x5a   : > { %522 = vrot.lane.b32.xlu0 %v5146_v19, %s4716_s25 }
  0x5d   : > { %520 = vrot.lane.b32.xlu1 %v5156_v22, %s4716_s25 }
  0x5e   : > { %526 = vrot.lane.b32.xlu0 %v5162_v23, %s4716_s25 }
  0x61   : > { %524 = vrot.lane.b32.xlu1 %v5172_v29, %s4716_s25 }
  0x62   : > { %530 = vrot.lane.b32.xlu0 %v5178_v33, %s4716_s25  ;;  %v624_v33 = vld [vmem:[#allocation2 + $0xfa] sm:$0xff] }
  0x65   : > { %528 = vrot.lane.b32.xlu1 %v5182_v34, %s4716_s25  ;;  %v620_v34 = vld [vmem:[#allocation2 + $0xca] sm:$0xff] }
  0x66   : > { %534 = vrot.lane.b32.xlu0 %v5188_v36, %s4716_s25  ;;  %v5212_v36 = vld [vmem:[#allocation2 + $0x22] sm:$0xff] }
  0x67   : > { %7159 = vst [vmem:[#allocation13_spill] sm:$0xff] %v5212_v36 }
  0x69   : > { %532 = vrot.lane.b32.xlu1 %v5194_v38, %s4716_s25  ;;  %v5216_v38 = vld [vmem:[#allocation2 + $0x4a] sm:$0xff] }
  0x6a   : > { %667 = vrot.lane.b32.xlu0 %v603_v45, %s4717_s26  ;;  %7160 = vst [vmem:[#allocation14_spill] sm:$0xff] %v5216_v38  ;;  %v5220_v45 = vld [vmem:[#allocation2 + $0x3a] sm:$0xff] }
  0x6b   : > { %7161 = vst [vmem:[#allocation15_spill] sm:$0xff] %v5220_v45 }
  0x6d   : > { %536 = vrot.lane.b32.xlu1 %v5200_v48, %s4716_s25  ;;  %v619_v48 = vld [vmem:[#allocation2 + $0xc2] sm:$0xff] }
  0x6e   : > { %671 = vrot.lane.b32.xlu0 %v5203_v35, %s4717_s26  ;;  %v5224_v35 = vld [vmem:[#allocation2 + $0x62] sm:$0xff] }
  0x6f   : > { %7162 = vst [vmem:[#allocation16_spill] sm:$0xff] %v5224_v35 }
  0x71   : > { %669 = vrot.lane.b32.xlu1 %v604_v37, %s4717_s26  ;;  %v5228_v37 = vld [vmem:[#allocation2 + $0x52] sm:$0xff] }
  0x72   : > { %675 = vrot.lane.b32.xlu0 %v5209_v0, %s4717_s26  ;;  %7163 = vst [vmem:[#allocation17_spill] sm:$0xff] %v5228_v37  ;;  %v5232_v0 = vld [vmem:[#allocation2 + $0x7a] sm:$0xff] }
  0x73   : > { %7164 = vst [vmem:[#allocation18_spill] sm:$0xff] %v5232_v0 }
  0x75   : > { %673 = vrot.lane.b32.xlu1 %v5212_v36, %s4717_s26  ;;  %v5236_v36 = vld [vmem:[#allocation2 + $0x6a] sm:$0xff] }
  0x76   : > { %679 = vrot.lane.b32.xlu0 %v5216_v38, %s4717_s26  ;;  %7165 = vst [vmem:[#allocation19_spill] sm:$0xff] %v5236_v36  ;;  %v5240_v38 = vld [vmem:[#allocation2 + $0x92] sm:$0xff] }
  0x77   : > { %7166 = vst [vmem:[#allocation20_spill] sm:$0xff] %v5240_v38 }
  0x79   : > { %677 = vrot.lane.b32.xlu1 %v5220_v45, %s4717_s26  ;;  %v5244_v45 = vld [vmem:[#allocation2 + $0x82] sm:$0xff] }
  0x7a   : > { %683 = vrot.lane.b32.xlu0 %v5224_v35, %s4717_s26  ;;  %7167 = vst [vmem:[#allocation21_spill] sm:$0xff] %v5244_v45  ;;  %v617_v35 = vld [vmem:[#allocation2 + $0xaa] sm:$0xff] }
  0x7d   : > { %681 = vrot.lane.b32.xlu1 %v5228_v37, %s4717_s26  ;;  %v5250_v37 = vld [vmem:[#allocation2 + $0x9a] sm:$0xff] }
  0x7e   : > { %687 = vrot.lane.b32.xlu0 %v5232_v0, %s4717_s26  ;;  %7168 = vst [vmem:[#allocation22_spill] sm:$0xff] %v5250_v37  ;;  %v618_v0 = vld [vmem:[#allocation2 + $0xb2] sm:$0xff] }
  0x81   : > { %685 = vrot.lane.b32.xlu1 %v5236_v36, %s4717_s26  ;;  %v621_v36 = vld [vmem:[#allocation2 + $0xda] sm:$0xff] }
  0x82   : > { %691 = vrot.lane.b32.xlu0 %v5240_v38, %s4717_s26  ;;  %v623_v38 = vld [vmem:[#allocation2 + $0xf2] sm:$0xff] }
  0x85   : > { %689 = vrot.lane.b32.xlu1 %v5244_v45, %s4717_s26  ;;  %v622_v45 = vld [vmem:[#allocation2 + $0xe2] sm:$0xff] }
  0x86   : > { %695 = vrot.lane.b32.xlu0 %v617_v35, %s4717_s26  ;;  %v625_v35 = vld [vmem:[#allocation2 + $0x10a] sm:$0xff] }
  0x89   : > { %693 = vrot.lane.b32.xlu1 %v5250_v37, %s4717_s26  ;;  %v627_v37 = vld [vmem:[#allocation2 + $0x122] sm:$0xff] }
  0x8a   : > { %699 = vrot.lane.b32.xlu0 %v619_v48, %s4717_s26  ;;  %v626_v48 = vld [vmem:[#allocation2 + $0x112] sm:$0xff] }
  0x8d   : > { %697 = vrot.lane.b32.xlu1 %v618_v0, %s4717_s26  ;;  %v629_v0 = vld [vmem:[#allocation2 + $0x13a] sm:$0xff] }
  0x8e   : > { %703 = vrot.lane.b32.xlu0 %v621_v36, %s4717_s26  ;;  %v628_v36 = vld [vmem:[#allocation2 + $0x12a] sm:$0xff] }
  0x91   : > { %701 = vrot.lane.b32.xlu1 %v620_v34, %s4717_s26  ;;  %v475_v34 = vpop.permute.xlu0 %474 }
  0x92   : > { %707 = vrot.lane.b32.xlu0 %v623_v38, %s4717_s26  ;;  %571 = vst.msk [vmem:[#allocation3] sm:$0xff] %vm570_vm2, %v475_v34  ;;  %v631_v38 = vld [vmem:[#allocation2 + $0x152] sm:$0xff]  ;;  %v632_v34 = vld [vmem:[#allocation2 + $0x15a] sm:$0xff] }
  0x95   : > { %705 = vrot.lane.b32.xlu1 %v622_v45, %s4717_s26 }
  0x96   : > { %711 = vrot.lane.b32.xlu0 %v625_v35, %s4717_s26 }
  0x99   : > { %709 = vrot.lane.b32.xlu1 %v624_v33, %s4717_s26  ;;  %v630_v33 = vld [vmem:[#allocation2 + $0x142] sm:$0xff] }
  0x9a   : > { %715 = vrot.lane.b32.xlu0 %v627_v37, %s4717_s26  ;;  %v477_v45 = vpop.permute.xlu0 %476  ;;  %v633_v37 = vld [vmem:[#allocation2 + $0x16a] sm:$0xff] }
  0x9b   : > { %572 = vst.msk [vmem:[#allocation3 + $0x8] sm:$0xff] %vm570_vm2, %v477_v45 }
  0x9d   : > { %713 = vrot.lane.b32.xlu1 %v626_v48, %s4717_s26 }
  0x9e   : > { %719 = vrot.lane.b32.xlu0 %v629_v0, %s4717_s26 }
  0xa1   : > { %717 = vrot.lane.b32.xlu1 %v628_v36, %s4717_s26 }
  0xa2   : > { %723 = vrot.lane.b32.xlu0 %v631_v38, %s4717_s26  ;;  %v634_v38 = vld [vmem:[#allocation2 + $0x172] sm:$0xff] }
  0xa3   : > { %v479_v35 = vpop.permute.xlu1 %478 }
  0xa4   : > { %573 = vst.msk [vmem:[#allocation3 + $0x10] sm:$0xff] %vm570_vm2, %v479_v35  ;;  %v483_v48 = vpop.permute.xlu0 %482 }
  0xa5   : > { %721 = vrot.lane.b32.xlu1 %v630_v33, %s4717_s26  ;;  %575 = vst.msk [vmem:[#allocation3 + $0x20] sm:$0xff] %vm570_vm2, %v483_v48 }
  0xa6   : > { %727 = vrot.lane.b32.xlu0 %v633_v37, %s4717_s26 }
  0xa7   : > { %v481_v0 = vpop.permute.xlu1 %480 }
  0xa8   : > { %574 = vst.msk [vmem:[#allocation3 + $0x18] sm:$0xff] %vm570_vm2, %v481_v0  ;;  %v487_v36 = vpop.permute.xlu0 %486 }
  0xa9   : > { %725 = vrot.lane.b32.xlu1 %v632_v34, %s4717_s26  ;;  %577 = vst.msk [vmem:[#allocation3 + $0x30] sm:$0xff] %vm570_vm2, %v487_v36 }
  0xaa   : > { %860 = vrot.lane.b32.xlu0 %v5007_v47, %s4718_s27 }
  0xab   : > { %v485_v45 = vpop.permute.xlu1 %484 }
  0xac   : > { %576 = vst.msk [vmem:[#allocation3 + $0x28] sm:$0xff] %vm570_vm2, %v485_v45  ;;  %v491_v33 = vpop.permute.xlu0 %490 }
  0xad   : > { %729 = vrot.lane.b32.xlu1 %v634_v38, %s4717_s26  ;;  %579 = vst.msk [vmem:[#allocation3 + $0x40] sm:$0xff] %vm570_vm2, %v491_v33 }
  0xae   : > { %864 = vrot.lane.b32.xlu0 %v5016_v50, %s4718_s27 }
  0xaf   : > { %v489_v35 = vpop.permute.xlu1 %488 }
  0xb0   : > { %578 = vst.msk [vmem:[#allocation3 + $0x38] sm:$0xff] %vm570_vm2, %v489_v35  ;;  %v495_v37 = vpop.permute.xlu0 %494 }
  0xb1   : > { %862 = vrot.lane.b32.xlu1 %v5014_v49, %s4718_s27  ;;  %581 = vst.msk [vmem:[#allocation3 + $0x50] sm:$0xff] %vm570_vm2, %v495_v37 }
  0xb2   : > { %868 = vrot.lane.b32.xlu0 %v5032_v54, %s4718_s27 }
  0xb3   : > { %v493_v47 = vpop.permute.xlu1 %492 }
  0xb4   : > { %580 = vst.msk [vmem:[#allocation3 + $0x48] sm:$0xff] %vm570_vm2, %v493_v47  ;;  %v499_v48 = vpop.permute.xlu0 %498 }
  0xb5   : > { %866 = vrot.lane.b32.xlu1 %v5024_v52, %s4718_s27  ;;  %583 = vst.msk [vmem:[#allocation3 + $0x60] sm:$0xff] %vm570_vm2, %v499_v48 }
  0xb6   : > { %872 = vrot.lane.b32.xlu0 %v5042_v57, %s4718_s27 }
  0xb7   : > { %v497_v34 = vpop.permute.xlu1 %496 }
  0xb8   : > { %582 = vst.msk [vmem:[#allocation3 + $0x58] sm:$0xff] %vm570_vm2, %v497_v34  ;;  %v503_v49 = vpop.permute.xlu0 %502 }
  0xb9   : > { %870 = vrot.lane.b32.xlu1 %v5034_v55, %s4718_s27  ;;  %585 = vst.msk [vmem:[#allocation3 + $0x70] sm:$0xff] %vm570_vm2, %v503_v49 }
  0xba   : > { %876 = vrot.lane.b32.xlu0 %v5046_v59, %s4718_s27 }
  0xbb   : > { %v501_v0 = vpop.permute.xlu1 %500 }
  0xbc   : > { %584 = vst.msk [vmem:[#allocation3 + $0x68] sm:$0xff] %vm570_vm2, %v501_v0  ;;  %v507_v36 = vpop.permute.xlu0 %506 }
  0xbd   : > { %874 = vrot.lane.b32.xlu1 %v5044_v58, %s4718_s27  ;;  %587 = vst.msk [vmem:[#allocation3 + $0x80] sm:$0xff] %vm570_vm2, %v507_v36 }
  0xbe   : > { %880 = vrot.lane.b32.xlu0 %v5058_v61, %s4718_s27 }
  0xbf   : > { %v505_v38 = vpop.permute.xlu1 %504 }
  0xc0   : > { %586 = vst.msk [vmem:[#allocation3 + $0x78] sm:$0xff] %vm570_vm2, %v505_v38  ;;  %v511_v45 = vpop.permute.xlu0 %510 }
  0xc1   : > { %878 = vrot.lane.b32.xlu1 %v5056_v60, %s4718_s27  ;;  %589 = vst.msk [vmem:[#allocation3 + $0x90] sm:$0xff] %vm570_vm2, %v511_v45 }
  0xc2   : > { %884 = vrot.lane.b32.xlu0 %v5070_v1, %s4718_s27 }
  0xc3   : > { %v509_v33 = vpop.permute.xlu1 %508 }
  0xc4   : > { %588 = vst.msk [vmem:[#allocation3 + $0x88] sm:$0xff] %vm570_vm2, %v509_v33  ;;  %v515_v35 = vpop.permute.xlu0 %514 }
  0xc5   : > { %882 = vrot.lane.b32.xlu1 %v5060_v62, %s4718_s27  ;;  %591 = vst.msk [vmem:[#allocation3 + $0xa0] sm:$0xff] %vm570_vm2, %v515_v35 }
  0xc6   : > { %888 = vrot.lane.b32.xlu0 %v5074_v3, %s4718_s27 }
  0xc7   : > { %v513_v37 = vpop.permute.xlu1 %512 }
  0xc8   : > { %590 = vst.msk [vmem:[#allocation3 + $0x98] sm:$0xff] %vm570_vm2, %v513_v37  ;;  %v519_v47 = vpop.permute.xlu0 %518 }
  0xc9   : > { %886 = vrot.lane.b32.xlu1 %v5072_v2, %s4718_s27  ;;  %593 = vst.msk [vmem:[#allocation3 + $0xb0] sm:$0xff] %vm570_vm2, %v519_v47 }
  0xca   : > { %892 = vrot.lane.b32.xlu0 %v5086_v5, %s4718_s27 }
  0xcb   : > { %v517_v48 = vpop.permute.xlu1 %516 }
  0xcc   : > { %592 = vst.msk [vmem:[#allocation3 + $0xa8] sm:$0xff] %vm570_vm2, %v517_v48  ;;  %v523_v34 = vpop.permute.xlu0 %522 }
  0xcd   : > { %890 = vrot.lane.b32.xlu1 %v5084_v4, %s4718_s27  ;;  %595 = vst.msk [vmem:[#allocation3 + $0xc0] sm:$0xff] %vm570_vm2, %v523_v34 }
  0xce   : > { %896 = vrot.lane.b32.xlu0 %v5096_v7, %s4718_s27 }
  0xcf   : > { %v521_v49 = vpop.permute.xlu1 %520 }
  0xd0   : > { %594 = vst.msk [vmem:[#allocation3 + $0xb8] sm:$0xff] %vm570_vm2, %v521_v49  ;;  %v527_v0 = vpop.permute.xlu0 %526  ;;  %v7169_v49 = vld [vmem:[#allocation6_spill] sm:$0xff] }
  0xd1   : > { %894 = vrot.lane.b32.xlu1 %v5088_v6, %s4718_s27  ;;  %597 = vst.msk [vmem:[#allocation3 + $0xd0] sm:$0xff] %vm570_vm2, %v527_v0 }
  0xd2   : > { %900 = vrot.lane.b32.xlu0 %v5100_v9, %s4718_s27 }
  0xd3   : > { %v525_v36 = vpop.permute.xlu1 %524 }
  0xd4   : > { %596 = vst.msk [vmem:[#allocation3 + $0xc8] sm:$0xff] %vm570_vm2, %v525_v36  ;;  %v531_v38 = vpop.permute.xlu0 %530  ;;  %v7171_v36 = vld [vmem:[#allocation8_spill] sm:$0xff] }
  0xd5   : > { %898 = vrot.lane.b32.xlu1 %v5098_v8, %s4718_s27  ;;  %599 = vst.msk [vmem:[#allocation3 + $0xe0] sm:$0xff] %vm570_vm2, %v531_v38  ;;  %v7172_v38 = vld [vmem:[#allocation9_spill] sm:$0xff] }
  0xd6   : > { %904 = vrot.lane.b32.xlu0 %v5116_v12, %s4718_s27 }
  0xd7   : > { %v529_v45 = vpop.permute.xlu1 %528 }
  0xd8   : > { %598 = vst.msk [vmem:[#allocation3 + $0xd8] sm:$0xff] %vm570_vm2, %v529_v45  ;;  %v535_v33 = vpop.permute.xlu0 %534 }
  0xd9   : > { %902 = vrot.lane.b32.xlu1 %v5110_v10, %s4718_s27  ;;  %601 = vst.msk [vmem:[#allocation3 + $0xf0] sm:$0xff] %vm570_vm2, %v535_v33 }
  0xda   : > { %908 = vrot.lane.b32.xlu0 %v5132_v16, %s4718_s27 }
  0xdb   : > { %v533_v9 = vpop.permute.xlu1 %532 }
  0xdc   : > { %600 = vst.msk [vmem:[#allocation3 + $0xe8] sm:$0xff] %vm570_vm2, %v533_v9  ;;  %v668_v35 = vpop.permute.xlu0 %667  ;;  %v7173_v9 = vld [vmem:[#allocation10_spill] sm:$0xff] }
  0xdd   : > { %906 = vrot.lane.b32.xlu1 %v5122_v13, %s4718_s27  ;;  %764 = vst.msk [vmem:[#allocation3] sm:$0xff] %vm763_vm3, %v668_v35  ;;  %v826_v13 = vld [vmem:[#allocation2 + $0x180] sm:$0xff] }
  0xde   : > { %912 = vrot.lane.b32.xlu0 %v5148_v20, %s4718_s27 }
  0xdf   : > { %v537_v12 = vpop.permute.xlu1 %536 }
  0xe0   : > { %602 = vst.msk [vmem:[#allocation3 + $0xf8] sm:$0xff] %vm570_vm2, %v537_v12  ;;  %v672_v10 = vpop.permute.xlu0 %671  ;;  %v1020_v12 = vld [vmem:[#allocation2 + $0x189] sm:$0xff]  ;;  %vm3249_vm2 = vcmask 654848  }
  0xe1   : > { %910 = vrot.lane.b32.xlu1 %v5138_v17, %s4718_s27  ;;  %766 = vst.msk [vmem:[#allocation3 + $0x10] sm:$0xff] %vm763_vm3, %v672_v10 }
  0xe2   : > { %916 = vrot.lane.b32.xlu0 %v5164_v24, %s4718_s27  ;;  %v827_v24 = vld [vmem:[#allocation2 + $0x188] sm:$0xff] }
  0xe3   : > { %v670_v16 = vpop.permute.xlu1 %669 }
  0xe4   : > { %765 = vst.msk [vmem:[#allocation3 + $0x8] sm:$0xff] %vm763_vm3, %v670_v16  ;;  %v676_v37 = vpop.permute.xlu0 %675  ;;  %v7174_v16 = vld [vmem:[#allocation11_spill] sm:$0xff] }
  0xe5   : > { %914 = vrot.lane.b32.xlu1 %v5154_v21, %s4718_s27  ;;  %768 = vst.msk [vmem:[#allocation3 + $0x20] sm:$0xff] %vm763_vm3, %v676_v37 }
  0xe6   : > { %920 = vrot.lane.b32.xlu0 %v826_v13, %s4718_s27 }
  0xe7   : > { %v674_v20 = vpop.permute.xlu1 %673 }
  0xe8   : > { %767 = vst.msk [vmem:[#allocation3 + $0x18] sm:$0xff] %vm763_vm3, %v674_v20  ;;  %v680_v17 = vpop.permute.xlu0 %679  ;;  %v7175_v20 = vld [vmem:[#allocation12_spill] sm:$0xff] }
  0xe9   : > { %918 = vrot.lane.b32.xlu1 %v5170_v28, %s4718_s27  ;;  %770 = vst.msk [vmem:[#allocation3 + $0x30] sm:$0xff] %vm763_vm3, %v680_v17  ;;  %v7176_v17 = vld [vmem:[#allocation13_spill] sm:$0xff] }
  0xea   : > { %1053 = vrot.lane.b32.xlu0 %v4939_v25, %s4719_s28 }
  0xeb   : > { %v678_v47 = vpop.permute.xlu1 %677 }
  0xec   : > { %769 = vst.msk [vmem:[#allocation3 + $0x28] sm:$0xff] %vm763_vm3, %v678_v47  ;;  %v684_v21 = vpop.permute.xlu0 %683 }
  0xed   : > { %922 = vrot.lane.b32.xlu1 %v827_v24, %s4718_s27  ;;  %772 = vst.msk [vmem:[#allocation3 + $0x40] sm:$0xff] %vm763_vm3, %v684_v21  ;;  %v7177_v21 = vld [vmem:[#allocation14_spill] sm:$0xff]  ;;  %s6917_s27 = scalar_lea.vmem %s7108_s5, %s4533_s21 }
  0xee   : > { %1057 = vrot.lane.b32.xlu0 %v4941_v26, %s4719_s28 }
  0xef   : > { %v682_v48 = vpop.permute.xlu1 %681 }
  0xf0   : > { %771 = vst.msk [vmem:[#allocation3 + $0x38] sm:$0xff] %vm763_vm3, %v682_v48  ;;  %v688_v28 = vpop.permute.xlu0 %687  ;;  %v7178_v48 = vld [vmem:[#allocation15_spill] sm:$0xff] }
  0xf1   : > { %1055 = vrot.lane.b32.xlu1 %v4948_v27, %s4719_s28  ;;  %774 = vst.msk [vmem:[#allocation3 + $0x50] sm:$0xff] %vm763_vm3, %v688_v28 }
  0xf2   : > { %1061 = vrot.lane.b32.xlu0 %v4956_v30, %s4719_s28 }
  0xf3   : > { %v686_v25 = vpop.permute.xlu1 %685 }
  0xf4   : > { %773 = vst.msk [vmem:[#allocation3 + $0x48] sm:$0xff] %vm763_vm3, %v686_v25  ;;  %v692_v34 = vpop.permute.xlu0 %691 }
  0xf5   : > { %1059 = vrot.lane.b32.xlu1 %v4960_v31, %s4719_s28  ;;  %776 = vst.msk [vmem:[#allocation3 + $0x60] sm:$0xff] %vm763_vm3, %v692_v34  ;;  %v7179_v34 = vld [vmem:[#allocation16_spill] sm:$0xff] }
  0xf6   : > { %1065 = vrot.lane.b32.xlu0 %v4964_v32, %s4719_s28 }
  0xf7   : > { %v690_v26 = vpop.permute.xlu1 %689 }
  0xf8   : > { %775 = vst.msk [vmem:[#allocation3 + $0x58] sm:$0xff] %vm763_vm3, %v690_v26  ;;  %v696_v27 = vpop.permute.xlu0 %695  ;;  %v7180_v26 = vld [vmem:[#allocation17_spill] sm:$0xff] }
  0xf9   : > { %1063 = vrot.lane.b32.xlu1 %v4977_v39, %s4719_s28  ;;  %778 = vst.msk [vmem:[#allocation3 + $0x70] sm:$0xff] %vm763_vm3, %v696_v27 }
  0xfa   : > { %1069 = vrot.lane.b32.xlu0 %v4984_v40, %s4719_s28 }
  0xfb   : > { %v694_v30 = vpop.permute.xlu1 %693 }
  0xfc   : > { %777 = vst.msk [vmem:[#allocation3 + $0x68] sm:$0xff] %vm763_vm3, %v694_v30  ;;  %v700_v31 = vpop.permute.xlu0 %699 }
  0xfd   : > { %1067 = vrot.lane.b32.xlu1 %v4988_v41, %s4719_s28  ;;  %780 = vst.msk [vmem:[#allocation3 + $0x80] sm:$0xff] %vm763_vm3, %v700_v31  ;;  %v7181_v31 = vld [vmem:[#allocation18_spill] sm:$0xff] }
  0xfe   : > { %1073 = vrot.lane.b32.xlu0 %v4992_v42, %s4719_s28 }
  0xff   : > { %v698_v32 = vpop.permute.xlu1 %697 }
 0x100   : > { %779 = vst.msk [vmem:[#allocation3 + $0x78] sm:$0xff] %vm763_vm3, %v698_v32  ;;  %v704_v39 = vpop.permute.xlu0 %703  ;;  %v7182_v32 = vld [vmem:[#allocation19_spill] sm:$0xff] }
 0x101   : > { %1071 = vrot.lane.b32.xlu1 %v4996_v43, %s4719_s28  ;;  %782 = vst.msk [vmem:[#allocation3 + $0x90] sm:$0xff] %vm763_vm3, %v704_v39 }
 0x102   : > { %1077 = vrot.lane.b32.xlu0 %v5000_v44, %s4719_s28 }
 0x103   : > { %v702_v40 = vpop.permute.xlu1 %701 }
 0x104   : > { %781 = vst.msk [vmem:[#allocation3 + $0x88] sm:$0xff] %vm763_vm3, %v702_v40  ;;  %v708_v41 = vpop.permute.xlu0 %707 }
 0x105   : > { %1075 = vrot.lane.b32.xlu1 %v5004_v46, %s4719_s28  ;;  %784 = vst.msk [vmem:[#allocation3 + $0xa0] sm:$0xff] %vm763_vm3, %v708_v41  ;;  %v7183_v41 = vld [vmem:[#allocation20_spill] sm:$0xff] }
 0x106   : > { %1081 = vrot.lane.b32.xlu0 %v5018_v51, %s4719_s28 }
 0x107   : > { %v706_v42 = vpop.permute.xlu1 %705 }
 0x108   : > { %783 = vst.msk [vmem:[#allocation3 + $0x98] sm:$0xff] %vm763_vm3, %v706_v42  ;;  %v712_v43 = vpop.permute.xlu0 %711  ;;  %v1987_v42 = vld [vmem:[%s7104_s1] sm:$0xff] }
 0x109   : > { %1079 = vrot.lane.b32.xlu1 %v5028_v53, %s4719_s28  ;;  %786 = vst.msk [vmem:[#allocation3 + $0xb0] sm:$0xff] %vm763_vm3, %v712_v43  ;;  %v1988_v43 = vld [vmem:[%s7104_s1 + $0x8] sm:$0xff] }
 0x10a   : > { %1085 = vrot.lane.b32.xlu0 %v5036_v56, %s4719_s28 }
 0x10b   : > { %v710_v44 = vpop.permute.xlu1 %709 }
 0x10c   : > { %785 = vst.msk [vmem:[#allocation3 + $0xa8] sm:$0xff] %vm763_vm3, %v710_v44  ;;  %v716_v46 = vpop.permute.xlu0 %715  ;;  %v4630_v44 = vpack.c.bf16 %v1988_v43, %v1987_v42 }
 0x10d   : > { %1083 = vrot.lane.b32.xlu1 %v5062_v63, %s4719_s28  ;;  %788 = vst.msk [vmem:[#allocation3 + $0xc0] sm:$0xff] %vm763_vm3, %v716_v46  ;;  %v7184_v46 = vld [vmem:[#allocation21_spill] sm:$0xff] }
 0x10e   : > { %1089 = vrot.lane.b32.xlu0 %v5112_v11, %s4719_s28  ;;  %4631 = vmatprep.subr.bf16.mxu0 %v4630_v44 }
 0x10f   : > { %v714_v51 = vpop.permute.xlu1 %713  ;;  %4633 = vmatpush3.bf16.msra.mxu0 %v4630_v44  ;;  %v1772_v44 = vld [vmem:[#allocation2 + $0xaa] sm:$0xff] }
 0x110   : > { %787 = vst.msk [vmem:[#allocation3 + $0xb8] sm:$0xff] %vm763_vm3, %v714_v51  ;;  %v720_v53 = vpop.permute.xlu0 %719 }
 0x111   : > { %1087 = vrot.lane.b32.xlu1 %v5124_v14, %s4719_s28  ;;  %790 = vst.msk [vmem:[#allocation3 + $0xd0] sm:$0xff] %vm763_vm3, %v720_v53 }
 0x112   : > { %1093 = vrot.lane.b32.xlu0 %v5130_v15, %s4719_s28 }
 0x113   : > { %v718_v56 = vpop.permute.xlu1 %717 }
 0x114   : > { %789 = vst.msk [vmem:[#allocation3 + $0xc8] sm:$0xff] %vm763_vm3, %v718_v56  ;;  %v724_v63 = vpop.permute.xlu0 %723  ;;  %v1989_v56 = vld [vmem:[%s7104_s1 + $0x10] sm:$0xff] }
 0x115   : > { %1091 = vrot.lane.b32.xlu1 %v5140_v18, %s4719_s28  ;;  %792 = vst.msk [vmem:[#allocation3 + $0xe0] sm:$0xff] %vm763_vm3, %v724_v63  ;;  %v1990_v63 = vld [vmem:[%s7104_s1 + $0x18] sm:$0xff] }
 0x116   : > { %1097 = vrot.lane.b32.xlu0 %v5146_v19, %s4719_s28 }
 0x117   : > { %v722_v11 = vpop.permute.xlu1 %721 }
 0x118   : > { %791 = vst.msk [vmem:[#allocation3 + $0xd8] sm:$0xff] %vm763_vm3, %v722_v11  ;;  %v728_v14 = vpop.permute.xlu0 %727  ;;  %v1569_v11 = vld [vmem:[#allocation2 + $0x31] sm:$0xff] }
 0x119   : > { %1095 = vrot.lane.b32.xlu1 %v5156_v22, %s4719_s28  ;;  %794 = vst.msk [vmem:[#allocation3 + $0xf0] sm:$0xff] %vm763_vm3, %v728_v14  ;;  %v7170_v22 = vld [vmem:[#allocation7_spill] sm:$0xff]  ;;  %v4634_v14 = vpack.c.bf16 %v1990_v63, %v1989_v56 }
 0x11a   : > { %1101 = vrot.lane.b32.xlu0 %v5162_v23, %s4719_s28 }
 0x11b   : > { %v726_v15 = vpop.permute.xlu1 %725  ;;  %4635 = vmatprep.subr.bf16.mxu0 %v4634_v14 }
 0x11c   : > { %793 = vst.msk [vmem:[#allocation3 + $0xe8] sm:$0xff] %vm763_vm3, %v726_v15  ;;  %v861_v18 = vpop.permute.xlu0 %860  ;;  %v7185_v15 = vld [vmem:[#allocation22_spill] sm:$0xff]  ;;  %4637 = vmatpush3.bf16.msra.mxu0 %v4634_v14 }
 0x11d   : > { %1099 = vrot.lane.b32.xlu1 %v5172_v29, %s4719_s28  ;;  %957 = vst.msk [vmem:[#allocation3] sm:$0xff] %vm956_vm4, %v861_v18  ;;  %v1019_v29 = vld [vmem:[#allocation2 + $0x181] sm:$0xff] }
 0x11e   : > { %1105 = vrot.lane.b32.xlu0 %v7169_v49, %s4719_s28  ;;  %v1991_v49 = vld [vmem:[%s7104_s1 + $0x20] sm:$0xf] }
 0x11f   : > { %v730_v19 = vpop.permute.xlu1 %729  ;;  %4580 = vmatprep.subr.msk.mxu0 %vm2096_vm5, %v1991_v49  ;;  %v1581_v14 = vld [vmem:[#allocation2 + $0xc1] sm:$0xff] }
 0x120   : > { %795 = vst.msk [vmem:[#allocation3 + $0xf8] sm:$0xff] %vm763_vm3, %v730_v19  ;;  %v865_v0 = vpop.permute.xlu0 %864  ;;  %4581 = vmatpush3.msk.msra.mxu0 %vm2096_vm5, %v1991_v49  ;;  %vm3442_vm3 = vcmask 786048   ;;  %vm3829_vm5 = vcmask 1048448  }
 0x121   : > { %1103 = vrot.lane.b32.xlu1 %v7170_v22, %s4719_s28  ;;  %959 = vst.msk [vmem:[#allocation3 + $0x10] sm:$0xff] %vm956_vm4, %v865_v0  ;;  %v1570_v22 = vld [vmem:[#allocation2 + $0x39] sm:$0xff] }
 0x122   : > { %1109 = vrot.lane.b32.xlu0 %v7171_v36, %s4719_s28  ;;  %v1571_v36 = vld [vmem:[#allocation2 + $0x49] sm:$0xff] }
 0x123   : > { %v863_v23 = vpop.permute.xlu1 %862 }
 0x124   : > { %958 = vst.msk [vmem:[#allocation3 + $0x8] sm:$0xff] %vm956_vm4, %v863_v23  ;;  %v869_v45 = vpop.permute.xlu0 %868 }
 0x125   : > { %1107 = vrot.lane.b32.xlu1 %v7172_v38, %s4719_s28  ;;  %961 = vst.msk [vmem:[#allocation3 + $0x20] sm:$0xff] %vm956_vm4, %v869_v45 }
 0x126   : > { %1113 = vrot.lane.b32.xlu0 %v1019_v29, %s4719_s28 }
 0x127   : > { %v867_v33 = vpop.permute.xlu1 %866 }
 0x128   : > { %960 = vst.msk [vmem:[#allocation3 + $0x18] sm:$0xff] %vm956_vm4, %v867_v33  ;;  %v873_v35 = vpop.permute.xlu0 %872 }
 0x129   : > { %1111 = vrot.lane.b32.xlu1 %v7173_v9, %s4719_s28  ;;  %963 = vst.msk [vmem:[#allocation3 + $0x30] sm:$0xff] %vm956_vm4, %v873_v35 }
 0x12a   : > { %1246 = vrot.lane.b32.xlu0 %v7174_v16, %s4720_s29 }
 0x12b   : > { %v871_v10 = vpop.permute.xlu1 %870 }
 0x12c   : > { %962 = vst.msk [vmem:[#allocation3 + $0x28] sm:$0xff] %vm956_vm4, %v871_v10  ;;  %v877_v13 = vpop.permute.xlu0 %876 }
 0x12d   : > { %1115 = vrot.lane.b32.xlu1 %v1020_v12, %s4719_s28  ;;  %965 = vst.msk [vmem:[#allocation3 + $0x40] sm:$0xff] %vm956_vm4, %v877_v13 }
 0x12e   : > { %1250 = vrot.lane.b32.xlu0 %v7175_v20, %s4720_s29 }
 0x12f   : > { %v875_v37 = vpop.permute.xlu1 %874 }
 0x130   : > { %964 = vst.msk [vmem:[#allocation3 + $0x38] sm:$0xff] %vm956_vm4, %v875_v37  ;;  %v881_v24 = vpop.permute.xlu0 %880 }
 0x131   : > { %1248 = vrot.lane.b32.xlu1 %v7176_v17, %s4720_s29  ;;  %967 = vst.msk [vmem:[#allocation3 + $0x50] sm:$0xff] %vm956_vm4, %v881_v24 }
 0x132   : > { %1254 = vrot.lane.b32.xlu0 %v7177_v21, %s4720_s29 }
 0x133   : > { %v879_v47 = vpop.permute.xlu1 %878 }
 0x134   : > { %966 = vst.msk [vmem:[#allocation3 + $0x48] sm:$0xff] %vm956_vm4, %v879_v47  ;;  %v885_v28 = vpop.permute.xlu0 %884  ;;  %v1768_v47 = vld [vmem:[#allocation2 + $0x7a] sm:$0xff] }
 0x135   : > { %1252 = vrot.lane.b32.xlu1 %v7178_v48, %s4720_s29  ;;  %969 = vst.msk [vmem:[#allocation3 + $0x60] sm:$0xff] %vm956_vm4, %v885_v28 }
 0x136   : > { %1258 = vrot.lane.b32.xlu0 %v7179_v34, %s4720_s29 }
 0x137   : > { %v883_v25 = vpop.permute.xlu1 %882 }
 0x138   : > { %968 = vst.msk [vmem:[#allocation3 + $0x58] sm:$0xff] %vm956_vm4, %v883_v25  ;;  %v889_v27 = vpop.permute.xlu0 %888  ;;  %v1769_v25 = vld [vmem:[#allocation2 + $0x82] sm:$0xff] }
 0x139   : > { %1256 = vrot.lane.b32.xlu1 %v7180_v26, %s4720_s29  ;;  %971 = vst.msk [vmem:[#allocation3 + $0x70] sm:$0xff] %vm956_vm4, %v889_v27 }
 0x13a   : > { %1262 = vrot.lane.b32.xlu0 %v7181_v31, %s4720_s29 }
 0x13b   : > { %v887_v30 = vpop.permute.xlu1 %886 }
 0x13c   : > { %970 = vst.msk [vmem:[#allocation3 + $0x68] sm:$0xff] %vm956_vm4, %v887_v30  ;;  %v893_v39 = vpop.permute.xlu0 %892  ;;  %v1770_v30 = vld [vmem:[#allocation2 + $0x92] sm:$0xff] }
 0x13d   : > { %1260 = vrot.lane.b32.xlu1 %v7182_v32, %s4720_s29  ;;  %973 = vst.msk [vmem:[#allocation3 + $0x80] sm:$0xff] %vm956_vm4, %v893_v39 }
 0x13e   : > { %1266 = vrot.lane.b32.xlu0 %v7183_v41, %s4720_s29 }
 0x13f   : > { %v891_v40 = vpop.permute.xlu1 %890 }
 0x140   : > { %972 = vst.msk [vmem:[#allocation3 + $0x78] sm:$0xff] %vm956_vm4, %v891_v40  ;;  %v897_v51 = vpop.permute.xlu0 %896  ;;  %v1771_v40 = vld [vmem:[#allocation2 + $0x9a] sm:$0xff] }
 0x141   : > { %1264 = vrot.lane.b32.xlu1 %v7184_v46, %s4720_s29  ;;  %975 = vst.msk [vmem:[#allocation3 + $0x90] sm:$0xff] %vm956_vm4, %v897_v51 }
 0x142   : > { %1440 = vrot.lane.b32.xlu0 %v5016_v50, %s4721_s9 }
 0x143   : > { %v895_v53 = vpop.permute.xlu1 %894 }
 0x144   : > { %974 = vst.msk [vmem:[#allocation3 + $0x88] sm:$0xff] %vm956_vm4, %v895_v53  ;;  %v901_v18 = vpop.permute.xlu0 %900  ;;  %v1773_v53 = vld [vmem:[#allocation2 + $0xb2] sm:$0xff] }
 0x145   : > { %1268 = vrot.lane.b32.xlu1 %v7185_v15, %s4720_s29  ;;  %977 = vst.msk [vmem:[#allocation3 + $0xa0] sm:$0xff] %vm956_vm4, %v901_v18 }
 0x146   : > { %1633 = vrot.lane.b32.xlu0 %v1569_v11, %s4722_s14 }
 0x147   : > { %v899_v50 = vpop.permute.xlu1 %898 }
 0x148   : > { %976 = vst.msk [vmem:[#allocation3 + $0x98] sm:$0xff] %vm956_vm4, %v899_v50  ;;  %v905_v19 = vpop.permute.xlu0 %904  ;;  %v1774_v50 = vld [vmem:[#allocation2 + $0xc2] sm:$0xff] }
 0x149   : > { %1442 = vrot.lane.b32.xlu1 %v5024_v52, %s4721_s9  ;;  %979 = vst.msk [vmem:[#allocation3 + $0xb0] sm:$0xff] %vm956_vm4, %v905_v19 }
 0x14a   : > { %1826 = vrot.lane.b32.xlu0 %v7175_v20, %s4723_s17 }
 0x14b   : > { %v903_v0 = vpop.permute.xlu1 %902 }
 0x14c   : > { %978 = vst.msk [vmem:[#allocation3 + $0xa8] sm:$0xff] %vm956_vm4, %v903_v0  ;;  %v909_v52 = vpop.permute.xlu0 %908 }
 0x14d   : > { %1635 = vrot.lane.b32.xlu1 %v1570_v22, %s4722_s14  ;;  %981 = vst.msk [vmem:[#allocation3 + $0xc0] sm:$0xff] %vm956_vm4, %v909_v52  ;;  %v1775_v22 = vld [vmem:[#allocation2 + $0xca] sm:$0xff] }
 0x14e   : > { %1444 = vrot.lane.b32.xlu0 %v5032_v54, %s4721_s9  ;;  %v1572_v54 = vld [vmem:[#allocation2 + $0x51] sm:$0xff] }
 0x14f   : > { %v907_v23 = vpop.permute.xlu1 %906 }
 0x150   : > { %980 = vst.msk [vmem:[#allocation3 + $0xb8] sm:$0xff] %vm956_vm4, %v907_v23  ;;  %v913_v29 = vpop.permute.xlu0 %912 }
 0x151   : > { %1828 = vrot.lane.b32.xlu1 %v7178_v48, %s4723_s17  ;;  %983 = vst.msk [vmem:[#allocation3 + $0xd0] sm:$0xff] %vm956_vm4, %v913_v29 }
 0x152   : > { %1637 = vrot.lane.b32.xlu0 %v1571_v36, %s4722_s14  ;;  %v1583_v36 = vld [vmem:[#allocation2 + $0xd9] sm:$0xff] }
 0x153   : > { %v911_v38 = vpop.permute.xlu1 %910 }
 0x154   : > { %982 = vst.msk [vmem:[#allocation3 + $0xc8] sm:$0xff] %vm956_vm4, %v911_v38  ;;  %v917_v45 = vpop.permute.xlu0 %916 }
 0x155   : > { %1446 = vrot.lane.b32.xlu1 %v5034_v55, %s4721_s9  ;;  %985 = vst.msk [vmem:[#allocation3 + $0xe0] sm:$0xff] %vm956_vm4, %v917_v45  ;;  %v1573_v55 = vld [vmem:[#allocation2 + $0x61] sm:$0xff] }
 0x156   : > { %1830 = vrot.lane.b32.xlu0 %v7177_v21, %s4723_s17  ;;  %v1776_v45 = vld [vmem:[#allocation2 + $0xda] sm:$0xff] }
 0x157   : > { %v915_v33 = vpop.permute.xlu1 %914 }
 0x158   : > { %984 = vst.msk [vmem:[#allocation3 + $0xd8] sm:$0xff] %vm956_vm4, %v915_v33  ;;  %v921_v9 = vpop.permute.xlu0 %920 }
 0x159   : > { %1639 = vrot.lane.b32.xlu1 %v1572_v54, %s4722_s14  ;;  %987 = vst.msk [vmem:[#allocation3 + $0xf0] sm:$0xff] %vm956_vm4, %v921_v9 }
 0x15a   : > { %1448 = vrot.lane.b32.xlu0 %v5042_v57, %s4721_s9  ;;  %v1574_v57 = vld [vmem:[#allocation2 + $0x69] sm:$0xff] }
 0x15b   : > { %v919_v35 = vpop.permute.xlu1 %918 }
 0x15c   : > { %986 = vst.msk [vmem:[#allocation3 + $0xe8] sm:$0xff] %vm956_vm4, %v919_v35  ;;  %v1054_v12 = vpop.permute.xlu0 %1053  ;;  %v1777_v35 = vld [vmem:[#allocation2 + $0xe2] sm:$0xff] }
 0x15d   : > { %1832 = vrot.lane.b32.xlu1 %v7180_v26, %s4723_s17  ;;  %1150 = vst.msk [vmem:[#allocation3] sm:$0xff] %vm1149_vm6, %v1054_v12 }
 0x15e   : > { %1641 = vrot.lane.b32.xlu0 %v1573_v55, %s4722_s14 }
 0x15f   : > { %v923_v10 = vpop.permute.xlu1 %922 }
 0x160   : > { %988 = vst.msk [vmem:[#allocation3 + $0xf8] sm:$0xff] %vm956_vm4, %v923_v10  ;;  %v1058_v16 = vpop.permute.xlu0 %1057  ;;  %v1585_v10 = vld [vmem:[#allocation2 + $0xf1] sm:$0xff]  ;;  %vm3636_vm4 = vcmask 917248  }
 0x161   : > { %1450 = vrot.lane.b32.xlu1 %v5044_v58, %s4721_s9  ;;  %1152 = vst.msk [vmem:[#allocation3 + $0x10] sm:$0xff] %vm1149_vm6, %v1058_v16  ;;  %v1575_v58 = vld [vmem:[#allocation2 + $0x79] sm:$0xff] }
 0x162   : > { %1834 = vrot.lane.b32.xlu0 %v7179_v34, %s4723_s17 }
 0x163   : > { %v1056_v13 = vpop.permute.xlu1 %1055 }
 0x164   : > { %1151 = vst.msk [vmem:[#allocation3 + $0x8] sm:$0xff] %vm1149_vm6, %v1056_v13  ;;  %v1062_v37 = vpop.permute.xlu0 %1061  ;;  %v1778_v13 = vld [vmem:[#allocation2 + $0xf2] sm:$0xff] }
 0x165   : > { %1643 = vrot.lane.b32.xlu1 %v1574_v57, %s4722_s14  ;;  %1154 = vst.msk [vmem:[#allocation3 + $0x20] sm:$0xff] %vm1149_vm6, %v1062_v37 }
 0x166   : > { %1452 = vrot.lane.b32.xlu0 %v5046_v59, %s4721_s9  ;;  %v1576_v59 = vld [vmem:[#allocation2 + $0x81] sm:$0xff] }
 0x167   : > { %v1060_v20 = vpop.permute.xlu1 %1059 }
 0x168   : > { %1153 = vst.msk [vmem:[#allocation3 + $0x18] sm:$0xff] %vm1149_vm6, %v1060_v20  ;;  %v1066_v17 = vpop.permute.xlu0 %1065 }
 0x169   : > { %1836 = vrot.lane.b32.xlu1 %v7182_v32, %s4723_s17  ;;  %1156 = vst.msk [vmem:[#allocation3 + $0x30] sm:$0xff] %vm1149_vm6, %v1066_v17  ;;  %v1779_v17 = vld [vmem:[#allocation2 + $0xfa] sm:$0xff] }
 0x16a   : > { %1645 = vrot.lane.b32.xlu0 %v1575_v58, %s4722_s14 }
 0x16b   : > { %v1064_v24 = vpop.permute.xlu1 %1063 }
 0x16c   : > { %1155 = vst.msk [vmem:[#allocation3 + $0x28] sm:$0xff] %vm1149_vm6, %v1064_v24  ;;  %v1070_v21 = vpop.permute.xlu0 %1069 }
 0x16d   : > { %1454 = vrot.lane.b32.xlu1 %v5056_v60, %s4721_s9  ;;  %1158 = vst.msk [vmem:[#allocation3 + $0x40] sm:$0xff] %vm1149_vm6, %v1070_v21  ;;  %v1577_v60 = vld [vmem:[#allocation2 + $0x91] sm:$0xff] }
 0x16e   : > { %1838 = vrot.lane.b32.xlu0 %v1768_v47, %s4723_s17 }
 0x16f   : > { %v1068_v48 = vpop.permute.xlu1 %1067 }
 0x170   : > { %1157 = vst.msk [vmem:[#allocation3 + $0x38] sm:$0xff] %vm1149_vm6, %v1068_v48  ;;  %v1074_v28 = vpop.permute.xlu0 %1073 }
 0x171   : > { %1647 = vrot.lane.b32.xlu1 %v1576_v59, %s4722_s14  ;;  %1160 = vst.msk [vmem:[#allocation3 + $0x50] sm:$0xff] %vm1149_vm6, %v1074_v28  ;;  %v1587_v59 = vld [vmem:[#allocation2 + $0x109] sm:$0xff] }
 0x172   : > { %1456 = vrot.lane.b32.xlu0 %v5058_v61, %s4721_s9  ;;  %v1578_v61 = vld [vmem:[#allocation2 + $0x99] sm:$0xff]  ;;  %v1395_v28 = vld [vmem:[#allocation2 + $0x110] sm:$0xff] }
 0x173   : > { %v1072_v34 = vpop.permute.xlu1 %1071 }
 0x174   : > { %1159 = vst.msk [vmem:[#allocation3 + $0x48] sm:$0xff] %vm1149_vm6, %v1072_v34  ;;  %v1078_v26 = vpop.permute.xlu0 %1077  ;;  %v1780_v34 = vld [vmem:[#allocation2 + $0x10a] sm:$0xff] }
 0x175   : > { %1840 = vrot.lane.b32.xlu1 %v1769_v25, %s4723_s17  ;;  %1162 = vst.msk [vmem:[#allocation3 + $0x60] sm:$0xff] %vm1149_vm6, %v1078_v26 }
 0x176   : > { %1649 = vrot.lane.b32.xlu0 %v1577_v60, %s4722_s14 }
 0x177   : > { %v1076_v27 = vpop.permute.xlu1 %1075 }
 0x178   : > { %1161 = vst.msk [vmem:[#allocation3 + $0x58] sm:$0xff] %vm1149_vm6, %v1076_v27  ;;  %v1082_v31 = vpop.permute.xlu0 %1081  ;;  %v1588_v27 = vld [vmem:[#allocation2 + $0x111] sm:$0xff] }
 0x179   : > { %1458 = vrot.lane.b32.xlu1 %v5060_v62, %s4721_s9  ;;  %1164 = vst.msk [vmem:[#allocation3 + $0x70] sm:$0xff] %vm1149_vm6, %v1082_v31  ;;  %v1579_v62 = vld [vmem:[#allocation2 + $0xa9] sm:$0xff] }
 0x17a   : > { %1842 = vrot.lane.b32.xlu0 %v1770_v30, %s4723_s17 }
 0x17b   : > { %v1080_v32 = vpop.permute.xlu1 %1079 }
 0x17c   : > { %1163 = vst.msk [vmem:[#allocation3 + $0x68] sm:$0xff] %vm1149_vm6, %v1080_v32  ;;  %v1086_v39 = vpop.permute.xlu0 %1085 }
 0x17d   : > { %1651 = vrot.lane.b32.xlu1 %v1578_v61, %s4722_s14  ;;  %1166 = vst.msk [vmem:[#allocation3 + $0x80] sm:$0xff] %vm1149_vm6, %v1086_v39  ;;  %v1781_v61 = vld [vmem:[#allocation2 + $0x112] sm:$0xff] }
 0x17e   : > { %1460 = vrot.lane.b32.xlu0 %v5070_v1, %s4721_s9  ;;  %v1580_v1 = vld [vmem:[#allocation2 + $0xb1] sm:$0xff] }
 0x17f   : > { %v1084_v41 = vpop.permute.xlu1 %1083 }
 0x180   : > { %1165 = vst.msk [vmem:[#allocation3 + $0x78] sm:$0xff] %vm1149_vm6, %v1084_v41  ;;  %v1090_v42 = vpop.permute.xlu0 %1089 }
 0x181   : > { %1844 = vrot.lane.b32.xlu1 %v1771_v40, %s4723_s17  ;;  %1168 = vst.msk [vmem:[#allocation3 + $0x90] sm:$0xff] %vm1149_vm6, %v1090_v42  ;;  %v1396_v40 = vld [vmem:[#allocation2 + $0x120] sm:$0xff] }
 0x182   : > { %1653 = vrot.lane.b32.xlu0 %v1579_v62, %s4722_s14  ;;  %v1589_v42 = vld [vmem:[#allocation2 + $0x121] sm:$0xff] }
 0x183   : > { %v1088_v43 = vpop.permute.xlu1 %1087 }
 0x184   : > { %1167 = vst.msk [vmem:[#allocation3 + $0x88] sm:$0xff] %vm1149_vm6, %v1088_v43  ;;  %v1094_v46 = vpop.permute.xlu0 %1093 }
 0x185   : > { %1462 = vrot.lane.b32.xlu1 %v5072_v2, %s4721_s9  ;;  %1170 = vst.msk [vmem:[#allocation3 + $0xa0] sm:$0xff] %vm1149_vm6, %v1094_v46  ;;  %v1397_v46 = vld [vmem:[#allocation2 + $0x128] sm:$0xff] }
 0x186   : > { %1846 = vrot.lane.b32.xlu0 %v1772_v44, %s4723_s17 }
 0x187   : > { %v1092_v51 = vpop.permute.xlu1 %1091 }
 0x188   : > { %1169 = vst.msk [vmem:[#allocation3 + $0x98] sm:$0xff] %vm1149_vm6, %v1092_v51  ;;  %v1098_v56 = vpop.permute.xlu0 %1097  ;;  %v1782_v51 = vld [vmem:[#allocation2 + $0x122] sm:$0xff] }
 0x189   : > { %1655 = vrot.lane.b32.xlu1 %v1580_v1, %s4722_s14  ;;  %1172 = vst.msk [vmem:[#allocation3 + $0xb0] sm:$0xff] %vm1149_vm6, %v1098_v56  ;;  %v1590_v56 = vld [vmem:[#allocation2 + $0x129] sm:$0xff] }
 0x18a   : > { %1848 = vrot.lane.b32.xlu0 %v1773_v53, %s4723_s17 }
 0x18b   : > { %v1096_v63 = vpop.permute.xlu1 %1095 }
 0x18c   : > { %1171 = vst.msk [vmem:[#allocation3 + $0xa8] sm:$0xff] %vm1149_vm6, %v1096_v63  ;;  %v1102_v2 = vpop.permute.xlu0 %1101 }
 0x18d   : > { %1270 = vrot.lane.b32.xlu1 %v1772_v44, %s4720_s29  ;;  %1174 = vst.msk [vmem:[#allocation3 + $0xc0] sm:$0xff] %vm1149_vm6, %v1102_v2 }
 0x18e   : > { %1464 = vrot.lane.b32.xlu0 %v5074_v3, %s4721_s9  ;;  %v1582_v3 = vld [vmem:[#allocation2 + $0xc9] sm:$0xff] }
 0x18f   : > { %v1100_v11 = vpop.permute.xlu1 %1099 }
 0x190   : > { %1173 = vst.msk [vmem:[#allocation3 + $0xb8] sm:$0xff] %vm1149_vm6, %v1100_v11  ;;  %v1106_v15 = vpop.permute.xlu0 %1105 }
 0x191   : > { %1272 = vrot.lane.b32.xlu1 %v1773_v53, %s4720_s29  ;;  %1176 = vst.msk [vmem:[#allocation3 + $0xd0] sm:$0xff] %vm1149_vm6, %v1106_v15 }
 0x192   : > { %1657 = vrot.lane.b32.xlu0 %v1581_v14, %s4722_s14  ;;  %v1783_v14 = vld [vmem:[#allocation2 + $0x12a] sm:$0xff] }
 0x193   : > { %v1104_v18 = vpop.permute.xlu1 %1103 }
 0x194   : > { %1175 = vst.msk [vmem:[#allocation3 + $0xc8] sm:$0xff] %vm1149_vm6, %v1104_v18  ;;  %v1110_v19 = vpop.permute.xlu0 %1109  ;;  %v1398_v18 = vld [vmem:[#allocation2 + $0x138] sm:$0xff] }
 0x195   : > { %1466 = vrot.lane.b32.xlu1 %v5084_v4, %s4721_s9  ;;  %1178 = vst.msk [vmem:[#allocation3 + $0xe0] sm:$0xff] %vm1149_vm6, %v1110_v19 }
 0x196   : > { %1850 = vrot.lane.b32.xlu0 %v1774_v50, %s4723_s17 }
 0x197   : > { %v1108_v49 = vpop.permute.xlu1 %1107 }
 0x198   : > { %1177 = vst.msk [vmem:[#allocation3 + $0xd8] sm:$0xff] %vm1149_vm6, %v1108_v49  ;;  %v1114_v0 = vpop.permute.xlu0 %1113  ;;  %v1591_v49 = vld [vmem:[#allocation2 + $0x139] sm:$0xff] }
 0x199   : > { %1659 = vrot.lane.b32.xlu1 %v1582_v3, %s4722_s14  ;;  %1180 = vst.msk [vmem:[#allocation3 + $0xf0] sm:$0xff] %vm1149_vm6, %v1114_v0  ;;  %v1399_v0 = vld [vmem:[#allocation2 + $0x140] sm:$0xff] }
 0x19a   : > { %1852 = vrot.lane.b32.xlu0 %v1775_v22, %s4723_s17 }
 0x19b   : > { %v1112_v52 = vpop.permute.xlu1 %1111 }
 0x19c   : > { %1179 = vst.msk [vmem:[#allocation3 + $0xe8] sm:$0xff] %vm1149_vm6, %v1112_v52  ;;  %v1247_v4 = vpop.permute.xlu0 %1246 }
 0x19d   : > { %1274 = vrot.lane.b32.xlu1 %v1774_v50, %s4720_s29  ;;  %1343 = vst.msk [vmem:[#allocation3] sm:$0xff] %vm1342_vm7, %v1247_v4 }
 0x19e   : > { %1468 = vrot.lane.b32.xlu0 %v5086_v5, %s4721_s9  ;;  %v1584_v5 = vld [vmem:[#allocation2 + $0xe1] sm:$0xff] }
 0x19f   : > { %v1116_v23 = vpop.permute.xlu1 %1115 }
 0x1a0   : > { %1181 = vst.msk [vmem:[#allocation3 + $0xf8] sm:$0xff] %vm1149_vm6, %v1116_v23  ;;  %v1251_v29 = vpop.permute.xlu0 %1250  ;;  %v1784_v23 = vld [vmem:[#allocation2 + $0x13a] sm:$0xff] }
 0x1a1   : > { %1276 = vrot.lane.b32.xlu1 %v1775_v22, %s4720_s29  ;;  %1345 = vst.msk [vmem:[#allocation3 + $0x10] sm:$0xff] %vm1342_vm7, %v1251_v29  ;;  %v1592_v29 = vld [vmem:[#allocation2 + $0x141] sm:$0xff] }
 0x1a2   : > { %1661 = vrot.lane.b32.xlu0 %v1583_v36, %s4722_s14 }
 0x1a3   : > { %v1249_v38 = vpop.permute.xlu1 %1248 }
 0x1a4   : > { %1344 = vst.msk [vmem:[#allocation3 + $0x8] sm:$0xff] %vm1342_vm7, %v1249_v38  ;;  %v1255_v54 = vpop.permute.xlu0 %1254 }
 0x1a5   : > { %1470 = vrot.lane.b32.xlu1 %v5088_v6, %s4721_s9  ;;  %1347 = vst.msk [vmem:[#allocation3 + $0x20] sm:$0xff] %vm1342_vm7, %v1255_v54 }
 0x1a6   : > { %1854 = vrot.lane.b32.xlu0 %v1776_v45, %s4723_s17 }
 0x1a7   : > { %v1253_v33 = vpop.permute.xlu1 %1252 }
 0x1a8   : > { %1346 = vst.msk [vmem:[#allocation3 + $0x18] sm:$0xff] %vm1342_vm7, %v1253_v33  ;;  %v1259_v9 = vpop.permute.xlu0 %1258 }
 0x1a9   : > { %1663 = vrot.lane.b32.xlu1 %v1584_v5, %s4722_s14  ;;  %1349 = vst.msk [vmem:[#allocation3 + $0x30] sm:$0xff] %vm1342_vm7, %v1259_v9  ;;  %v1785_v5 = vld [vmem:[#allocation2 + $0x142] sm:$0xff]  ;;  %v1400_v9 = vld [vmem:[#allocation2 + $0x150] sm:$0xff] }
 0x1aa   : > { %1278 = vrot.lane.b32.xlu0 %v1776_v45, %s4720_s29 }
 0x1ab   : > { %v1257_v55 = vpop.permute.xlu1 %1256 }
 0x1ac   : > { %1348 = vst.msk [vmem:[#allocation3 + $0x28] sm:$0xff] %vm1342_vm7, %v1257_v55  ;;  %v1263_v6 = vpop.permute.xlu0 %1262 }
 0x1ad   : > { %1856 = vrot.lane.b32.xlu1 %v1777_v35, %s4723_s17  ;;  %1351 = vst.msk [vmem:[#allocation3 + $0x40] sm:$0xff] %vm1342_vm7, %v1263_v6 }
 0x1ae   : > { %1472 = vrot.lane.b32.xlu0 %v5096_v7, %s4721_s9  ;;  %v1586_v7 = vld [vmem:[#allocation2 + $0xf9] sm:$0xff] }
 0x1af   : > { %v1261_v12 = vpop.permute.xlu1 %1260 }
 0x1b0   : > { %1350 = vst.msk [vmem:[#allocation3 + $0x38] sm:$0xff] %vm1342_vm7, %v1261_v12  ;;  %v1267_v16 = vpop.permute.xlu0 %1266  ;;  %v1593_v12 = vld [vmem:[#allocation2 + $0x151] sm:$0xff] }
 0x1b1   : > { %1280 = vrot.lane.b32.xlu1 %v1777_v35, %s4720_s29  ;;  %1353 = vst.msk [vmem:[#allocation3 + $0x50] sm:$0xff] %vm1342_vm7, %v1267_v16  ;;  %v1401_v16 = vld [vmem:[#allocation2 + $0x158] sm:$0xff] }
 0x1b2   : > { %1665 = vrot.lane.b32.xlu0 %v1585_v10, %s4722_s14 }
 0x1b3   : > { %v1265_v57 = vpop.permute.xlu1 %1264 }
 0x1b4   : > { %1352 = vst.msk [vmem:[#allocation3 + $0x48] sm:$0xff] %vm1342_vm7, %v1265_v57  ;;  %v1441_v37 = vpop.permute.xlu0 %1440 }
 0x1b5   : > { %1474 = vrot.lane.b32.xlu1 %v5098_v8, %s4721_s9  ;;  %1537 = vst.msk [vmem:[#allocation3] sm:$0xff] %vm1536_vm8, %v1441_v37  ;;  %v1394_v8 = vld [vmem:[#allocation2 + $0x108] sm:$0xff] }
 0x1b6   : > { %1858 = vrot.lane.b32.xlu0 %v1778_v13, %s4723_s17 }
 0x1b7   : > { %v1269_v20 = vpop.permute.xlu1 %1268 }
 0x1b8   : > { %1354 = vst.msk [vmem:[#allocation3 + $0x58] sm:$0xff] %vm1342_vm7, %v1269_v20  ;;  %v1634_v58 = vpop.permute.xlu0 %1633  ;;  %v1594_v20 = vld [vmem:[#allocation2 + $0x159] sm:$0xff] }
 0x1b9   : > { %1667 = vrot.lane.b32.xlu1 %v1586_v7, %s4722_s14  ;;  %1730 = vst.msk [vmem:[#allocation3] sm:$0xff] %vm1729_vm9, %v1634_v58 }
 0x1ba   : > { %1282 = vrot.lane.b32.xlu0 %v1778_v13, %s4720_s29  ;;  %v1786_v13 = vld [vmem:[#allocation2 + $0x152] sm:$0xff] }
 0x1bb   : > { %v1443_v24 = vpop.permute.xlu1 %1442 }
 0x1bc   : > { %1538 = vst.msk [vmem:[#allocation3 + $0x8] sm:$0xff] %vm1536_vm8, %v1443_v24  ;;  %v1827_v47 = vpop.permute.xlu0 %1826  ;;  %v1787_v24 = vld [vmem:[#allocation2 + $0x15a] sm:$0xff] }
 0x1bd   : > { %1860 = vrot.lane.b32.xlu1 %v1779_v17, %s4723_s17  ;;  %1923 = vst.msk [vmem:[#allocation3] sm:$0xff] %vm1922_vm10, %v1827_v47 }
 0x1be   : > { %1476 = vrot.lane.b32.xlu0 %v1394_v8, %s4721_s9 }
 0x1bf   : > { %v1636_v21 = vpop.permute.xlu1 %1635 }
 0x1c0   : > { %1731 = vst.msk [vmem:[#allocation3 + $0x8] sm:$0xff] %vm1729_vm9, %v1636_v21  ;;  %v1445_v48 = vpop.permute.xlu0 %1444  ;;  %v1402_v21 = vld [vmem:[#allocation2 + $0x168] sm:$0xff] }
 0x1c1   : > { %1284 = vrot.lane.b32.xlu1 %v1779_v17, %s4720_s29  ;;  %1539 = vst.msk [vmem:[#allocation3 + $0x10] sm:$0xff] %vm1536_vm8, %v1445_v48 }
 0x1c2   : > { %1669 = vrot.lane.b32.xlu0 %v1587_v59, %s4722_s14 }
 0x1c3   : > { %v1829_v25 = vpop.permute.xlu1 %1828 }
 0x1c4   : > { %1924 = vst.msk [vmem:[#allocation3 + $0x8] sm:$0xff] %vm1922_vm10, %v1829_v25  ;;  %v1638_v60 = vpop.permute.xlu0 %1637  ;;  %v1955_v26 = vld [vmem:[#allocation3] sm:$0xff] }
 0x1c5   : > { %1478 = vrot.lane.b32.xlu1 %v1395_v28, %s4721_s9  ;;  %1732 = vst.msk [vmem:[#allocation3 + $0x10] sm:$0xff] %vm1729_vm9, %v1638_v60  ;;  %4582 = vmatprep.mubr.msk.f32.mxu0 %vm1999_vm11, %v1955_v26  ;;  %v1595_v28 = vld [vmem:[#allocation2 + $0x169] sm:$0xff] }
 0x1c6   : > { %1862 = vrot.lane.b32.xlu0 %v1780_v34, %s4723_s17  ;;  %v1403_v60 = vld [vmem:[#allocation2 + $0x170] sm:$0xff] }
 0x1c7   : > { %v1447_v30 = vpop.permute.xlu1 %1446 }
 0x1c8   : > { %1540 = vst.msk [vmem:[#allocation3 + $0x18] sm:$0xff] %vm1536_vm8, %v1447_v30  ;;  %v1831_v31 = vpop.permute.xlu0 %1830 }
 0x1c9   : > { %1671 = vrot.lane.b32.xlu1 %v1588_v27, %s4722_s14  ;;  %1925 = vst.msk [vmem:[#allocation3 + $0x10] sm:$0xff] %vm1922_vm10, %v1831_v31  ;;  %v1788_v27 = vld [vmem:[#allocation2 + $0x16a] sm:$0xff] }
 0x1ca   : > { %1286 = vrot.lane.b32.xlu0 %v1780_v34, %s4720_s29 }
 0x1cb   : > { %v1640_v32 = vpop.permute.xlu1 %1639  ;;  %v1956_v39 = vld [vmem:[#allocation3 + $0x8] sm:$0xff] }
 0x1cc   : > { %1733 = vst.msk [vmem:[#allocation3 + $0x18] sm:$0xff] %vm1729_vm9, %v1640_v32  ;;  %4583 = vmatmul.mubr.msk.f32.vlgmr.msra.gmra.mrb[0].mxu0 %vm1999_vm11, %v1956_v39  ;;  %v1449_v41 = vpop.permute.xlu0 %1448 }
 0x1cd   : > { %1864 = vrot.lane.b32.xlu1 %v1781_v61, %s4723_s17  ;;  %1541 = vst.msk [vmem:[#allocation3 + $0x20] sm:$0xff] %vm1536_vm8, %v1449_v41 }
 0x1ce   : > { %1480 = vrot.lane.b32.xlu0 %v1396_v40, %s4721_s9  ;;  %v1789_v40 = vld [vmem:[#allocation2 + $0x172] sm:$0xff] }
 0x1cf   : > { %v1833_v62 = vpop.permute.xlu1 %1832 }
 0x1d0   : > { %1926 = vst.msk [vmem:[#allocation3 + $0x18] sm:$0xff] %vm1922_vm10, %v1833_v62  ;;  %v1642_v43 = vpop.permute.xlu0 %1641  ;;  %v1957_v44 = vld [vmem:[#allocation3 + $0x10] sm:$0xff] }
 0x1d1   : > { %1288 = vrot.lane.b32.xlu1 %v1781_v61, %s4720_s29  ;;  %1734 = vst.msk [vmem:[#allocation3 + $0x20] sm:$0xff] %vm1729_vm9, %v1642_v43  ;;  %4585 = vmatprep.mubr.msk.f32.mxu0 %vm1999_vm11, %v1957_v44  ;;  %v1596_v61 = vld [vmem:[#allocation2 + $0x171] sm:$0xff]  ;;  %v1404_v62 = vld [vmem:[#allocation2 + $0x180] sm:$0xff] }
 0x1d2   : > { %1673 = vrot.lane.b32.xlu0 %v1589_v42, %s4722_s14  ;;  %v1597_v44 = vld [vmem:[#allocation2 + $0x181] sm:$0xff] }
 0x1d3   : > { %v1451_v1 = vpop.permute.xlu1 %1450 }
 0x1d4   : > { %1542 = vst.msk [vmem:[#allocation3 + $0x28] sm:$0xff] %vm1536_vm8, %v1451_v1  ;;  %v1835_v53 = vpop.permute.xlu0 %1834 }
 0x1d5   : > { %1482 = vrot.lane.b32.xlu1 %v1397_v46, %s4721_s9  ;;  %1927 = vst.msk [vmem:[#allocation3 + $0x20] sm:$0xff] %vm1922_vm10, %v1835_v53 }
 0x1d6   : > { %1866 = vrot.lane.b32.xlu0 %v1782_v51, %s4723_s17 }
 0x1d7   : > { %v1644_v63 = vpop.permute.xlu1 %1643  ;;  %v1958_v2 = vld [vmem:[#allocation3 + $0x18] sm:$0xff] }
 0x1d8   : > { %1735 = vst.msk [vmem:[#allocation3 + $0x28] sm:$0xff] %vm1729_vm9, %v1644_v63  ;;  %4586 = vmatmul.mubr.msk.f32.gmra.mrb[2].mxu0 %vm1999_vm11, %v1958_v2  ;;  %v1453_v11 = vpop.permute.xlu0 %1452 }
 0x1d9   : > { %1675 = vrot.lane.b32.xlu1 %v1590_v56, %s4722_s14  ;;  %1543 = vst.msk [vmem:[#allocation3 + $0x30] sm:$0xff] %vm1536_vm8, %v1453_v11  ;;  %v1790_v56 = vld [vmem:[#allocation2 + $0x182] sm:$0xff] }
 0x1da   : > { %1290 = vrot.lane.b32.xlu0 %v1782_v51, %s4720_s29  ;;  %v1405_v51 = vld [vmem:[#allocation2 + $0x188] sm:$0xff] }
 0x1db   : > { %v1837_v15 = vpop.permute.xlu1 %1836  ;;  %v1598_v11 = vld [vmem:[#allocation2 + $0x189] sm:$0xff] }
 0x1dc   : > { %1928 = vst.msk [vmem:[#allocation3 + $0x28] sm:$0xff] %vm1922_vm10, %v1837_v15  ;;  %v1646_v50 = vpop.permute.xlu0 %1645  ;;  %v1959_v19 = vld [vmem:[#allocation3 + $0x20] sm:$0xff] }
 0x1dd   : > { %1868 = vrot.lane.b32.xlu1 %v1783_v14, %s4723_s17  ;;  %1736 = vst.msk [vmem:[#allocation3 + $0x30] sm:$0xff] %vm1729_vm9, %v1646_v50  ;;  %4588 = vmatprep.mubr.msk.f32.mxu0 %vm1999_vm11, %v1959_v19  ;;  %v1406_v19 = vld [vmem:[#allocation2 + $0x198] sm:$0xff] }
 0x1de   : > { %1484 = vrot.lane.b32.xlu0 %v1398_v18, %s4721_s9  ;;  %v5769_v18 = vld [vmem:[#allocation2 + $0x18a] sm:$0xff] }
 0x1df   : > { %v1455_v3 = vpop.permute.xlu1 %1454 }
 0x1e0   : > { %1544 = vst.msk [vmem:[#allocation3 + $0x38] sm:$0xff] %vm1536_vm8, %v1455_v3  ;;  %v1839_v22 = vpop.permute.xlu0 %1838 }
 0x1e1   : > { %1292 = vrot.lane.b32.xlu1 %v1783_v14, %s4720_s29  ;;  %1929 = vst.msk [vmem:[#allocation3 + $0x30] sm:$0xff] %vm1922_vm10, %v1839_v22  ;;  %v1599_v22 = vld [vmem:[#allocation2 + $0x199] sm:$0xff] }
 0x1e2   : > { %1677 = vrot.lane.b32.xlu0 %v1591_v49, %s4722_s14 }
 0x1e3   : > { %v1648_v52 = vpop.permute.xlu1 %1647  ;;  %v1960_v4 = vld [vmem:[#allocation3 + $0x28] sm:$0xff] }
 0x1e4   : > { %1737 = vst.msk [vmem:[#allocation3 + $0x38] sm:$0xff] %vm1729_vm9, %v1648_v52  ;;  %4589 = vmatmul.mubr.msk.f32.gmra.mrb[4].mxu0 %vm1999_vm11, %v1960_v4  ;;  %v1457_v36 = vpop.permute.xlu0 %1456 }
 0x1e5   : > { %1486 = vrot.lane.b32.xlu1 %v1399_v0, %s4721_s9  ;;  %1545 = vst.msk [vmem:[#allocation3 + $0x40] sm:$0xff] %vm1536_vm8, %v1457_v36  ;;  %v7186_v0 = vmov 0.0  }
 0x1e6   : > { %1870 = vrot.lane.b32.xlu0 %v1784_v23, %s4723_s17  ;;  %2363 = vst.msk [vmem:[#allocation4 + $0x20] sm:$0xff] %vm2357_vm12, %v7186_v0  ;;  %2358 = vst.msk [vmem:[#allocation4] sm:$0xff] %vm2357_vm12, %v7186_v0 }
 0x1e7   : > { %v1841_v38 = vpop.permute.xlu1 %1840  ;;  %2364 = vst.msk [vmem:[#allocation4 + $0x28] sm:$0x3] %vm2360_vm13, %v7186_v0  ;;  %2361 = vst.msk [vmem:[#allocation4 + $0x10] sm:$0x3] %vm2360_vm13, %v7186_v0 }
 0x1e8   : > { %1930 = vst.msk [vmem:[#allocation3 + $0x38] sm:$0xff] %vm1922_vm10, %v1841_v38  ;;  %v1650_v45 = vpop.permute.xlu0 %1649  ;;  %v1961_v54 = vld [vmem:[#allocation3 + $0x30] sm:$0xff] }
 0x1e9   : > { %1679 = vrot.lane.b32.xlu1 %v1592_v29, %s4722_s14  ;;  %1738 = vst.msk [vmem:[#allocation3 + $0x40] sm:$0xff] %vm1729_vm9, %v1650_v45  ;;  %4591 = vmatprep.mubr.msk.f32.mxu0 %vm1999_vm11, %v1961_v54  ;;  %v1792_v29 = vld [vmem:[#allocation2 + $0x19a] sm:$0xff] }
 0x1ea   : > { %1294 = vrot.lane.b32.xlu0 %v1784_v23, %s4720_s29  ;;  %2359 = vst.msk [vmem:[#allocation4 + $0x8] sm:$0xff] %vm2357_vm12, %v7186_v0  ;;  %2362 = vst.msk [vmem:[#allocation4 + $0x18] sm:$0xff] %vm2357_vm12, %v7186_v0  ;;  %v1407_v23 = vld [vmem:[#allocation2 + $0x1a0] sm:$0xff] }
 0x1eb   : > { %v1459_v33 = vpop.permute.xlu1 %1458  ;;  %2365 = vst.msk [vmem:[#allocation4 + $0x30] sm:$0xff] %vm2357_vm12, %v7186_v0  ;;  %2366 = vst.msk [vmem:[#allocation4 + $0x38] sm:$0xff] %vm2357_vm12, %v7186_v0  ;;  %v1600_v45 = vld [vmem:[#allocation2 + $0x1a1] sm:$0xff] }
 0x1ec   : > { %1546 = vst.msk [vmem:[#allocation3 + $0x48] sm:$0xff] %vm1536_vm8, %v1459_v33  ;;  %v1843_v35 = vpop.permute.xlu0 %1842 }
 0x1ed   : > { %1872 = vrot.lane.b32.xlu1 %v1785_v5, %s4723_s17  ;;  %1931 = vst.msk [vmem:[#allocation3 + $0x40] sm:$0xff] %vm1922_vm10, %v1843_v35  ;;  %v1793_v35 = vld [vmem:[#allocation2 + $0x1a2] sm:$0xff] }
 0x1ee   : > { %1488 = vrot.lane.b32.xlu0 %v1400_v9, %s4721_s9  ;;  %2367 = vst.msk [vmem:[#allocation4 + $0x40] sm:$0x3] %vm2360_vm13, %v7186_v0  ;;  %2370 = vst.msk [vmem:[#allocation4 + $0x58] sm:$0x3] %vm2360_vm13, %v7186_v0 }
 0x1ef   : > { %v1652_v55 = vpop.permute.xlu1 %1651  ;;  %v1962_v6 = vld [vmem:[#allocation3 + $0x38] sm:$0xff]  ;;  %2368 = vst.msk [vmem:[#allocation4 + $0x48] sm:$0xff] %vm2357_vm12, %v7186_v0  ;;  %2369 = vst.msk [vmem:[#allocation4 + $0x50] sm:$0xff] %vm2357_vm12, %v7186_v0 }
 0x1f0   : > { %1739 = vst.msk [vmem:[#allocation3 + $0x48] sm:$0xff] %vm1729_vm9, %v1652_v55  ;;  %4592 = vmatmul.mubr.msk.f32.gmra.mrb[6].mxu0 %vm1999_vm11, %v1962_v6  ;;  %v1461_v10 = vpop.permute.xlu0 %1460 }
 0x1f1   : > { %1296 = vrot.lane.b32.xlu1 %v1785_v5, %s4720_s29  ;;  %1547 = vst.msk [vmem:[#allocation3 + $0x50] sm:$0xff] %vm1536_vm8, %v1461_v10  ;;  %v2510_v33 = vld [vmem:[#allocation4 + $0x1] sm:$0xff] }
 0x1f2   : > { %1681 = vrot.lane.b32.xlu0 %v1593_v12, %s4722_s14  ;;  %2371 = vst.msk [vmem:[#allocation4 + $0x60] sm:$0xff] %vm2357_vm12, %v7186_v0  ;;  %2372 = vst.msk [vmem:[#allocation4 + $0x68] sm:$0xff] %vm2357_vm12, %v7186_v0  ;;  %v2511_v12 = vld [vmem:[#allocation4 + $0x9] sm:$0xff] }
 0x1f3   : > { %v1845_v57 = vpop.permute.xlu1 %1844  ;;  %2373 = vst.msk [vmem:[#allocation4 + $0x70] sm:$0x3] %vm2360_vm13, %v7186_v0  ;;  %2376 = vst.msk [vmem:[#allocation4 + $0x88] sm:$0x3] %vm2360_vm13, %v7186_v0 }
 0x1f4   : > { %1932 = vst.msk [vmem:[#allocation3 + $0x48] sm:$0xff] %vm1922_vm10, %v1845_v57  ;;  %v1654_v37 = vpop.permute.xlu0 %1653  ;;  %v1963_v7 = vld [vmem:[#allocation3 + $0x40] sm:$0xff] }
 0x1f5   : > { %1490 = vrot.lane.b32.xlu1 %v1401_v16, %s4721_s9  ;;  %1740 = vst.msk [vmem:[#allocation3 + $0x50] sm:$0xff] %vm1729_vm9, %v1654_v37  ;;  %4594 = vmatprep.mubr.msk.f32.mxu0 %vm1999_vm11, %v1963_v7 }
 0x1f6   : > { %1874 = vrot.lane.b32.xlu0 %v1786_v13, %s4723_s17  ;;  %2374 = vst.msk [vmem:[#allocation4 + $0x78] sm:$0xff] %vm2357_vm12, %v7186_v0  ;;  %2375 = vst.msk [vmem:[#allocation4 + $0x80] sm:$0xff] %vm2357_vm12, %v7186_v0 }
 0x1f7   : > { %v1463_v58 = vpop.permute.xlu1 %1462  ;;  %2377 = vst.msk [vmem:[#allocation4 + $0x90] sm:$0xff] %vm2357_vm12, %v7186_v0  ;;  %2378 = vst.msk [vmem:[#allocation4 + $0x98] sm:$0xff] %vm2357_vm12, %v7186_v0 }
 0x1f8   : > { %1548 = vst.msk [vmem:[#allocation3 + $0x58] sm:$0xff] %vm1536_vm8, %v1463_v58  ;;  %v1847_v17 = vpop.permute.xlu0 %1846 }
 0x1f9   : > { %1683 = vrot.lane.b32.xlu1 %v1594_v20, %s4722_s14  ;;  %1933 = vst.msk [vmem:[#allocation3 + $0x50] sm:$0xff] %vm1922_vm10, %v1847_v17 }
 0x1fa   : > { %1298 = vrot.lane.b32.xlu0 %v1786_v13, %s4720_s29  ;;  %2379 = vst.msk [vmem:[#allocation4 + $0xa0] sm:$0x3] %vm2360_vm13, %v7186_v0  ;;  %2382 = vst.msk [vmem:[#allocation4 + $0xb8] sm:$0x3] %vm2360_vm13, %v7186_v0 }
 0x1fb   : > { %v1656_v8 = vpop.permute.xlu1 %1655  ;;  %v1964_v47 = vld [vmem:[#allocation3 + $0x48] sm:$0xff]  ;;  %2380 = vst.msk [vmem:[#allocation4 + $0xa8] sm:$0xff] %vm2357_vm12, %v7186_v0  ;;  %2381 = vst.msk [vmem:[#allocation4 + $0xb0] sm:$0xff] %vm2357_vm12, %v7186_v0 }
 0x1fc   : > { %1741 = vst.msk [vmem:[#allocation3 + $0x58] sm:$0xff] %vm1729_vm9, %v1656_v8  ;;  %4595 = vmatmul.mubr.msk.f32.gmra.mrb[8].mxu0 %vm1999_vm11, %v1964_v47  ;;  %v1849_v59 = vpop.permute.xlu0 %1848 }
 0x1fd   : > { %1876 = vrot.lane.b32.xlu1 %v1787_v24, %s4723_s17  ;;  %1934 = vst.msk [vmem:[#allocation3 + $0x58] sm:$0xff] %vm1922_vm10, %v1849_v59 }
 0x1fe   : > { %1492 = vrot.lane.b32.xlu0 %v1402_v21, %s4721_s9  ;;  %2383 = vst.msk [vmem:[#allocation4 + $0xc0] sm:$0xff] %vm2357_vm12, %v7186_v0  ;;  %2384 = vst.msk [vmem:[#allocation4 + $0xc8] sm:$0xff] %vm2357_vm12, %v7186_v0 }
 0x1ff   : > { %v1271_v48 = vpop.permute.xlu1 %1270  ;;  %2385 = vst.msk [vmem:[#allocation4 + $0xd0] sm:$0x3] %vm2360_vm13, %v7186_v0  ;;  %2388 = vst.msk [vmem:[#allocation4 + $0xe8] sm:$0x3] %vm2360_vm13, %v7186_v0 }
 0x200   : > { %1355 = vst.msk [vmem:[#allocation3 + $0x60] sm:$0xff] %vm1342_vm7, %v1271_v48  ;;  %v1465_v25 = vpop.permute.xlu0 %1464  ;;  %v1965_v34 = vld [vmem:[#allocation3 + $0x50] sm:$0xff] }
 0x201   : > { %1300 = vrot.lane.b32.xlu1 %v1787_v24, %s4720_s29  ;;  %1549 = vst.msk [vmem:[#allocation3 + $0x60] sm:$0xff] %vm1536_vm8, %v1465_v25  ;;  %4597 = vmatprep.mubr.msk.f32.mxu0 %vm1999_vm11, %v1965_v34 }
 0x202   : > { %1685 = vrot.lane.b32.xlu0 %v1595_v28, %s4722_s14  ;;  %2386 = vst.msk [vmem:[#allocation4 + $0xd8] sm:$0xff] %vm2357_vm12, %v7186_v0  ;;  %2387 = vst.msk [vmem:[#allocation4 + $0xe0] sm:$0xff] %vm2357_vm12, %v7186_v0 }
 0x203   : > { %v1273_v26 = vpop.permute.xlu1 %1272  ;;  %2389 = vst.msk [vmem:[#allocation4 + $0xf0] sm:$0xff] %vm2357_vm12, %v7186_v0  ;;  %2390 = vst.msk [vmem:[#allocation4 + $0xf8] sm:$0xff] %vm2357_vm12, %v7186_v0 }
 0x204   : > { %1356 = vst.msk [vmem:[#allocation3 + $0x68] sm:$0xff] %vm1342_vm7, %v1273_v26  ;;  %v1658_v30 = vpop.permute.xlu0 %1657  ;;  %v1966_v31 = vld [vmem:[#allocation3 + $0x58] sm:$0xff] }
 0x205   : > { %1494 = vrot.lane.b32.xlu1 %v1403_v60, %s4721_s9  ;;  %1742 = vst.msk [vmem:[#allocation3 + $0x60] sm:$0xff] %vm1729_vm9, %v1658_v30  ;;  %4598 = vmatmul.mubr.msk.f32.gmra.mrb[10].mxu0 %vm1999_vm11, %v1966_v31 }
 0x206   : > { %1878 = vrot.lane.b32.xlu0 %v1788_v27, %s4723_s17  ;;  %2391 = vst.msk [vmem:[#allocation4 + $0x100] sm:$0x3] %vm2360_vm13, %v7186_v0  ;;  %2394 = vst.msk [vmem:[#allocation4 + $0x118] sm:$0x3] %vm2360_vm13, %v7186_v0 }
 0x207   : > { %v1467_v32 = vpop.permute.xlu1 %1466  ;;  %2392 = vst.msk [vmem:[#allocation4 + $0x108] sm:$0xff] %vm2357_vm12, %v7186_v0  ;;  %2393 = vst.msk [vmem:[#allocation4 + $0x110] sm:$0xff] %vm2357_vm12, %v7186_v0 }
 0x208   : > { %1550 = vst.msk [vmem:[#allocation3 + $0x68] sm:$0xff] %vm1536_vm8, %v1467_v32  ;;  %v1851_v39 = vpop.permute.xlu0 %1850 }
 0x209   : > { %1687 = vrot.lane.b32.xlu1 %v1596_v61, %s4722_s14  ;;  %1935 = vst.msk [vmem:[#allocation3 + $0x60] sm:$0xff] %vm1922_vm10, %v1851_v39 }
 0x20a   : > { %1302 = vrot.lane.b32.xlu0 %v1788_v27, %s4720_s29  ;;  %2395 = vst.msk [vmem:[#allocation4 + $0x120] sm:$0xff] %vm2357_vm12, %v7186_v0  ;;  %2396 = vst.msk [vmem:[#allocation4 + $0x128] sm:$0xff] %vm2357_vm12, %v7186_v0 }
 0x20b   : > { %v1660_v41 = vpop.permute.xlu1 %1659  ;;  %2397 = vst.msk [vmem:[#allocation4 + $0x130] sm:$0x3] %vm2360_vm13, %v7186_v0  ;;  %2400 = vst.msk [vmem:[#allocation4 + $0x148] sm:$0x3] %vm2360_vm13, %v7186_v0 }
 0x20c   : > { %1743 = vst.msk [vmem:[#allocation3 + $0x68] sm:$0xff] %vm1729_vm9, %v1660_v41  ;;  %v1853_v42 = vpop.permute.xlu0 %1852 }
 0x20d   : > { %1880 = vrot.lane.b32.xlu1 %v1789_v40, %s4723_s17  ;;  %1936 = vst.msk [vmem:[#allocation3 + $0x68] sm:$0xff] %vm1922_vm10, %v1853_v42 }
 0x20e   : > { %1496 = vrot.lane.b32.xlu0 %v1404_v62, %s4721_s9  ;;  %2398 = vst.msk [vmem:[#allocation4 + $0x138] sm:$0xff] %vm2357_vm12, %v7186_v0  ;;  %2399 = vst.msk [vmem:[#allocation4 + $0x140] sm:$0xff] %vm2357_vm12, %v7186_v0 }
 0x20f   : > { %v1275_v43 = vpop.permute.xlu1 %1274  ;;  %2401 = vst.msk [vmem:[#allocation4 + $0x150] sm:$0xff] %vm2357_vm12, %v7186_v0  ;;  %2402 = vst.msk [vmem:[#allocation4 + $0x158] sm:$0xff] %vm2357_vm12, %v7186_v0 }
 0x210   : > { %1357 = vst.msk [vmem:[#allocation3 + $0x70] sm:$0xff] %vm1342_vm7, %v1275_v43  ;;  %v1469_v46 = vpop.permute.xlu0 %1468  ;;  %v1967_v1 = vld [vmem:[#allocation3 + $0x60] sm:$0xff] }
 0x211   : > { %1304 = vrot.lane.b32.xlu1 %v1789_v40, %s4720_s29  ;;  %1551 = vst.msk [vmem:[#allocation3 + $0x70] sm:$0xff] %vm1536_vm8, %v1469_v46  ;;  %4600 = vmatprep.mubr.msk.f32.mxu0 %vm1999_vm11, %v1967_v1 }
 0x212   : > { %1689 = vrot.lane.b32.xlu0 %v1597_v44, %s4722_s14  ;;  %2403 = vst.msk [vmem:[#allocation4 + $0x160] sm:$0x3] %vm2360_vm13, %v7186_v0  ;;  %2406 = vst.msk [vmem:[#allocation4 + $0x178] sm:$0x3] %vm2360_vm13, %v7186_v0 }
 0x213   : > { %v1277_v53 = vpop.permute.xlu1 %1276  ;;  %2404 = vst.msk [vmem:[#allocation4 + $0x168] sm:$0xff] %vm2357_vm12, %v7186_v0  ;;  %2405 = vst.msk [vmem:[#allocation4 + $0x170] sm:$0xff] %vm2357_vm12, %v7186_v0 }
 0x214   : > { %1358 = vst.msk [vmem:[#allocation3 + $0x78] sm:$0xff] %vm1342_vm7, %v1277_v53  ;;  %v1662_v63 = vpop.permute.xlu0 %1661  ;;  %v1968_v2 = vld [vmem:[#allocation3 + $0x68] sm:$0xff] }
 0x215   : > { %1498 = vrot.lane.b32.xlu1 %v1405_v51, %s4721_s9  ;;  %1744 = vst.msk [vmem:[#allocation3 + $0x70] sm:$0xff] %vm1729_vm9, %v1662_v63  ;;  %4601 = vmatmul.mubr.msk.f32.gmra.mrb[12].mxu0 %vm1999_vm11, %v1968_v2 }
 0x216   : > { %1882 = vrot.lane.b32.xlu0 %v1790_v56, %s4723_s17  ;;  %2407 = vst.msk [vmem:[#allocation4 + $0x180] sm:$0xff] %vm2357_vm12, %v7186_v0  ;;  %2408 = vst.msk [vmem:[#allocation4 + $0x188] sm:$0xff] %vm2357_vm12, %v7186_v0 }
 0x217   : > { %v1471_v14 = vpop.permute.xlu1 %1470  ;;  %2409 = vst.msk [vmem:[#allocation4 + $0x190] sm:$0x3] %vm2360_vm13, %v7186_v0  ;;  %2412 = vst.msk [vmem:[#allocation4 + $0x1a8] sm:$0x3] %vm2360_vm13, %v7186_v0 }
 0x218   : > { %1552 = vst.msk [vmem:[#allocation3 + $0x78] sm:$0xff] %vm1536_vm8, %v1471_v14  ;;  %v1855_v15 = vpop.permute.xlu0 %1854 }
 0x219   : > { %1691 = vrot.lane.b32.xlu1 %v1598_v11, %s4722_s14  ;;  %1937 = vst.msk [vmem:[#allocation3 + $0x70] sm:$0xff] %vm1922_vm10, %v1855_v15 }
 0x21a   : > { %1306 = vrot.lane.b32.xlu0 %v1790_v56, %s4720_s29  ;;  %2410 = vst.msk [vmem:[#allocation4 + $0x198] sm:$0xff] %vm2357_vm12, %v7186_v0  ;;  %2411 = vst.msk [vmem:[#allocation4 + $0x1a0] sm:$0xff] %vm2357_vm12, %v7186_v0 }
 0x21b   : > { %v1664_v50 = vpop.permute.xlu1 %1663 }
 0x21c   : > { %1745 = vst.msk [vmem:[#allocation3 + $0x78] sm:$0xff] %vm1729_vm9, %v1664_v50  ;;  %v1279_v3 = vpop.permute.xlu0 %1278 }
 0x21d   : > { %1884 = vrot.lane.b32.xlu1 %v5769_v18, %s4723_s17  ;;  %1359 = vst.msk [vmem:[#allocation3 + $0x80] sm:$0xff] %vm1342_vm7, %v1279_v3 }
 0x21e   : > { %1500 = vrot.lane.b32.xlu0 %v1406_v19, %s4721_s9 }
 0x21f   : > { %v1857_v49 = vpop.permute.xlu1 %1856 }
 0x220   : > { %1938 = vst.msk [vmem:[#allocation3 + $0x78] sm:$0xff] %vm1922_vm10, %v1857_v49  ;;  %v1473_v52 = vpop.permute.xlu0 %1472  ;;  %v1969_v4 = vld [vmem:[#allocation3 + $0x70] sm:$0xff] }
 0x221   : > { %1308 = vrot.lane.b32.xlu1 %v5769_v18, %s4720_s29  ;;  %1553 = vst.msk [vmem:[#allocation3 + $0x80] sm:$0xff] %vm1536_vm8, %v1473_v52  ;;  %4603 = vmatprep.mubr.msk.f32.mxu0 %vm1999_vm11, %v1969_v4 }
 0x222   : > { %1693 = vrot.lane.b32.xlu0 %v1599_v22, %s4722_s14 }
 0x223   : > { %v1281_v36 = vpop.permute.xlu1 %1280 }
 0x224   : > { %1360 = vst.msk [vmem:[#allocation3 + $0x88] sm:$0xff] %vm1342_vm7, %v1281_v36  ;;  %v1666_v38 = vpop.permute.xlu0 %1665 }
 0x225   : > { %1502 = vrot.lane.b32.xlu1 %v1407_v23, %s4721_s9  ;;  %1746 = vst.msk [vmem:[#allocation3 + $0x80] sm:$0xff] %vm1729_vm9, %v1666_v38  ;;  %s4725_s9 = smov 64  }
 0x226   : > { %1886 = vrot.lane.b32.xlu0 %v1792_v29, %s4723_s17 }
 0x227   : > { %v1475_v54 = vpop.permute.xlu1 %1474  ;;  %v1970_v5 = vld [vmem:[#allocation3 + $0x78] sm:$0xff] }
 0x228   : > { %1554 = vst.msk [vmem:[#allocation3 + $0x88] sm:$0xff] %vm1536_vm8, %v1475_v54  ;;  %4604 = vmatmul.mubr.msk.f32.gmra.mrb[14].mxu0 %vm1999_vm11, %v1970_v5  ;;  %v1859_v9 = vpop.permute.xlu0 %1858 }
 0x229   : > { %1695 = vrot.lane.b32.xlu1 %v1600_v45, %s4722_s14  ;;  %1939 = vst.msk [vmem:[#allocation3 + $0x80] sm:$0xff] %vm1922_vm10, %v1859_v9 }
 0x22a   : > { %2574 = vrot.lane.b32.xlu0 %v2510_v33, %s4719_s28 }
 0x22b   : > { %v1668_v55 = vpop.permute.xlu1 %1667 }
 0x22c   : > { %1747 = vst.msk [vmem:[#allocation3 + $0x88] sm:$0xff] %vm1729_vm9, %v1668_v55  ;;  %v1283_v6 = vpop.permute.xlu0 %1282 }
 0x22d   : > { %1888 = vrot.lane.b32.xlu1 %v1793_v35, %s4723_s17  ;;  %1361 = vst.msk [vmem:[#allocation3 + $0x90] sm:$0xff] %vm1342_vm7, %v1283_v6 }
 0x22f   : > { %v1861_v10 = vpop.permute.xlu1 %1860 }
 0x230   : > { %1940 = vst.msk [vmem:[#allocation3 + $0x88] sm:$0xff] %vm1922_vm10, %v1861_v10  ;;  %v1477_v16 = vpop.permute.xlu0 %1476  ;;  %v1971_v57 = vld [vmem:[#allocation3 + $0x80] sm:$0xff] }
 0x231   : > { %2576 = vrot.lane.b32.xlu1 %v2511_v12, %s4719_s28  ;;  %1555 = vst.msk [vmem:[#allocation3 + $0x90] sm:$0xff] %vm1536_vm8, %v1477_v16  ;;  %4606 = vmatprep.mubr.msk.f32.mxu0 %vm1999_vm11, %v1971_v57 }
 0x233   : > { %v1285_v13 = vpop.permute.xlu1 %1284 }
 0x234   : > { %1362 = vst.msk [vmem:[#allocation3 + $0x98] sm:$0xff] %vm1342_vm7, %v1285_v13  ;;  %v1670_v37 = vpop.permute.xlu0 %1669 }
 0x235   : > { %1748 = vst.msk [vmem:[#allocation3 + $0x90] sm:$0xff] %vm1729_vm9, %v1670_v37  ;;  %v2447_v37 = vld [vmem:[#allocation4 + $0x8] sm:$0xff] }
 0x236   : > { %2479 = vst.msk [vmem:[#allocation5 + $0x10] sm:$0xff] %vm2357_vm12, %v2447_v37 }
 0x237   : > { %v1479_v7 = vpop.permute.xlu1 %1478  ;;  %v1972_v20 = vld [vmem:[#allocation3 + $0x88] sm:$0xff] }
 0x238   : > { %1556 = vst.msk [vmem:[#allocation3 + $0x98] sm:$0xff] %vm1536_vm8, %v1479_v7  ;;  %4607 = vmatmul.mubr.msk.f32.gmra.mrb[16].mxu0 %vm1999_vm11, %v1972_v20  ;;  %v1863_v58 = vpop.permute.xlu0 %1862  ;;  %v2446_v7 = vld [vmem:[#allocation4] sm:$0xff] }
 0x239   : > { %1941 = vst.msk [vmem:[#allocation3 + $0x90] sm:$0xff] %vm1922_vm10, %v1863_v58  ;;  %v5979_v58 = vld [vmem:[%s7105_s2] ss:$0 sm:$0xff] }
 0x23a   : > { %2478 = vst.msk [vmem:[#allocation5] sm:$0xff] %vm2357_vm12, %v2446_v7 }
 0x23b   : > { %v1672_v17 = vpop.permute.xlu1 %1671 }
 0x23c   : > { %1749 = vst.msk [vmem:[#allocation3 + $0x98] sm:$0xff] %vm1729_vm9, %v1672_v17  ;;  %v1287_v24 = vpop.permute.xlu0 %1286 }
 0x23d   : > { %1363 = vst.msk [vmem:[#allocation3 + $0xa0] sm:$0xff] %vm1342_vm7, %v1287_v24 }
 0x23f   : > { %v1865_v8 = vpop.permute.xlu1 %1864 }
 0x240   : > { %1942 = vst.msk [vmem:[#allocation3 + $0x98] sm:$0xff] %vm1922_vm10, %v1865_v8  ;;  %v1481_v47 = vpop.permute.xlu0 %1480  ;;  %v1973_v21 = vld [vmem:[#allocation3 + $0x90] sm:$0xff] }
 0x241   : > { %1557 = vst.msk [vmem:[#allocation3 + $0xa0] sm:$0xff] %vm1536_vm8, %v1481_v47  ;;  %4609 = vmatprep.mubr.msk.f32.mxu0 %vm1999_vm11, %v1973_v21 }
 0x243   : > { %v1289_v59 = vpop.permute.xlu1 %1288 }
 0x244   : > { %1364 = vst.msk [vmem:[#allocation3 + $0xa8] sm:$0xff] %vm1342_vm7, %v1289_v59  ;;  %v1674_v48 = vpop.permute.xlu0 %1673 }
 0x245   : > { %1750 = vst.msk [vmem:[#allocation3 + $0xa0] sm:$0xff] %vm1729_vm9, %v1674_v48 }
 0x247   : > { %v1483_v28 = vpop.permute.xlu1 %1482  ;;  %v1974_v25 = vld [vmem:[#allocation3 + $0x98] sm:$0xff] }
 0x248   : > { %1558 = vst.msk [vmem:[#allocation3 + $0xa8] sm:$0xff] %vm1536_vm8, %v1483_v28  ;;  %4610 = vmatmul.mubr.msk.f32.gmra.mrb[18].mxu0 %vm1999_vm11, %v1974_v25  ;;  %v1867_v34 = vpop.permute.xlu0 %1866 }
 0x249   : > { %1943 = vst.msk [vmem:[#allocation3 + $0xa0] sm:$0xff] %vm1922_vm10, %v1867_v34 }
 0x24b   : > { %v1676_v60 = vpop.permute.xlu1 %1675 }
 0x24c   : > { %1751 = vst.msk [vmem:[#allocation3 + $0xa8] sm:$0xff] %vm1729_vm9, %v1676_v60  ;;  %v1291_v26 = vpop.permute.xlu0 %1290 }
 0x24d   : > { %1365 = vst.msk [vmem:[#allocation3 + $0xb0] sm:$0xff] %vm1342_vm7, %v1291_v26 }
 0x24f   : > { %v1869_v27 = vpop.permute.xlu1 %1868 }
 0x250   : > { %1944 = vst.msk [vmem:[#allocation3 + $0xa8] sm:$0xff] %vm1922_vm10, %v1869_v27  ;;  %v1485_v30 = vpop.permute.xlu0 %1484  ;;  %v1975_v31 = vld [vmem:[#allocation3 + $0xa0] sm:$0xff] }
 0x251   : > { %1559 = vst.msk [vmem:[#allocation3 + $0xb0] sm:$0xff] %vm1536_vm8, %v1485_v30  ;;  %4612 = vmatprep.mubr.msk.f32.mxu0 %vm1999_vm11, %v1975_v31 }
 0x253   : > { %v1293_v61 = vpop.permute.xlu1 %1292 }
 0x254   : > { %1366 = vst.msk [vmem:[#allocation3 + $0xb8] sm:$0xff] %vm1342_vm7, %v1293_v61  ;;  %v1678_v32 = vpop.permute.xlu0 %1677 }
 0x255   : > { %1752 = vst.msk [vmem:[#allocation3 + $0xb0] sm:$0xff] %vm1729_vm9, %v1678_v32 }
 0x257   : > { %v1487_v39 = vpop.permute.xlu1 %1486  ;;  %v1976_v40 = vld [vmem:[#allocation3 + $0xa8] sm:$0xff] }
 0x258   : > { %1560 = vst.msk [vmem:[#allocation3 + $0xb8] sm:$0xff] %vm1536_vm8, %v1487_v39  ;;  %4613 = vmatmul.mubr.msk.f32.gmra.mrb[20].mxu0 %vm1999_vm11, %v1976_v40  ;;  %v1871_v41 = vpop.permute.xlu0 %1870 }
 0x259   : > { %1945 = vst.msk [vmem:[#allocation3 + $0xb0] sm:$0xff] %vm1922_vm10, %v1871_v41 }
 0x25b   : > { %v1680_v62 = vpop.permute.xlu1 %1679 }
 0x25c   : > { %1753 = vst.msk [vmem:[#allocation3 + $0xb8] sm:$0xff] %vm1729_vm9, %v1680_v62  ;;  %v1295_v42 = vpop.permute.xlu0 %1294 }
 0x25d   : > { %1367 = vst.msk [vmem:[#allocation3 + $0xc0] sm:$0xff] %vm1342_vm7, %v1295_v42 }
 0x25f   : > { %v1873_v43 = vpop.permute.xlu1 %1872 }
 0x260   : > { %1946 = vst.msk [vmem:[#allocation3 + $0xb8] sm:$0xff] %vm1922_vm10, %v1873_v43  ;;  %v1489_v44 = vpop.permute.xlu0 %1488  ;;  %v1977_v46 = vld [vmem:[#allocation3 + $0xb0] sm:$0xff] }
 0x261   : > { %1561 = vst.msk [vmem:[#allocation3 + $0xc0] sm:$0xff] %vm1536_vm8, %v1489_v44  ;;  %4615 = vmatprep.mubr.msk.f32.mxu0 %vm1999_vm11, %v1977_v46 }
 0x263   : > { %v1297_v1 = vpop.permute.xlu1 %1296 }
 0x264   : > { %1368 = vst.msk [vmem:[#allocation3 + $0xc8] sm:$0xff] %vm1342_vm7, %v1297_v1  ;;  %v1682_v51 = vpop.permute.xlu0 %1681 }
 0x265   : > { %1754 = vst.msk [vmem:[#allocation3 + $0xc0] sm:$0xff] %vm1729_vm9, %v1682_v51 }
 0x267   : > { %v1491_v53 = vpop.permute.xlu1 %1490  ;;  %v1978_v56 = vld [vmem:[#allocation3 + $0xb8] sm:$0xff] }
 0x268   : > { %1562 = vst.msk [vmem:[#allocation3 + $0xc8] sm:$0xff] %vm1536_vm8, %v1491_v53  ;;  %4616 = vmatmul.mubr.msk.f32.gmra.mrb[22].mxu0 %vm1999_vm11, %v1978_v56  ;;  %v1875_v63 = vpop.permute.xlu0 %1874 }
 0x269   : > { %1947 = vst.msk [vmem:[#allocation3 + $0xc0] sm:$0xff] %vm1922_vm10, %v1875_v63 }
 0x26b   : > { %v1684_v2 = vpop.permute.xlu1 %1683 }
 0x26c   : > { %1755 = vst.msk [vmem:[#allocation3 + $0xc8] sm:$0xff] %vm1729_vm9, %v1684_v2  ;;  %v1299_v11 = vpop.permute.xlu0 %1298 }
 0x26d   : > { %1369 = vst.msk [vmem:[#allocation3 + $0xd0] sm:$0xff] %vm1342_vm7, %v1299_v11 }
 0x26f   : > { %v1877_v14 = vpop.permute.xlu1 %1876 }
 0x270   : > { %1948 = vst.msk [vmem:[#allocation3 + $0xc8] sm:$0xff] %vm1922_vm10, %v1877_v14  ;;  %v1493_v15 = vpop.permute.xlu0 %1492  ;;  %v1979_v18 = vld [vmem:[#allocation3 + $0xc0] sm:$0xff] }
 0x271   : > { %1563 = vst.msk [vmem:[#allocation3 + $0xd0] sm:$0xff] %vm1536_vm8, %v1493_v15  ;;  %4618 = vmatprep.mubr.msk.f32.mxu0 %vm1999_vm11, %v1979_v18 }
 0x273   : > { %v1301_v50 = vpop.permute.xlu1 %1300 }
 0x274   : > { %1370 = vst.msk [vmem:[#allocation3 + $0xd8] sm:$0xff] %vm1342_vm7, %v1301_v50  ;;  %v1686_v19 = vpop.permute.xlu0 %1685 }
 0x275   : > { %1756 = vst.msk [vmem:[#allocation3 + $0xd0] sm:$0xff] %vm1729_vm9, %v1686_v19 }
 0x277   : > { %v1495_v3 = vpop.permute.xlu1 %1494  ;;  %v1980_v49 = vld [vmem:[#allocation3 + $0xc8] sm:$0xff] }
 0x278   : > { %1564 = vst.msk [vmem:[#allocation3 + $0xd8] sm:$0xff] %vm1536_vm8, %v1495_v3  ;;  %4619 = vmatmul.mubr.msk.f32.gmra.mrb[24].mxu0 %vm1999_vm11, %v1980_v49  ;;  %v1879_v22 = vpop.permute.xlu0 %1878 }
 0x279   : > { %1949 = vst.msk [vmem:[#allocation3 + $0xd0] sm:$0xff] %vm1922_vm10, %v1879_v22 }
 0x27b   : > { %v1688_v0 = vpop.permute.xlu1 %1687 }
 0x27c   : > { %1757 = vst.msk [vmem:[#allocation3 + $0xd8] sm:$0xff] %vm1729_vm9, %v1688_v0  ;;  %v1303_v52 = vpop.permute.xlu0 %1302 }
 0x27d   : > { %1371 = vst.msk [vmem:[#allocation3 + $0xe0] sm:$0xff] %vm1342_vm7, %v1303_v52 }
 0x27f   : > { %v1881_v4 = vpop.permute.xlu1 %1880 }
 0x280   : > { %1950 = vst.msk [vmem:[#allocation3 + $0xd8] sm:$0xff] %vm1922_vm10, %v1881_v4  ;;  %v1497_v23 = vpop.permute.xlu0 %1496  ;;  %v1981_v36 = vld [vmem:[#allocation3 + $0xd0] sm:$0xff] }
 0x281   : > { %1565 = vst.msk [vmem:[#allocation3 + $0xe0] sm:$0xff] %vm1536_vm8, %v1497_v23  ;;  %4621 = vmatprep.mubr.msk.f32.mxu0 %vm1999_vm11, %v1981_v36 }
 0x283   : > { %v1305_v29 = vpop.permute.xlu1 %1304 }
 0x284   : > { %1372 = vst.msk [vmem:[#allocation3 + $0xe8] sm:$0xff] %vm1342_vm7, %v1305_v29  ;;  %v1690_v38 = vpop.permute.xlu0 %1689 }
 0x285   : > { %1758 = vst.msk [vmem:[#allocation3 + $0xe0] sm:$0xff] %vm1729_vm9, %v1690_v38 }
 0x287   : > { %v1499_v45 = vpop.permute.xlu1 %1498  ;;  %v1982_v54 = vld [vmem:[#allocation3 + $0xd8] sm:$0xff] }
 0x288   : > { %1566 = vst.msk [vmem:[#allocation3 + $0xe8] sm:$0xff] %vm1536_vm8, %v1499_v45  ;;  %4622 = vmatmul.mubr.msk.f32.gmra.mrb[26].mxu0 %vm1999_vm11, %v1982_v54  ;;  %v1883_v5 = vpop.permute.xlu0 %1882 }
 0x289   : > { %1951 = vst.msk [vmem:[#allocation3 + $0xe0] sm:$0xff] %vm1922_vm10, %v1883_v5 }
 0x28b   : > { %v1692_v33 = vpop.permute.xlu1 %1691 }
 0x28c   : > { %1759 = vst.msk [vmem:[#allocation3 + $0xe8] sm:$0xff] %vm1729_vm9, %v1692_v33  ;;  %v1307_v9 = vpop.permute.xlu0 %1306 }
 0x28d   : > { %1373 = vst.msk [vmem:[#allocation3 + $0xf0] sm:$0xff] %vm1342_vm7, %v1307_v9 }
 0x28f   : > { %v1885_v35 = vpop.permute.xlu1 %1884 }
 0x290   : > { %1952 = vst.msk [vmem:[#allocation3 + $0xe8] sm:$0xff] %vm1922_vm10, %v1885_v35  ;;  %v1983_v55 = vld [vmem:[#allocation3 + $0xe0] sm:$0xff]  ;;  %v1501_v6 = vpop.permute.xlu0 %1500 }
 0x291   : > { %4624 = vmatprep.mubr.msk.f32.mxu0 %vm1999_vm11, %v1983_v55  ;;  %1567 = vst.msk [vmem:[#allocation3 + $0xf0] sm:$0xff] %vm1536_vm8, %v1501_v6 }
 0x293   : > { %v1309_v12 = vpop.permute.xlu1 %1308 }
 0x294   : > { %1374 = vst.msk [vmem:[#allocation3 + $0xf8] sm:$0xff] %vm1342_vm7, %v1309_v12  ;;  %v1694_v10 = vpop.permute.xlu0 %1693 }
 0x295   : > { %1760 = vst.msk [vmem:[#allocation3 + $0xf0] sm:$0xff] %vm1729_vm9, %v1694_v10 }
 0x297   : > { %v1984_v16 = vld [vmem:[#allocation3 + $0xe8] sm:$0xff]  ;;  %v1503_v57 = vpop.permute.xlu1 %1502 }
 0x298   : > { %4625 = vmatmul.mubr.msk.f32.gmra.mrb[28].mxu0 %vm1999_vm11, %v1984_v16  ;;  %1568 = vst.msk [vmem:[#allocation3 + $0xf8] sm:$0xff] %vm1536_vm8, %v1503_v57  ;;  %v1887_v13 = vpop.permute.xlu0 %1886 }
 0x299   : > { %1953 = vst.msk [vmem:[#allocation3 + $0xf0] sm:$0xff] %vm1922_vm10, %v1887_v13 }
 0x29b   : > { %v1696_v20 = vpop.permute.xlu1 %1695 }
 0x29c   : > { %1761 = vst.msk [vmem:[#allocation3 + $0xf8] sm:$0xff] %vm1729_vm9, %v1696_v20  ;;  %v2575_v17 = vpop.permute.xlu0 %2574 }
 0x29d   : > { %2671 = vst.msk [vmem:[#allocation5] sm:$0xff] %vm2670_vm14, %v2575_v17 }
 0x29f   : > { %v4584_v24 = vpop.f32.mrb[0].mxu0  ;;  %v1889_v8 = vpop.permute.xlu1 %1888 }
 0x2a0   : > { %v2172_v47 = vadd.f32 %v4584_v24, %v5979_v58  ;;  %v2166_v21 = vpop.f32.mrb[1].mxu0  ;;  %1954 = vst.msk [vmem:[#allocation3 + $0xf8] sm:$0xff] %vm1922_vm10, %v1889_v8  ;;  %v1985_v48 = vld [vmem:[#allocation3 + $0xf0] sm:$0xff] }
 0x2a1   : > { %v2167_v59 = vadd.f32 %v5979_v58, %v2166_v21  ;;  %4627 = vmatprep.mubr.msk.f32.mxu0 %vm1999_vm11, %v1985_v48 }
 0x2a2   : > { %v2326_v28 = vmax.f32 %v2172_v47, 0.0 }
 0x2a3   : > { %v2325_v25 = vmax.f32 %v2167_v59, 0.0  ;;  %v2577_v34 = vpop.permute.xlu1 %2576 }
 0x2a4   : > { %2415 = vst.msk [vmem:[#allocation4 + $0x21] sm:$0xff] %vm2357_vm12, %v2326_v28 }
 0x2a5   : > { %2672 = vst.msk [vmem:[#allocation5 + $0x10] sm:$0xff] %vm2670_vm14, %v2577_v34 }
 0x2a6   : > { %2414 = vst.msk [vmem:[#allocation4 + $0x19] sm:$0xff] %vm2357_vm12, %v2325_v25 }
 0x2a7   : > { %v1986_v60 = vld [vmem:[#allocation3 + $0xf8] sm:$0xff] }
 0x2a8   : > { %4628 = vmatmul.mubr.msk.f32.gmra.mrb[30].mxu0 %vm1999_vm11, %v1986_v60 }
 0x2ab   : > { %v4587_v26 = vpop.f32.mrb[2].mxu0  ;;  %v2513_v27 = vld [vmem:[#allocation4 + $0x21] sm:$0xff] }
 0x2ac   : > { %v2182_v30 = vadd.f32 %v4587_v26, %v5979_v58  ;;  %2580 = vrot.lane.b32.xlu1 %v2513_v27, %s4719_s28  ;;  %v2176_v31 = vpop.f32.mrb[3].mxu0 }
 0x2ad   : > { %v2512_v61 = vld [vmem:[#allocation4 + $0x19] sm:$0xff]  ;;  %v2177_v40 = vadd.f32 %v5979_v58, %v2176_v31 }
 0x2ae   : > { %v5992_v32 = vld [vmem:[#allocation4 + $0x20] sm:$0xff]  ;;  %v5994_v39 = vld [vmem:[#allocation4 + $0x18] sm:$0xff]  ;;  %2578 = vrot.lane.b32.xlu0 %v2512_v61, %s4719_s28  ;;  %v2328_v41 = vmax.f32 %v2182_v30, 0.0 }
 0x2af   : > { %2481 = vst.msk [vmem:[#allocation5 + $0x30] sm:$0xff] %vm2357_vm12, %v5992_v32  ;;  %2480 = vst.msk [vmem:[#allocation5 + $0x20] sm:$0xff] %vm2357_vm12, %v5994_v39  ;;  %v2327_v62 = vmax.f32 %v2177_v40, 0.0 }
 0x2b0   : > { %2417 = vst.msk [vmem:[#allocation4 + $0x39] sm:$0xff] %vm2357_vm12, %v2328_v41 }
 0x2b1   : > { %2416 = vst.msk [vmem:[#allocation4 + $0x31] sm:$0xff] %vm2357_vm12, %v2327_v62 }
 0x2b7   : > { %v4590_v42 = vpop.f32.mrb[4].mxu0  ;;  %v2515_v43 = vld [vmem:[#allocation4 + $0x39] sm:$0xff] }
 0x2b8   : > { %v2192_v44 = vadd.f32 %v4590_v42, %v5979_v58  ;;  %2584 = vrot.lane.b32.xlu1 %v2515_v43, %s4719_s28  ;;  %v2186_v46 = vpop.f32.mrb[5].mxu0  ;;  %v2514_v1 = vld [vmem:[#allocation4 + $0x31] sm:$0xff]  ;;  %v3863_v11 = vld [vmem:[#allocation4 + $0x3a] sm:$0xff] }
 0x2b9   : > { %v6006_v51 = vld [vmem:[#allocation4 + $0x32] sm:$0xff]  ;;  %v2187_v56 = vadd.f32 %v5979_v58, %v2186_v46  ;;  %2582 = vrot.lane.b32.xlu0 %v2514_v1, %s4719_s28  ;;  %3895 = vst.msk [vmem:[#allocation5 + $0x18] sm:$0xff] %vm2357_vm12, %v3863_v11 }
 0x2ba   : > { %v6008_v53 = vld [vmem:[#allocation4 + $0x38] sm:$0xff]  ;;  %3894 = vst.msk [vmem:[#allocation5 + $0x8] sm:$0xff] %vm2357_vm12, %v6006_v51  ;;  %v6016_v63 = vld [vmem:[#allocation4 + $0x30] sm:$0xff]  ;;  %v2330_v2 = vmax.f32 %v2192_v44, 0.0 }
 0x2bb   : > { %2483 = vst.msk [vmem:[#allocation5 + $0x50] sm:$0xff] %vm2357_vm12, %v6008_v53  ;;  %2482 = vst.msk [vmem:[#allocation5 + $0x40] sm:$0xff] %vm2357_vm12, %v6016_v63  ;;  %v2329_v14 = vmax.f32 %v2187_v56, 0.0 }
 0x2bc   : > { %2419 = vst.msk [vmem:[#allocation4 + $0x51] sm:$0xff] %vm2357_vm12, %v2330_v2 }
 0x2bd   : > { %2418 = vst.msk [vmem:[#allocation4 + $0x49] sm:$0xff] %vm2357_vm12, %v2329_v14 }
 0x2c1   : > { %v3927_v15 = vld [vmem:[#allocation5 + $0x8] sm:$0xff] }
 0x2c2   : > { %4499 = vmatprep.mubr.msk.f32.mxu0 %vm2357_vm12, %v3927_v15 }
 0x2c3   : > { %v4593_v18 = vpop.f32.mrb[6].mxu0  ;;  %v2517_v50 = vld [vmem:[#allocation4 + $0x51] sm:$0xff] }
 0x2c4   : > { %v2202_v19 = vadd.f32 %v4593_v18, %v5979_v58  ;;  %2588 = vrot.lane.b32.xlu1 %v2517_v50, %s4719_s28  ;;  %v2196_v3 = vpop.f32.mrb[7].mxu0  ;;  %v2516_v49 = vld [vmem:[#allocation4 + $0x49] sm:$0xff]  ;;  %v6030_v23 = vld [vmem:[#allocation4 + $0x52] sm:$0xff] }
 0x2c5   : > { %v2453_v22 = vld [vmem:[#allocation4 + $0x50] sm:$0xff]  ;;  %v2452_v0 = vld [vmem:[#allocation4 + $0x48] sm:$0xff]  ;;  %v2197_v52 = vadd.f32 %v5979_v58, %v2196_v3  ;;  %2586 = vrot.lane.b32.xlu0 %v2516_v49, %s4719_s28  ;;  %3897 = vst.msk [vmem:[#allocation5 + $0x38] sm:$0xff] %vm2357_vm12, %v6030_v23 }
 0x2c6   : > { %2485 = vst.msk [vmem:[#allocation5 + $0x70] sm:$0xff] %vm2357_vm12, %v2453_v22  ;;  %2484 = vst.msk [vmem:[#allocation5 + $0x60] sm:$0xff] %vm2357_vm12, %v2452_v0  ;;  %v2332_v4 = vmax.f32 %v2202_v19, 0.0  ;;  %v3864_v36 = vld [vmem:[#allocation4 + $0x4a] sm:$0xff] }
 0x2c7   : > { %v2331_v29 = vmax.f32 %v2197_v52, 0.0  ;;  %3896 = vst.msk [vmem:[#allocation5 + $0x28] sm:$0xff] %vm2357_vm12, %v3864_v36 }
 0x2c8   : > { %2421 = vst.msk [vmem:[#allocation4 + $0x69] sm:$0xff] %vm2357_vm12, %v2332_v4 }
 0x2c9   : > { %2420 = vst.msk [vmem:[#allocation4 + $0x61] sm:$0xff] %vm2357_vm12, %v2331_v29 }
 0x2cf   : > { %v4596_v38 = vpop.f32.mrb[8].mxu0  ;;  %v2519_v45 = vld [vmem:[#allocation4 + $0x69] sm:$0xff] }
 0x2d0   : > { %v6037_v54 = vld [vmem:[#allocation4 + $0x6a] sm:$0xff]  ;;  %v2212_v5 = vadd.f32 %v4596_v38, %v5979_v58  ;;  %2592 = vrot.lane.b32.xlu1 %v2519_v45, %s4719_s28  ;;  %v2206_v33 = vpop.f32.mrb[9].mxu0  ;;  %v2518_v9 = vld [vmem:[#allocation4 + $0x61] sm:$0xff] }
 0x2d1   : > { %7187 = vst [vmem:[#allocation6_spill] sm:$0xff] %v6037_v54  ;;  %v2455_v35 = vld [vmem:[#allocation4 + $0x68] sm:$0xff]  ;;  %v2454_v55 = vld [vmem:[#allocation4 + $0x60] sm:$0xff]  ;;  %3899 = vst.msk [vmem:[#allocation5 + $0x58] sm:$0xff] %vm2357_vm12, %v6037_v54  ;;  %v2207_v6 = vadd.f32 %v5979_v58, %v2206_v33  ;;  %2590 = vrot.lane.b32.xlu0 %v2518_v9, %s4719_s28 }
 0x2d2   : > { %2487 = vst.msk [vmem:[#allocation5 + $0x90] sm:$0xff] %vm2357_vm12, %v2455_v35  ;;  %2486 = vst.msk [vmem:[#allocation5 + $0x80] sm:$0xff] %vm2357_vm12, %v2454_v55  ;;  %v2334_v12 = vmax.f32 %v2212_v5, 0.0  ;;  %v6047_v10 = vld [vmem:[#allocation4 + $0x62] sm:$0xff] }
 0x2d3   : > { %7188 = vst [vmem:[#allocation7_spill] sm:$0xff] %v6047_v10  ;;  %v2333_v16 = vmax.f32 %v2207_v6, 0.0  ;;  %3898 = vst.msk [vmem:[#allocation5 + $0x48] sm:$0xff] %vm2357_vm12, %v6047_v10  ;;  %v7141_v10 = vmov 0.0|0.0  }
 0x2d4   : > { %2423 = vst.msk [vmem:[#allocation4 + $0x81] sm:$0xff] %vm2357_vm12, %v2334_v12  ;;  %4665 = vmatprep.subr.bf16.mxu1 %v7141_v10  ;;  %4638 = vmatprep.subr.bf16.mxu0 %v7141_v10 }
 0x2d5   : > { %2422 = vst.msk [vmem:[#allocation4 + $0x79] sm:$0xff] %vm2357_vm12, %v2333_v16 }
 0x2d8   : > { %v4599_v57 = vpop.f32.mrb[10].mxu0 }
 0x2d9   : > { %v2222_v13 = vadd.f32 %v4599_v57, %v5979_v58  ;;  %v2216_v37 = vpop.f32.mrb[11].mxu0 }
 0x2da   : > { %v2217_v20 = vadd.f32 %v5979_v58, %v2216_v37 }
 0x2db   : > { %v2521_v7 = vld [vmem:[#allocation4 + $0x81] sm:$0xff]  ;;  %v2336_v17 = vmax.f32 %v2222_v13, 0.0 }
 0x2dc   : > { %2596 = vrot.lane.b32.xlu1 %v2521_v7, %s4719_s28  ;;  %v2520_v24 = vld [vmem:[#allocation4 + $0x79] sm:$0xff]  ;;  %v2335_v21 = vmax.f32 %v2217_v20, 0.0  ;;  %v6062_v48 = vld [vmem:[#allocation4 + $0x82] sm:$0xff] }
 0x2dd   : > { %v2457_v8 = vld [vmem:[#allocation4 + $0x80] sm:$0xff]  ;;  %v2456_v47 = vld [vmem:[#allocation4 + $0x78] sm:$0xff]  ;;  %2594 = vrot.lane.b32.xlu0 %v2520_v24, %s4719_s28  ;;  %2425 = vst.msk [vmem:[#allocation4 + $0x99] sm:$0xff] %vm2357_vm12, %v2336_v17  ;;  %7190 = vst [vmem:[#allocation9_spill] sm:$0xff] %v6062_v48 }
 0x2de   : > { %2489 = vst.msk [vmem:[#allocation5 + $0xb0] sm:$0xff] %vm2357_vm12, %v2457_v8  ;;  %2488 = vst.msk [vmem:[#allocation5 + $0xa0] sm:$0xff] %vm2357_vm12, %v2456_v47  ;;  %v6060_v59 = vld [vmem:[#allocation4 + $0x7a] sm:$0xff] }
 0x2df   : > { %7189 = vst [vmem:[#allocation8_spill] sm:$0xff] %v6060_v59  ;;  %2424 = vst.msk [vmem:[#allocation4 + $0x91] sm:$0xff] %vm2357_vm12, %v2335_v21 }
 0x2e0   : > { %3900 = vst.msk [vmem:[#allocation5 + $0x68] sm:$0xff] %vm2357_vm12, %v6060_v59  ;;  %3901 = vst.msk [vmem:[#allocation5 + $0x78] sm:$0xff] %vm2357_vm12, %v6062_v48 }
 0x2e4   : > { %v6069_v28 = vld [vmem:[#allocation4 + $0x99] sm:$0xff] }
 0x2e5   : > { %2600 = vrot.lane.b32.xlu1 %v6069_v28, %s4719_s28  ;;  %v3871_v30 = vld [vmem:[#allocation4 + $0x9a] sm:$0xff] }
 0x2e6   : > { %v2522_v25 = vld [vmem:[#allocation4 + $0x91] sm:$0xff]  ;;  %3903 = vst.msk [vmem:[#allocation5 + $0x98] sm:$0xff] %vm2357_vm12, %v3871_v30 }
 0x2e7   : > { %v6073_v34 = vld [vmem:[#allocation4 + $0x98] sm:$0xff]  ;;  %v2458_v60 = vld [vmem:[#allocation4 + $0x90] sm:$0xff]  ;;  %2598 = vrot.lane.b32.xlu0 %v2522_v25, %s4719_s28 }
 0x2e8   : > { %2491 = vst.msk [vmem:[#allocation5 + $0xd0] sm:$0xff] %vm2357_vm12, %v6073_v34  ;;  %2490 = vst.msk [vmem:[#allocation5 + $0xc0] sm:$0xff] %vm2357_vm12, %v2458_v60  ;;  %v6079_v26 = vld [vmem:[#allocation4 + $0x92] sm:$0xff]  ;;  %v4602_v27 = vpop.f32.mrb[12].mxu0 }
 0x2e9   : > { %7191 = vst [vmem:[#allocation10_spill] sm:$0xff] %v6079_v26  ;;  %3902 = vst.msk [vmem:[#allocation5 + $0x88] sm:$0xff] %vm2357_vm12, %v6079_v26  ;;  %v2232_v31 = vadd.f32 %v4602_v27, %v5979_v58  ;;  %v2226_v61 = vpop.f32.mrb[13].mxu0 }
 0x2ea   : > { %v2227_v40 = vadd.f32 %v5979_v58, %v2226_v61 }
 0x2eb   : > { %v2338_v41 = vmax.f32 %v2232_v31, 0.0 }
 0x2ec   : > { %v2337_v62 = vmax.f32 %v2227_v40, 0.0 }
 0x2ed   : > { %2427 = vst.msk [vmem:[#allocation4 + $0xb1] sm:$0xff] %vm2357_vm12, %v2338_v41 }
 0x2ee   : > { %2426 = vst.msk [vmem:[#allocation4 + $0xa9] sm:$0xff] %vm2357_vm12, %v2337_v62 }
 0x2f4   : > { %v6088_v42 = vld [vmem:[#allocation4 + $0xb1] sm:$0xff] }
 0x2f5   : > { %v6090_v43 = vld [vmem:[#allocation4 + $0xb2] sm:$0xff]  ;;  %2604 = vrot.lane.b32.xlu1 %v6088_v42, %s4719_s28  ;;  %v6094_v44 = vld [vmem:[#allocation4 + $0xa9] sm:$0xff] }
 0x2f6   : > { %3905 = vst.msk [vmem:[#allocation5 + $0xb8] sm:$0xff] %vm2357_vm12, %v6090_v43  ;;  %v6098_v46 = vld [vmem:[#allocation4 + $0xb0] sm:$0xff]  ;;  %v6100_v1 = vld [vmem:[#allocation4 + $0xa8] sm:$0xff]  ;;  %2602 = vrot.lane.b32.xlu0 %v6094_v44, %s4719_s28 }
 0x2f7   : > { %2493 = vst.msk [vmem:[#allocation5 + $0xf0] sm:$0xff] %vm2357_vm12, %v6098_v46  ;;  %2492 = vst.msk [vmem:[#allocation5 + $0xe0] sm:$0xff] %vm2357_vm12, %v6100_v1  ;;  %v3872_v56 = vld [vmem:[#allocation4 + $0xaa] sm:$0xff] }
 0x2f8   : > { %3904 = vst.msk [vmem:[#allocation5 + $0xa8] sm:$0xff] %vm2357_vm12, %v3872_v56 }
 0x2fb   : > { %v4605_v2 = vpop.f32.mrb[14].mxu0 }
 0x2fc   : > { %v2242_v11 = vadd.f32 %v4605_v2, %v5979_v58  ;;  %v2236_v14 = vpop.f32.mrb[15].mxu0 }
 0x2fd   : > { %v2237_v15 = vadd.f32 %v5979_v58, %v2236_v14  ;;  %v3949_v18 = vld [vmem:[#allocation5 + $0xb8] sm:$0xff] }
 0x2fe   : > { %v2340_v50 = vmax.f32 %v2242_v11, 0.0  ;;  %4510 = vmatprep.mubr.msk.f32.mxu1 %vm2357_vm12, %v3949_v18 }
 0x2ff   : > { %v2339_v19 = vmax.f32 %v2237_v15, 0.0 }
 0x300   : > { %2429 = vst.msk [vmem:[#allocation4 + $0xc9] sm:$0xff] %vm2357_vm12, %v2340_v50 }
 0x301   : > { %2428 = vst.msk [vmem:[#allocation4 + $0xc1] sm:$0xff] %vm2357_vm12, %v2339_v19 }
 0x307   : > { %v6114_v3 = vld [vmem:[#allocation4 + $0xc9] sm:$0xff] }
 0x308   : > { %v6116_v49 = vld [vmem:[#allocation4 + $0xca] sm:$0xff]  ;;  %2608 = vrot.lane.b32.xlu1 %v6114_v3, %s4719_s28  ;;  %v6120_v22 = vld [vmem:[#allocation4 + $0xc1] sm:$0xff] }
 0x309   : > { %v6122_v0 = vld [vmem:[#allocation4 + $0xc8] sm:$0xff]  ;;  %v6124_v52 = vld [vmem:[#allocation4 + $0xc0] sm:$0xff]  ;;  %3907 = vst.msk [vmem:[#allocation5 + $0xd8] sm:$0xff] %vm2357_vm12, %v6116_v49  ;;  %2606 = vrot.lane.b32.xlu0 %v6120_v22, %s4719_s28 }
 0x30a   : > { %2495 = vst.msk [vmem:[#allocation5 + $0x110] sm:$0xff] %vm2357_vm12, %v6122_v0  ;;  %2494 = vst.msk [vmem:[#allocation5 + $0x100] sm:$0xff] %vm2357_vm12, %v6124_v52  ;;  %v6134_v4 = vld [vmem:[#allocation4 + $0xc2] sm:$0xff] }
 0x30b   : > { %3906 = vst.msk [vmem:[#allocation5 + $0xc8] sm:$0xff] %vm2357_vm12, %v6134_v4  ;;  %v4608_v36 = vpop.f32.mrb[16].mxu0 }
 0x30c   : > { %v2252_v29 = vadd.f32 %v4608_v36, %v5979_v58  ;;  %v2246_v38 = vpop.f32.mrb[17].mxu0 }
 0x30d   : > { %v2247_v45 = vadd.f32 %v5979_v58, %v2246_v38 }
 0x30e   : > { %v2342_v5 = vmax.f32 %v2252_v29, 0.0 }
 0x30f   : > { %v2341_v33 = vmax.f32 %v2247_v45, 0.0 }
 0x310   : > { %2431 = vst.msk [vmem:[#allocation4 + $0xe1] sm:$0xff] %vm2357_vm12, %v2342_v5 }
 0x311   : > { %2430 = vst.msk [vmem:[#allocation4 + $0xd9] sm:$0xff] %vm2357_vm12, %v2341_v33 }
 0x317   : > { %v6142_v9 = vld [vmem:[#allocation4 + $0xe1] sm:$0xff] }
 0x318   : > { %v6144_v35 = vld [vmem:[#allocation4 + $0xe2] sm:$0xff]  ;;  %2612 = vrot.lane.b32.xlu1 %v6142_v9, %s4719_s28  ;;  %v6148_v55 = vld [vmem:[#allocation4 + $0xd9] sm:$0xff] }
 0x319   : > { %v6150_v6 = vld [vmem:[#allocation4 + $0xe0] sm:$0xff]  ;;  %v6152_v12 = vld [vmem:[#allocation4 + $0xd8] sm:$0xff]  ;;  %3909 = vst.msk [vmem:[#allocation5 + $0xf8] sm:$0xff] %vm2357_vm12, %v6144_v35  ;;  %2610 = vrot.lane.b32.xlu0 %v6148_v55, %s4719_s28 }
 0x31a   : > { %2497 = vst.msk [vmem:[#allocation5 + $0x130] sm:$0xff] %vm2357_vm12, %v6150_v6  ;;  %2496 = vst.msk [vmem:[#allocation5 + $0x120] sm:$0xff] %vm2357_vm12, %v6152_v12  ;;  %v6162_v16 = vld [vmem:[#allocation4 + $0xda] sm:$0xff] }
 0x31b   : > { %3908 = vst.msk [vmem:[#allocation5 + $0xe8] sm:$0xff] %vm2357_vm12, %v6162_v16  ;;  %v4611_v57 = vpop.f32.mrb[18].mxu0 }
 0x31c   : > { %v2262_v13 = vadd.f32 %v4611_v57, %v5979_v58  ;;  %v2256_v37 = vpop.f32.mrb[19].mxu0 }
 0x31d   : > { %v2257_v7 = vadd.f32 %v5979_v58, %v2256_v37 }
 0x31e   : > { %v2344_v20 = vmax.f32 %v2262_v13, 0.0  ;;  %v2581_v17 = vpop.permute.xlu1 %2580 }
 0x31f   : > { %v2343_v24 = vmax.f32 %v2257_v7, 0.0  ;;  %2674 = vst.msk [vmem:[#allocation5 + $0x30] sm:$0xff] %vm2670_vm14, %v2581_v17 }
 0x320   : > { %v2579_v8 = vpop.permute.xlu0 %2578  ;;  %2433 = vst.msk [vmem:[#allocation4 + $0xf9] sm:$0xff] %vm2357_vm12, %v2344_v20 }
 0x321   : > { %2673 = vst.msk [vmem:[#allocation5 + $0x20] sm:$0xff] %vm2670_vm14, %v2579_v8 }
 0x322   : > { %2432 = vst.msk [vmem:[#allocation4 + $0xf1] sm:$0xff] %vm2357_vm12, %v2343_v24 }
 0x327   : > { %v6172_v47 = vld [vmem:[#allocation4 + $0xf9] sm:$0xff] }
 0x328   : > { %v6174_v21 = vld [vmem:[#allocation4 + $0xfa] sm:$0xff]  ;;  %2616 = vrot.lane.b32.xlu1 %v6172_v47, %s4719_s28 }
 0x329   : > { %v6178_v25 = vld [vmem:[#allocation4 + $0xf1] sm:$0xff]  ;;  %3911 = vst.msk [vmem:[#allocation5 + $0x118] sm:$0xff] %vm2357_vm12, %v6174_v21 }
 0x32a   : > { %v6180_v60 = vld [vmem:[#allocation4 + $0xf8] sm:$0xff]  ;;  %v6182_v27 = vld [vmem:[#allocation4 + $0xf0] sm:$0xff]  ;;  %2614 = vrot.lane.b32.xlu0 %v6178_v25, %s4719_s28  ;;  %v2585_v31 = vpop.permute.xlu1 %2584 }
 0x32b   : > { %2499 = vst.msk [vmem:[#allocation5 + $0x150] sm:$0xff] %vm2357_vm12, %v6180_v60  ;;  %2498 = vst.msk [vmem:[#allocation5 + $0x140] sm:$0xff] %vm2357_vm12, %v6182_v27  ;;  %v6192_v30 = vld [vmem:[#allocation4 + $0xf2] sm:$0xff]  ;;  %v4614_v61 = vpop.f32.mrb[20].mxu0  ;;  %v2583_v40 = vpop.permute.xlu0 %2582 }
 0x32c   : > { %3910 = vst.msk [vmem:[#allocation5 + $0x108] sm:$0xff] %vm2357_vm12, %v6192_v30  ;;  %v2272_v41 = vadd.f32 %v4614_v61, %v5979_v58  ;;  %v2266_v62 = vpop.f32.mrb[21].mxu0 }
 0x32d   : > { %2676 = vst.msk [vmem:[#allocation5 + $0x50] sm:$0xff] %vm2670_vm14, %v2585_v31  ;;  %2675 = vst.msk [vmem:[#allocation5 + $0x40] sm:$0xff] %vm2670_vm14, %v2583_v40  ;;  %v2267_v56 = vadd.f32 %v5979_v58, %v2266_v62 }
 0x32e   : > { %v2346_v2 = vmax.f32 %v2272_v41, 0.0 }
 0x32f   : > { %v2345_v11 = vmax.f32 %v2267_v56, 0.0 }
 0x330   : > { %2435 = vst.msk [vmem:[#allocation4 + $0x111] sm:$0xff] %vm2357_vm12, %v2346_v2 }
 0x331   : > { %2434 = vst.msk [vmem:[#allocation4 + $0x109] sm:$0xff] %vm2357_vm12, %v2345_v11 }
 0x336   : > { %v2589_v14 = vpop.permute.xlu1 %2588 }
 0x337   : > { %2678 = vst.msk [vmem:[#allocation5 + $0x70] sm:$0xff] %vm2670_vm14, %v2589_v14  ;;  %v2587_v15 = vpop.permute.xlu0 %2586  ;;  %v6203_v18 = vld [vmem:[#allocation4 + $0x111] sm:$0xff] }
 0x338   : > { %v6205_v50 = vld [vmem:[#allocation4 + $0x112] sm:$0xff]  ;;  %2677 = vst.msk [vmem:[#allocation5 + $0x60] sm:$0xff] %vm2670_vm14, %v2587_v15  ;;  %2620 = vrot.lane.b32.xlu1 %v6203_v18, %s4719_s28  ;;  %v6210_v19 = vld [vmem:[#allocation4 + $0x109] sm:$0xff] }
 0x339   : > { %v6212_v36 = vld [vmem:[#allocation4 + $0x110] sm:$0xff]  ;;  %v6214_v29 = vld [vmem:[#allocation4 + $0x108] sm:$0xff]  ;;  %3913 = vst.msk [vmem:[#allocation5 + $0x138] sm:$0xff] %vm2357_vm12, %v6205_v50  ;;  %2618 = vrot.lane.b32.xlu0 %v6210_v19, %s4719_s28 }
 0x33a   : > { %2501 = vst.msk [vmem:[#allocation5 + $0x170] sm:$0xff] %vm2357_vm12, %v6212_v36  ;;  %2500 = vst.msk [vmem:[#allocation5 + $0x160] sm:$0xff] %vm2357_vm12, %v6214_v29  ;;  %v6224_v38 = vld [vmem:[#allocation4 + $0x10a] sm:$0xff] }
 0x33b   : > { %3912 = vst.msk [vmem:[#allocation5 + $0x128] sm:$0xff] %vm2357_vm12, %v6224_v38  ;;  %v4617_v45 = vpop.f32.mrb[22].mxu0 }
 0x33c   : > { %v2282_v5 = vadd.f32 %v4617_v45, %v5979_v58  ;;  %v2276_v33 = vpop.f32.mrb[23].mxu0 }
 0x33d   : > { %v2277_v57 = vadd.f32 %v5979_v58, %v2276_v33 }
 0x33e   : > { %v2348_v13 = vmax.f32 %v2282_v5, 0.0 }
 0x33f   : > { %v2347_v37 = vmax.f32 %v2277_v57, 0.0 }
 0x340   : > { %2437 = vst.msk [vmem:[#allocation4 + $0x129] sm:$0xff] %vm2357_vm12, %v2348_v13 }
 0x341   : > { %2436 = vst.msk [vmem:[#allocation4 + $0x121] sm:$0xff] %vm2357_vm12, %v2347_v37 }
 0x342   : > { %v2593_v7 = vpop.permute.xlu1 %2592 }
 0x343   : > { %2680 = vst.msk [vmem:[#allocation5 + $0x90] sm:$0xff] %vm2670_vm14, %v2593_v7  ;;  %v2591_v20 = vpop.permute.xlu0 %2590 }
 0x344   : > { %2679 = vst.msk [vmem:[#allocation5 + $0x80] sm:$0xff] %vm2670_vm14, %v2591_v20 }
 0x347   : > { %v6234_v17 = vld [vmem:[#allocation4 + $0x129] sm:$0xff] }
 0x348   : > { %v6236_v24 = vld [vmem:[#allocation4 + $0x12a] sm:$0xff]  ;;  %2624 = vrot.lane.b32.xlu1 %v6234_v17, %s4719_s28  ;;  %v6240_v8 = vld [vmem:[#allocation4 + $0x121] sm:$0xff] }
 0x349   : > { %v6242_v31 = vld [vmem:[#allocation4 + $0x128] sm:$0xff]  ;;  %v6244_v61 = vld [vmem:[#allocation4 + $0x120] sm:$0xff]  ;;  %3915 = vst.msk [vmem:[#allocation5 + $0x158] sm:$0xff] %vm2357_vm12, %v6236_v24  ;;  %2622 = vrot.lane.b32.xlu0 %v6240_v8, %s4719_s28 }
 0x34a   : > { %2503 = vst.msk [vmem:[#allocation5 + $0x190] sm:$0xff] %vm2357_vm12, %v6242_v31  ;;  %2502 = vst.msk [vmem:[#allocation5 + $0x180] sm:$0xff] %vm2357_vm12, %v6244_v61  ;;  %v6254_v40 = vld [vmem:[#allocation4 + $0x122] sm:$0xff] }
 0x34b   : > { %3914 = vst.msk [vmem:[#allocation5 + $0x148] sm:$0xff] %vm2357_vm12, %v6254_v40  ;;  %v4620_v41 = vpop.f32.mrb[24].mxu0 }
 0x34c   : > { %v2292_v62 = vadd.f32 %v4620_v41, %v5979_v58  ;;  %v2286_v56 = vpop.f32.mrb[25].mxu0 }
 0x34d   : > { %v2287_v2 = vadd.f32 %v5979_v58, %v2286_v56 }
 0x34e   : > { %v2350_v11 = vmax.f32 %v2292_v62, 0.0  ;;  %v2597_v14 = vpop.permute.xlu1 %2596 }
 0x34f   : > { %v2349_v15 = vmax.f32 %v2287_v2, 0.0  ;;  %2682 = vst.msk [vmem:[#allocation5 + $0xb0] sm:$0xff] %vm2670_vm14, %v2597_v14  ;;  %v2595_v45 = vpop.permute.xlu0 %2594 }
 0x350   : > { %2439 = vst.msk [vmem:[#allocation4 + $0x141] sm:$0xff] %vm2357_vm12, %v2350_v11 }
 0x351   : > { %2681 = vst.msk [vmem:[#allocation5 + $0xa0] sm:$0xff] %vm2670_vm14, %v2595_v45 }
 0x352   : > { %2438 = vst.msk [vmem:[#allocation4 + $0x139] sm:$0xff] %vm2357_vm12, %v2349_v15 }
 0x357   : > { %v6264_v5 = vld [vmem:[#allocation4 + $0x141] sm:$0xff]  ;;  %v2601_v13 = vpop.permute.xlu1 %2600 }
 0x358   : > { %v6266_v33 = vld [vmem:[#allocation4 + $0x142] sm:$0xff]  ;;  %2628 = vrot.lane.b32.xlu1 %v6264_v5, %s4719_s28  ;;  %2684 = vst.msk [vmem:[#allocation5 + $0xd0] sm:$0xff] %vm2670_vm14, %v2601_v13 }
 0x359   : > { %v6270_v57 = vld [vmem:[#allocation4 + $0x139] sm:$0xff]  ;;  %3917 = vst.msk [vmem:[#allocation5 + $0x178] sm:$0xff] %vm2357_vm12, %v6266_v33  ;;  %v2599_v20 = vpop.permute.xlu0 %2598 }
 0x35a   : > { %v6272_v37 = vld [vmem:[#allocation4 + $0x140] sm:$0xff]  ;;  %v6274_v7 = vld [vmem:[#allocation4 + $0x138] sm:$0xff]  ;;  %2626 = vrot.lane.b32.xlu0 %v6270_v57, %s4719_s28  ;;  %2683 = vst.msk [vmem:[#allocation5 + $0xc0] sm:$0xff] %vm2670_vm14, %v2599_v20 }
 0x35b   : > { %2505 = vst.msk [vmem:[#allocation5 + $0x1b0] sm:$0xff] %vm2357_vm12, %v6272_v37  ;;  %2504 = vst.msk [vmem:[#allocation5 + $0x1a0] sm:$0xff] %vm2357_vm12, %v6274_v7  ;;  %v6285_v41 = vld [vmem:[#allocation4 + $0x13a] sm:$0xff]  ;;  %v4623_v62 = vpop.f32.mrb[26].mxu0 }
 0x35c   : > { %3916 = vst.msk [vmem:[#allocation5 + $0x168] sm:$0xff] %vm2357_vm12, %v6285_v41  ;;  %v2302_v56 = vadd.f32 %v4623_v62, %v5979_v58  ;;  %v2296_v2 = vpop.f32.mrb[27].mxu0 }
 0x35d   : > { %v2297_v11 = vadd.f32 %v5979_v58, %v2296_v2 }
 0x35e   : > { %v2352_v14 = vmax.f32 %v2302_v56, 0.0 }
 0x35f   : > { %v2351_v15 = vmax.f32 %v2297_v11, 0.0 }
 0x360   : > { %2441 = vst.msk [vmem:[#allocation4 + $0x159] sm:$0xff] %vm2357_vm12, %v2352_v14 }
 0x361   : > { %2440 = vst.msk [vmem:[#allocation4 + $0x151] sm:$0xff] %vm2357_vm12, %v2351_v15 }
 0x367   : > { %v2539_v45 = vld [vmem:[#allocation4 + $0x159] sm:$0xff]  ;;  %v2605_v26 = vpop.permute.xlu1 %2604 }
 0x368   : > { %v6294_v13 = vld [vmem:[#allocation4 + $0x15a] sm:$0xff]  ;;  %2632 = vrot.lane.b32.xlu1 %v2539_v45, %s4719_s28  ;;  %v2538_v20 = vld [vmem:[#allocation4 + $0x151] sm:$0xff]  ;;  %2686 = vst.msk [vmem:[#allocation5 + $0xf0] sm:$0xff] %vm2670_vm14, %v2605_v26  ;;  %v2603_v62 = vpop.permute.xlu0 %2602 }
 0x369   : > { %7192 = vst [vmem:[#allocation11_spill] sm:$0xff] %v6294_v13  ;;  %v6297_v48 = vld [vmem:[#allocation4 + $0x158] sm:$0xff]  ;;  %v6299_v59 = vld [vmem:[#allocation4 + $0x150] sm:$0xff]  ;;  %3919 = vst.msk [vmem:[#allocation5 + $0x198] sm:$0xff] %vm2357_vm12, %v6294_v13  ;;  %2630 = vrot.lane.b32.xlu0 %v2538_v20, %s4719_s28 }
 0x36a   : > { %2507 = vst.msk [vmem:[#allocation5 + $0x1d0] sm:$0xff] %vm2357_vm12, %v6297_v48  ;;  %2506 = vst.msk [vmem:[#allocation5 + $0x1c0] sm:$0xff] %vm2357_vm12, %v6299_v59  ;;  %v6309_v56 = vld [vmem:[#allocation4 + $0x152] sm:$0xff]  ;;  %v2714_v13 = vld [vmem:[#allocation4 + $0x82] sm:$0xff] }
 0x36b   : > { %2685 = vst.msk [vmem:[#allocation5 + $0xe0] sm:$0xff] %vm2670_vm14, %v2603_v62  ;;  %v4626_v2 = vpop.f32.mrb[28].mxu0  ;;  %v3990_v20 = vld [vmem:[%s7106_s3] sm:$0xff]  ;;  %v3991_v62 = vld [vmem:[%s7106_s3 + $0x8] sm:$0xff] }
 0x36c   : > { %3918 = vst.msk [vmem:[#allocation5 + $0x188] sm:$0xff] %vm2357_vm12, %v6309_v56  ;;  %v2312_v11 = vadd.f32 %v4626_v2, %v5979_v58  ;;  %v2306_v14 = vpop.f32.mrb[29].mxu0  ;;  %v4639_v54 = vpack.c.bf16 %v3991_v62, %v3990_v20  ;;  %v3992_v2 = vld [vmem:[%s7106_s3 + $0x10] sm:$0xff] }
 0x36d   : > { %v2307_v26 = vadd.f32 %v5979_v58, %v2306_v14  ;;  %v2703_v62 = vld [vmem:[#allocation4 + $0x2] sm:$0xff] }
 0x36e   : > { %v2354_v15 = vmax.f32 %v2312_v11, 0.0  ;;  %4674 = vmatpush1.bf16.msra.mxu1 %v4639_v54  ;;  %4640 = vmatpush1.bf16.msra.mxu0 %v4639_v54  ;;  %v3993_v11 = vld [vmem:[%s7106_s3 + $0x18] sm:$0xff] }
 0x36f   : > { %v2353_v45 = vmax.f32 %v2307_v26, 0.0  ;;  %4666 = vmatprep.subr.bf16.mxu1 %v7141_v10  ;;  %4641 = vmatprep.subr.bf16.mxu0 %v7141_v10  ;;  %v4642_v54 = vpack.c.bf16 %v3993_v11, %v3992_v2  ;;  %v7197_v11 = vmov 0.0|0.0  }
 0x370   : > { %2443 = vst.msk [vmem:[#allocation4 + $0x171] sm:$0xff] %vm2357_vm12, %v2354_v15 }
 0x371   : > { %2442 = vst.msk [vmem:[#allocation4 + $0x169] sm:$0xff] %vm2357_vm12, %v2353_v45  ;;  %v2704_v45 = vld [vmem:[#allocation4 + $0xa] sm:$0xff] }
 0x372   : > { %4675 = vmatpush1.bf16.msra.mxu1 %v4642_v54  ;;  %4643 = vmatpush1.bf16.msra.mxu0 %v4642_v54 }
 0x373   : > { %4667 = vmatprep.subr.bf16.mxu1 %v7197_v11  ;;  %4644 = vmatprep.subr.bf16.mxu0 %v7197_v11 }
 0x377   : > { %v2541_v58 = vld [vmem:[#allocation4 + $0x171] sm:$0xff] }
 0x378   : > { %2636 = vrot.lane.b32.xlu1 %v2541_v58, %s4719_s28  ;;  %v2540_v14 = vld [vmem:[#allocation4 + $0x169] sm:$0xff]  ;;  %v6346_v10 = vld [vmem:[#allocation4 + $0x172] sm:$0xff] }
 0x379   : > { %v6335_v26 = vld [vmem:[#allocation4 + $0x170] sm:$0xff]  ;;  %v6337_v15 = vld [vmem:[#allocation4 + $0x168] sm:$0xff]  ;;  %2634 = vrot.lane.b32.xlu0 %v2540_v14, %s4719_s28  ;;  %7196 = vst [vmem:[#allocation15_spill] sm:$0xff] %v6346_v10  ;;  %3921 = vst.msk [vmem:[#allocation5 + $0x1b8] sm:$0xff] %vm2357_vm12, %v6346_v10 }
 0x37a   : > { %7193 = vst [vmem:[#allocation12_spill] sm:$0xff] %v6335_v26  ;;  %7194 = vst [vmem:[#allocation13_spill] sm:$0xff] %v6337_v15  ;;  %v2609_v20 = vpop.permute.xlu1 %2608  ;;  %v6344_v58 = vld [vmem:[#allocation4 + $0x16a] sm:$0xff] }
 0x37b   : > { %2509 = vst.msk [vmem:[#allocation5 + $0x1f0] sm:$0xff] %vm2357_vm12, %v6335_v26  ;;  %2508 = vst.msk [vmem:[#allocation5 + $0x1e0] sm:$0xff] %vm2357_vm12, %v6337_v15  ;;  %v2607_v2 = vpop.permute.xlu0 %2606  ;;  %v3994_v14 = vld [vmem:[%s7106_s3 + $0x20] sm:$0xff]  ;;  %v3995_v26 = vld [vmem:[%s7106_s3 + $0x28] sm:$0xff] }
 0x37c   : > { %7195 = vst [vmem:[#allocation14_spill] sm:$0xff] %v6344_v58  ;;  %2688 = vst.msk [vmem:[#allocation5 + $0x110] sm:$0xff] %vm2670_vm14, %v2609_v20  ;;  %2769 = vrot.lane.b32.xlu1 %v2704_v45, %s4723_s17  ;;  %v4645_v54 = vpack.c.bf16 %v3995_v26, %v3994_v14  ;;  %v6364_v20 = vld [vmem:[#allocation4 + $0x22] sm:$0xff]  ;;  %v6376_v26 = vld [vmem:[#allocation4 + $0x1a] sm:$0xff] }
 0x37d   : > { %3920 = vst.msk [vmem:[#allocation5 + $0x1a8] sm:$0xff] %vm2357_vm12, %v6344_v58  ;;  %2767 = vrot.lane.b32.xlu0 %v2703_v62, %s4723_s17  ;;  %v3996_v58 = vld [vmem:[%s7106_s3 + $0x30] sm:$0xff]  ;;  %v3997_v10 = vld [vmem:[%s7106_s3 + $0x38] sm:$0xff]  ;;  %v3999_v14 = vld [vmem:[%s7106_s3 + $0x48] sm:$0xff] }
 0x37e   : > { %2687 = vst.msk [vmem:[#allocation5 + $0x100] sm:$0xff] %vm2670_vm14, %v2607_v2  ;;  %4676 = vmatpush1.bf16.msra.mxu1 %v4645_v54  ;;  %4646 = vmatpush1.bf16.msra.mxu0 %v4645_v54  ;;  %v4648_v45 = vpack.c.bf16 %v3997_v10, %v3996_v58  ;;  %v6380_v62 = vld [vmem:[#allocation4 + $0x3a] sm:$0xff]  ;;  %v3998_v2 = vld [vmem:[%s7106_s3 + $0x40] sm:$0xff] }
 0x37f   : > { %4668 = vmatprep.subr.bf16.mxu1 %v7197_v11  ;;  %4647 = vmatprep.subr.bf16.mxu0 %v7197_v11  ;;  %v4651_v10 = vpack.c.bf16 %v3999_v14, %v3998_v2  ;;  %v2710_v58 = vld [vmem:[#allocation4 + $0x52] sm:$0xff]  ;;  %v4000_v54 = vld [vmem:[%s7106_s3 + $0x50] sm:$0xff]  ;;  %v6403_v2 = vld [vmem:[#allocation4 + $0x4a] sm:$0xff] }
 0x380   : > { %2773 = vrot.lane.b32.xlu1 %v6364_v20, %s4723_s17  ;;  %v4002_v15 = vld [vmem:[%s7106_s3 + $0x60] sm:$0xff] }
 0x381   : > { %2771 = vrot.lane.b32.xlu0 %v6376_v26, %s4723_s17 }
 0x382   : > { %4677 = vmatpush1.bf16.msra.mxu1 %v4648_v45  ;;  %4649 = vmatpush1.bf16.msra.mxu0 %v4648_v45  ;;  %v4001_v45 = vld [vmem:[%s7106_s3 + $0x58] sm:$0xff] }
 0x383   : > { %4669 = vmatprep.subr.bf16.mxu1 %v7197_v11  ;;  %4650 = vmatprep.subr.bf16.mxu0 %v7197_v11 }
 0x384   : > { %2777 = vrot.lane.b32.xlu1 %v6380_v62, %s4723_s17 }
 0x385   : > { %2775 = vrot.lane.b32.xlu0 %v6006_v51, %s4723_s17  ;;  %v4654_v51 = vpack.c.bf16 %v4001_v45, %v4000_v54  ;;  %v2711_v54 = vld [vmem:[#allocation4 + $0x62] sm:$0xff] }
 0x386   : > { %4678 = vmatpush1.bf16.msra.mxu1 %v4651_v10  ;;  %4652 = vmatpush1.bf16.msra.mxu0 %v4651_v10 }
 0x387   : > { %4670 = vmatprep.subr.bf16.mxu1 %v7197_v11  ;;  %4653 = vmatprep.subr.bf16.mxu0 %v7197_v11 }
 0x388   : > { %2781 = vrot.lane.b32.xlu1 %v2710_v58, %s4723_s17  ;;  %v4003_v58 = vld [vmem:[%s7106_s3 + $0x68] sm:$0xff] }
 0x389   : > { %2779 = vrot.lane.b32.xlu0 %v6403_v2, %s4723_s17  ;;  %v4657_v45 = vpack.c.bf16 %v4003_v58, %v4002_v15  ;;  %v2715_v15 = vld [vmem:[#allocation4 + $0x92] sm:$0xff] }
 0x38a   : > { %v2613_v14 = vpop.permute.xlu1 %2612  ;;  %4679 = vmatpush1.bf16.msra.mxu1 %v4654_v51  ;;  %4655 = vmatpush1.bf16.msra.mxu0 %v4654_v51  ;;  %v4004_v51 = vld [vmem:[%s7106_s3 + $0x70] sm:$0xff]  ;;  %v4007_v58 = vld [vmem:[%s7106_s3 + $0x88] sm:$0xff] }
 0x38b   : > { %2690 = vst.msk [vmem:[#allocation5 + $0x130] sm:$0xff] %vm2670_vm14, %v2613_v14  ;;  %v2611_v10 = vpop.permute.xlu0 %2610  ;;  %4671 = vmatprep.subr.bf16.mxu1 %v7197_v11  ;;  %4656 = vmatprep.subr.bf16.mxu0 %v7197_v11  ;;  %v4005_v14 = vld [vmem:[%s7106_s3 + $0x78] sm:$0xff] }
 0x38c   : > { %2689 = vst.msk [vmem:[#allocation5 + $0x120] sm:$0xff] %vm2670_vm14, %v2611_v10  ;;  %2789 = vrot.lane.b32.xlu1 %v2714_v13, %s4723_s17  ;;  %v4660_v13 = vpack.c.bf16 %v4005_v14, %v4004_v51  ;;  %v4006_v10 = vld [vmem:[%s7106_s3 + $0x80] sm:$0xff] }
 0x38d   : > { %2783 = vrot.lane.b32.xlu0 %v2711_v54, %s4723_s17  ;;  %v4663_v54 = vpack.c.bf16 %v4007_v58, %v4006_v10 }
 0x38e   : > { %4680 = vmatpush1.bf16.msra.mxu1 %v4657_v45  ;;  %4658 = vmatpush1.bf16.msra.mxu0 %v4657_v45 }
 0x38f   : > { %4672 = vmatprep.subr.bf16.mxu1 %v7197_v11  ;;  %4659 = vmatprep.subr.bf16.mxu0 %v7197_v11 }
 0x390   : > { %3175 = vrot.lane.b32.xlu1 %v6069_v28, %s4725_s9  ;;  %v3293_v28 = vld [vmem:[#allocation4 + $0x9a] sm:$0xff] }
 0x391   : > { %2982 = vrot.lane.b32.xlu0 %v6073_v34, %s4726_s10 }
 0x392   : > { %4681 = vmatpush1.bf16.msra.mxu1 %v4660_v13  ;;  %4661 = vmatpush1.bf16.msra.mxu0 %v4660_v13 }
 0x393   : > { %4673 = vmatprep.subr.bf16.mxu1 %v7197_v11  ;;  %4662 = vmatprep.subr.bf16.mxu0 %v7197_v11 }
 0x394   : > { %2791 = vrot.lane.b32.xlu1 %v2715_v15, %s4723_s17 }
 0x395   : > { %3368 = vrot.lane.b32.xlu0 %v3293_v28, %s4727_s15 }
 0x396   : > { %4682 = vmatpush1.bf16.msra.mxu1 %v4663_v54  ;;  %4664 = vmatpush1.bf16.msra.mxu0 %v4663_v54  ;;  %v3089_v54 = vld [vmem:[#allocation4 + $0x19] sm:$0xff] }
 0x398   : > { %2984 = vrot.lane.b32.xlu1 %v6100_v1, %s4726_s10  ;;  %v3294_v1 = vld [vmem:[#allocation4 + $0xaa] sm:$0xff] }
 0x399   : > { %3562 = vrot.lane.b32.xlu0 %v6098_v46, %s4728_s16 }
 0x39a   : > { %v2617_v34 = vpop.permute.xlu1 %2616 }
 0x39b   : > { %2692 = vst.msk [vmem:[#allocation5 + $0x150] sm:$0xff] %vm2670_vm14, %v2617_v34 }
 0x39c   : > { %v2615_v11 = vpop.permute.xlu0 %2614  ;;  %3177 = vrot.lane.b32.xlu1 %v6094_v44, %s4725_s9 }
 0x39d   : > { %2691 = vst.msk [vmem:[#allocation5 + $0x140] sm:$0xff] %vm2670_vm14, %v2615_v11  ;;  %3755 = vrot.lane.b32.xlu0 %v6088_v42, %s4729_s20 }
 0x3a0   : > { %2793 = vrot.lane.b32.xlu1 %v3293_v28, %s4723_s17 }
 0x3a1   : > { %3370 = vrot.lane.b32.xlu0 %v3294_v1, %s4727_s15 }
 0x3a4   : > { %2986 = vrot.lane.b32.xlu1 %v6098_v46, %s4726_s10 }
 0x3a5   : > { %3564 = vrot.lane.b32.xlu0 %v6124_v52, %s4728_s16 }
 0x3a8   : > { %3179 = vrot.lane.b32.xlu1 %v6088_v42, %s4725_s9 }
 0x3a9   : > { %3757 = vrot.lane.b32.xlu0 %v6120_v22, %s4729_s20 }
 0x3aa   : > { %v2621_v44 = vpop.permute.xlu1 %2620 }
 0x3ab   : > { %2694 = vst.msk [vmem:[#allocation5 + $0x170] sm:$0xff] %vm2670_vm14, %v2621_v44  ;;  %v2619_v45 = vpop.permute.xlu0 %2618 }
 0x3ac   : > { %2693 = vst.msk [vmem:[#allocation5 + $0x160] sm:$0xff] %vm2670_vm14, %v2619_v45  ;;  %2795 = vrot.lane.b32.xlu1 %v3294_v1, %s4723_s17 }
 0x3ad   : > { %3372 = vrot.lane.b32.xlu0 %v6090_v43, %s4727_s15 }
 0x3b0   : > { %2988 = vrot.lane.b32.xlu1 %v6124_v52, %s4726_s10 }
 0x3b1   : > { %3566 = vrot.lane.b32.xlu0 %v6122_v0, %s4728_s16 }
 0x3b4   : > { %3181 = vrot.lane.b32.xlu1 %v6120_v22, %s4725_s9 }
 0x3b5   : > { %3759 = vrot.lane.b32.xlu0 %v6114_v3, %s4729_s20 }
 0x3b8   : > { %2797 = vrot.lane.b32.xlu1 %v6090_v43, %s4723_s17 }
 0x3b9   : > { %3374 = vrot.lane.b32.xlu0 %v6134_v4, %s4727_s15 }
 0x3ba   : > { %v2625_v42 = vpop.permute.xlu1 %2624 }
 0x3bb   : > { %2696 = vst.msk [vmem:[#allocation5 + $0x190] sm:$0xff] %vm2670_vm14, %v2625_v42  ;;  %v2623_v46 = vpop.permute.xlu0 %2622 }
 0x3bc   : > { %2695 = vst.msk [vmem:[#allocation5 + $0x180] sm:$0xff] %vm2670_vm14, %v2623_v46  ;;  %2990 = vrot.lane.b32.xlu1 %v6122_v0, %s4726_s10 }
 0x3bd   : > { %3568 = vrot.lane.b32.xlu0 %v6152_v12, %s4728_s16 }
 0x3c0   : > { %3183 = vrot.lane.b32.xlu1 %v6114_v3, %s4725_s9 }
 0x3c1   : > { %3761 = vrot.lane.b32.xlu0 %v6148_v55, %s4729_s20 }
 0x3c4   : > { %2799 = vrot.lane.b32.xlu1 %v6134_v4, %s4723_s17 }
 0x3c5   : > { %3376 = vrot.lane.b32.xlu0 %v6116_v49, %s4727_s15 }
 0x3c8   : > { %2992 = vrot.lane.b32.xlu1 %v6152_v12, %s4726_s10 }
 0x3c9   : > { %3570 = vrot.lane.b32.xlu0 %v6150_v6, %s4728_s16 }
 0x3ca   : > { %v2629_v43 = vpop.permute.xlu1 %2628 }
 0x3cb   : > { %2698 = vst.msk [vmem:[#allocation5 + $0x1b0] sm:$0xff] %vm2670_vm14, %v2629_v43 }
 0x3cc   : > { %v2627_v22 = vpop.permute.xlu0 %2626  ;;  %3185 = vrot.lane.b32.xlu1 %v6148_v55, %s4725_s9 }
 0x3cd   : > { %2697 = vst.msk [vmem:[#allocation5 + $0x1a0] sm:$0xff] %vm2670_vm14, %v2627_v22  ;;  %3763 = vrot.lane.b32.xlu0 %v6142_v9, %s4729_s20 }
 0x3d0   : > { %2801 = vrot.lane.b32.xlu1 %v6116_v49, %s4723_s17 }
 0x3d1   : > { %3378 = vrot.lane.b32.xlu0 %v6162_v16, %s4727_s15 }
 0x3d4   : > { %2994 = vrot.lane.b32.xlu1 %v6150_v6, %s4726_s10 }
 0x3d5   : > { %3572 = vrot.lane.b32.xlu0 %v6182_v27, %s4728_s16 }
 0x3d8   : > { %3187 = vrot.lane.b32.xlu1 %v6142_v9, %s4725_s9 }
 0x3d9   : > { %3765 = vrot.lane.b32.xlu0 %v6178_v25, %s4729_s20 }
 0x3da   : > { %v2633_v3 = vpop.permute.xlu1 %2632 }
 0x3db   : > { %2700 = vst.msk [vmem:[#allocation5 + $0x1d0] sm:$0xff] %vm2670_vm14, %v2633_v3  ;;  %v2631_v0 = vpop.permute.xlu0 %2630 }
 0x3dc   : > { %2699 = vst.msk [vmem:[#allocation5 + $0x1c0] sm:$0xff] %vm2670_vm14, %v2631_v0  ;;  %2803 = vrot.lane.b32.xlu1 %v6162_v16, %s4723_s17  ;;  %v3090_v0 = vld [vmem:[#allocation4 + $0x21] sm:$0xff] }
 0x3dd   : > { %3380 = vrot.lane.b32.xlu0 %v6144_v35, %s4727_s15 }
 0x3e0   : > { %2996 = vrot.lane.b32.xlu1 %v6182_v27, %s4726_s10 }
 0x3e1   : > { %3574 = vrot.lane.b32.xlu0 %v6180_v60, %s4728_s16 }
 0x3e4   : > { %3189 = vrot.lane.b32.xlu1 %v6178_v25, %s4725_s9 }
 0x3e5   : > { %3767 = vrot.lane.b32.xlu0 %v6172_v47, %s4729_s20 }
 0x3e8   : > { %2805 = vrot.lane.b32.xlu1 %v6144_v35, %s4723_s17 }
 0x3e9   : > { %3382 = vrot.lane.b32.xlu0 %v6192_v30, %s4727_s15 }
 0x3ea   : > { %v2637_v49 = vpop.permute.xlu1 %2636 }
 0x3eb   : > { %2702 = vst.msk [vmem:[#allocation5 + $0x1f0] sm:$0xff] %vm2670_vm14, %v2637_v49  ;;  %v2635_v52 = vpop.permute.xlu0 %2634 }
 0x3ec   : > { %2701 = vst.msk [vmem:[#allocation5 + $0x1e0] sm:$0xff] %vm2670_vm14, %v2635_v52  ;;  %2998 = vrot.lane.b32.xlu1 %v6180_v60, %s4726_s10 }
 0x3ed   : > { %3576 = vrot.lane.b32.xlu0 %v6214_v29, %s4728_s16 }
 0x3ee   : > { %v2770_v4 = vpop.permute.xlu1 %2769 }
 0x3ef   : > { %2865 = vst.msk [vmem:[#allocation5 + $0x10] sm:$0xff] %vm2863_vm15, %v2770_v4  ;;  %v2768_v9 = vpop.permute.xlu0 %2767 }
 0x3f0   : > { %2864 = vst.msk [vmem:[#allocation5] sm:$0xff] %vm2863_vm15, %v2768_v9  ;;  %3191 = vrot.lane.b32.xlu1 %v6172_v47, %s4725_s9 }
 0x3f1   : > { %3769 = vrot.lane.b32.xlu0 %v6210_v19, %s4729_s20 }
 0x3f2   : > { %v2774_v35 = vpop.permute.xlu1 %2773 }
 0x3f3   : > { %2867 = vst.msk [vmem:[#allocation5 + $0x30] sm:$0xff] %vm2863_vm15, %v2774_v35  ;;  %v2772_v55 = vpop.permute.xlu0 %2771 }
 0x3f4   : > { %2866 = vst.msk [vmem:[#allocation5 + $0x20] sm:$0xff] %vm2863_vm15, %v2772_v55  ;;  %2807 = vrot.lane.b32.xlu1 %v6192_v30, %s4723_s17 }
 0x3f5   : > { %3384 = vrot.lane.b32.xlu0 %v6174_v21, %s4727_s15 }
 0x3f6   : > { %v2778_v6 = vpop.permute.xlu1 %2777 }
 0x3f7   : > { %2869 = vst.msk [vmem:[#allocation5 + $0x50] sm:$0xff] %vm2863_vm15, %v2778_v6  ;;  %v2776_v12 = vpop.permute.xlu0 %2775 }
 0x3f8   : > { %2868 = vst.msk [vmem:[#allocation5 + $0x40] sm:$0xff] %vm2863_vm15, %v2776_v12  ;;  %3000 = vrot.lane.b32.xlu1 %v6214_v29, %s4726_s10  ;;  %v4706_v29 = vld [vmem:[%s7105_s2] ss:$0 sm:$0xff]  ;;  %v3955_v12 = vld [vmem:[#allocation5 + $0xe8] sm:$0xff] }
 0x3f9   : > { %3578 = vrot.lane.b32.xlu0 %v6212_v36, %s4728_s16 }
 0x3fa   : > { %v2782_v16 = vpop.permute.xlu1 %2781 }
 0x3fb   : > { %2871 = vst.msk [vmem:[#allocation5 + $0x70] sm:$0xff] %vm2863_vm15, %v2782_v16  ;;  %v2780_v47 = vpop.permute.xlu0 %2779 }
 0x3fc   : > { %2870 = vst.msk [vmem:[#allocation5 + $0x60] sm:$0xff] %vm2863_vm15, %v2780_v47  ;;  %3193 = vrot.lane.b32.xlu1 %v6210_v19, %s4725_s9  ;;  %v4629_v19 = vpop.f32.mrb[30].mxu0  ;;  %v3670_v47 = vld [vmem:[#allocation4 + $0x39] sm:$0xff] }
 0x3fd   : > { %3771 = vrot.lane.b32.xlu0 %v6203_v18, %s4729_s20  ;;  %v2322_v51 = vadd.f32 %v4706_v29, %v4629_v19  ;;  %v2316_v13 = vpop.f32.mrb[31].mxu0  ;;  %v3957_v19 = vld [vmem:[#allocation5 + $0xf8] sm:$0xff] }
 0x3fe   : > { %v2790_v25 = vpop.permute.xlu1 %2789  ;;  %v2317_v15 = vadd.f32 %v4706_v29, %v2316_v13  ;;  %v3478_v29 = vld [vmem:[#allocation4 + $0x48] sm:$0xff]  ;;  %v2899_v13 = vld [vmem:[#allocation4 + $0x38] sm:$0xff] }
 0x3ff   : > { %2875 = vst.msk [vmem:[#allocation5 + $0xb0] sm:$0xff] %vm2863_vm15, %v2790_v25  ;;  %v2784_v60 = vpop.permute.xlu0 %2783 }
 0x400   : > { %2872 = vst.msk [vmem:[#allocation5 + $0x80] sm:$0xff] %vm2863_vm15, %v2784_v60  ;;  %2809 = vrot.lane.b32.xlu1 %v6174_v21, %s4723_s17  ;;  %v2355_v58 = vmax.f32 %v2317_v15, 0.0 }
 0x401   : > { %3386 = vrot.lane.b32.xlu0 %v6224_v38, %s4727_s15 }
 0x402   : > { %v3176_v27 = vpop.permute.xlu1 %3175  ;;  %2444 = vst.msk [vmem:[#allocation4 + $0x181] sm:$0xff] %vm2357_vm12, %v2355_v58 }
 0x403   : > { %v2983_v30 = vpop.permute.xlu0 %2982 }
 0x404   : > { %3068 = vst.msk [vmem:[#allocation5 + $0xb0] sm:$0xff] %vm3056_vm1, %v2983_v30  ;;  %2960 = vrot.lane.b32.xlu1 %v5994_v39, %s4726_s10  ;;  %v2356_v39 = vmax.f32 %v2322_v51, 0.0  ;;  %v3284_v30 = vld [vmem:[#allocation4 + $0x32] sm:$0xff] }
 0x405   : > { %3580 = vrot.lane.b32.xlu0 %v6244_v61, %s4728_s16  ;;  %3261 = vst.msk [vmem:[#allocation5 + $0xb0] sm:$0xff] %vm3249_vm2, %v3176_v27 }
 0x406   : > { %v2792_v21 = vpop.permute.xlu1 %2791  ;;  %2445 = vst.msk [vmem:[#allocation4 + $0x189] sm:$0xff] %vm2357_vm12, %v2356_v39 }
 0x407   : > { %2876 = vst.msk [vmem:[#allocation5 + $0xc0] sm:$0xff] %vm2863_vm15, %v2792_v21  ;;  %v3369_v14 = vpop.permute.xlu0 %3368 }
 0x408   : > { %3454 = vst.msk [vmem:[#allocation5 + $0xb0] sm:$0xff] %vm3442_vm3, %v3369_v14  ;;  %3773 = vrot.lane.b32.xlu1 %v6240_v8, %s4729_s20 }
 0x409   : > { %3002 = vrot.lane.b32.xlu0 %v6212_v36, %s4726_s10 }
 0x40a   : > { %v2985_v10 = vpop.permute.xlu1 %2984 }
 0x40b   : > { %3069 = vst.msk [vmem:[#allocation5 + $0xc0] sm:$0xff] %vm3056_vm1, %v2985_v10  ;;  %v3563_v28 = vpop.permute.xlu0 %3562  ;;  %v3671_v10 = vld [vmem:[#allocation4 + $0x49] sm:$0xff] }
 0x40c   : > { %3648 = vst.msk [vmem:[#allocation5 + $0xb0] sm:$0xff] %vm3636_vm4, %v3563_v28  ;;  %3195 = vrot.lane.b32.xlu1 %v6203_v18, %s4725_s9 }
 0x40d   : > { %3153 = vrot.lane.b32.xlu0 %v3089_v54, %s4725_s9  ;;  %v6603_v42 = vld [vmem:[#allocation4 + $0x182] sm:$0xff]  ;;  %v6608_v46 = vld [vmem:[#allocation4 + $0x18a] sm:$0xff] }
 0x40e   : > { %v3178_v36 = vpop.permute.xlu1 %3177  ;;  %3922 = vst.msk [vmem:[#allocation5 + $0x1c8] sm:$0xff] %vm2357_vm12, %v6603_v42  ;;  %3923 = vst.msk [vmem:[#allocation5 + $0x1d8] sm:$0xff] %vm2357_vm12, %v6608_v46 }
 0x40f   : > { %3262 = vst.msk [vmem:[#allocation5 + $0xc0] sm:$0xff] %vm3249_vm2, %v3178_v36  ;;  %v3756_v34 = vpop.permute.xlu0 %3755 }
 0x410   : > { %3841 = vst.msk [vmem:[#allocation5 + $0xb0] sm:$0xff] %vm3829_vm5, %v3756_v34  ;;  %3388 = vrot.lane.b32.xlu1 %v6205_v50, %s4727_s15 }
 0x411   : > { %3346 = vrot.lane.b32.xlu0 %v6376_v26, %s4727_s15  ;;  %v3951_v26 = vld [vmem:[#allocation5 + $0xc8] sm:$0xff] }
 0x412   : > { %v2794_v11 = vpop.permute.xlu1 %2793 }
 0x413   : > { %2877 = vst.msk [vmem:[#allocation5 + $0xd0] sm:$0xff] %vm2863_vm15, %v2794_v11  ;;  %v3371_v18 = vpop.permute.xlu0 %3370 }
 0x414   : > { %3455 = vst.msk [vmem:[#allocation5 + $0xc0] sm:$0xff] %vm3442_vm3, %v3371_v18  ;;  %3540 = vrot.lane.b32.xlu1 %v6016_v63, %s4728_s16 }
 0x415   : > { %2811 = vrot.lane.b32.xlu0 %v6224_v38, %s4723_s17 }
 0x416   : > { %v2987_v1 = vpop.permute.xlu1 %2986 }
 0x417   : > { %3070 = vst.msk [vmem:[#allocation5 + $0xd0] sm:$0xff] %vm3056_vm1, %v2987_v1  ;;  %v3565_v44 = vpop.permute.xlu0 %3564  ;;  %v3948_v45 = vld [vmem:[#allocation5 + $0xb0] sm:$0xff]  ;;  %v3479_v1 = vld [vmem:[#allocation4 + $0x50] sm:$0xff] }
 0x418   : > { %3649 = vst.msk [vmem:[#allocation5 + $0xc0] sm:$0xff] %vm3636_vm4, %v3565_v44  ;;  %2962 = vrot.lane.b32.xlu1 %v5992_v32, %s4726_s10  ;;  %4231 = vmatmul.mubr.f32.vlgmr.msra.gmra.mrb[0].mxu1 %v3948_v45  ;;  %v3669_v32 = vld [vmem:[#allocation4 + $0x31] sm:$0xff] }
 0x419   : > { %3582 = vrot.lane.b32.xlu0 %v6242_v31, %s4728_s16  ;;  %4511 = vmatprep.mubr.msk.f32.mxu1 %vm2357_vm12, %v3951_v26 }
 0x41a   : > { %v3180_v38 = vpop.permute.xlu1 %3179 }
 0x41b   : > { %3263 = vst.msk [vmem:[#allocation5 + $0xd0] sm:$0xff] %vm3249_vm2, %v3180_v38  ;;  %v3758_v43 = vpop.permute.xlu0 %3757  ;;  %v3693_v38 = vld [vmem:[#allocation4 + $0x151] sm:$0xff] }
 0x41c   : > { %3842 = vst.msk [vmem:[#allocation5 + $0xc0] sm:$0xff] %vm3829_vm5, %v3758_v43  ;;  %3733 = vrot.lane.b32.xlu1 %v3669_v32, %s4729_s20 }
 0x41d   : > { %3004 = vrot.lane.b32.xlu0 %v6244_v61, %s4726_s10  ;;  %v3953_v61 = vld [vmem:[#allocation5 + $0xd8] sm:$0xff] }
 0x41e   : > { %v2796_v22 = vpop.permute.xlu1 %2795 }
 0x41f   : > { %2878 = vst.msk [vmem:[#allocation5 + $0xe0] sm:$0xff] %vm2863_vm15, %v2796_v22  ;;  %v3373_v3 = vpop.permute.xlu0 %3372  ;;  %v3963_v22 = vld [vmem:[#allocation5 + $0x128] sm:$0xff] }
 0x420   : > { %3456 = vst.msk [vmem:[#allocation5 + $0xd0] sm:$0xff] %vm3442_vm3, %v3373_v3  ;;  %3155 = vrot.lane.b32.xlu1 %v3090_v0, %s4725_s9  ;;  %v3114_v0 = vld [vmem:[#allocation4 + $0x141] sm:$0xff] }
 0x421   : > { %3775 = vrot.lane.b32.xlu0 %v6234_v17, %s4729_s20 }
 0x422   : > { %v2989_v49 = vpop.permute.xlu1 %2988 }
 0x423   : > { %3071 = vst.msk [vmem:[#allocation5 + $0xe0] sm:$0xff] %vm3056_vm1, %v2989_v49  ;;  %v3567_v52 = vpop.permute.xlu0 %3566  ;;  %v3950_v4 = vld [vmem:[#allocation5 + $0xc0] sm:$0xff] }
 0x424   : > { %3650 = vst.msk [vmem:[#allocation5 + $0xd0] sm:$0xff] %vm3636_vm4, %v3567_v52  ;;  %3348 = vrot.lane.b32.xlu1 %v6364_v20, %s4727_s15  ;;  %4236 = vmatmul.mubr.f32.gmra.mrb[2].mxu1 %v3950_v4 }
 0x425   : > { %3197 = vrot.lane.b32.xlu0 %v6240_v8, %s4725_s9  ;;  %4512 = vmatprep.mubr.msk.f32.mxu1 %vm2357_vm12, %v3953_v61 }
 0x426   : > { %v3182_v9 = vpop.permute.xlu1 %3181 }
 0x427   : > { %3264 = vst.msk [vmem:[#allocation5 + $0xe0] sm:$0xff] %vm3249_vm2, %v3182_v9  ;;  %v3760_v35 = vpop.permute.xlu0 %3759  ;;  %v3480_v9 = vld [vmem:[#allocation4 + $0x60] sm:$0xff] }
 0x428   : > { %3843 = vst.msk [vmem:[#allocation5 + $0xd0] sm:$0xff] %vm3829_vm5, %v3760_v35  ;;  %2813 = vrot.lane.b32.xlu1 %v6205_v50, %s4723_s17 }
 0x429   : > { %3390 = vrot.lane.b32.xlu0 %v6254_v40, %s4727_s15 }
 0x42a   : > { %v2798_v20 = vpop.permute.xlu1 %2797 }
 0x42b   : > { %2879 = vst.msk [vmem:[#allocation5 + $0xf0] sm:$0xff] %vm2863_vm15, %v2798_v20  ;;  %v3375_v55 = vpop.permute.xlu0 %3374  ;;  %v3965_v20 = vld [vmem:[#allocation5 + $0x138] sm:$0xff] }
 0x42c   : > { %3457 = vst.msk [vmem:[#allocation5 + $0xe0] sm:$0xff] %vm3442_vm3, %v3375_v55  ;;  %3584 = vrot.lane.b32.xlu1 %v6274_v7, %s4728_s16 }
 0x42d   : > { %3542 = vrot.lane.b32.xlu0 %v6008_v53, %s4728_s16 }
 0x42e   : > { %v2991_v8 = vpop.permute.xlu1 %2990 }
 0x42f   : > { %3072 = vst.msk [vmem:[#allocation5 + $0xf0] sm:$0xff] %vm3056_vm1, %v2991_v8  ;;  %v3569_v6 = vpop.permute.xlu0 %3568  ;;  %v3952_v50 = vld [vmem:[#allocation5 + $0xd0] sm:$0xff] }
 0x430   : > { %3651 = vst.msk [vmem:[#allocation5 + $0xe0] sm:$0xff] %vm3636_vm4, %v3569_v6  ;;  %3006 = vrot.lane.b32.xlu1 %v6242_v31, %s4726_s10  ;;  %4241 = vmatmul.mubr.f32.gmra.mrb[4].mxu1 %v3952_v50  ;;  %v3673_v50 = vld [vmem:[#allocation4 + $0x61] sm:$0xff] }
 0x431   : > { %2964 = vrot.lane.b32.xlu0 %v6016_v63, %s4726_s10  ;;  %4513 = vmatprep.mubr.msk.f32.mxu1 %vm2357_vm12, %v3955_v12 }
 0x432   : > { %v3184_v16 = vpop.permute.xlu1 %3183 }
 0x433   : > { %3265 = vst.msk [vmem:[#allocation5 + $0xf0] sm:$0xff] %vm3249_vm2, %v3184_v16  ;;  %v3762_v53 = vpop.permute.xlu0 %3761 }
 0x434   : > { %3844 = vst.msk [vmem:[#allocation5 + $0xe0] sm:$0xff] %vm3829_vm5, %v3762_v53  ;;  %3777 = vrot.lane.b32.xlu1 %v6270_v57, %s4729_s20  ;;  %v3694_v53 = vld [vmem:[#allocation4 + $0x159] sm:$0xff] }
 0x435   : > { %3735 = vrot.lane.b32.xlu0 %v3670_v47, %s4729_s20 }
 0x436   : > { %v2800_v31 = vpop.permute.xlu1 %2799 }
 0x437   : > { %2880 = vst.msk [vmem:[#allocation5 + $0x100] sm:$0xff] %vm2863_vm15, %v2800_v31  ;;  %v3377_v25 = vpop.permute.xlu0 %3376 }
 0x438   : > { %3458 = vst.msk [vmem:[#allocation5 + $0xf0] sm:$0xff] %vm3442_vm3, %v3377_v25  ;;  %3199 = vrot.lane.b32.xlu1 %v6234_v17, %s4725_s9 }
 0x439   : > { %3157 = vrot.lane.b32.xlu0 %v3669_v32, %s4725_s9  ;;  %v3672_v32 = vld [vmem:[#allocation4 + $0x51] sm:$0xff] }
 0x43a   : > { %v2993_v63 = vpop.permute.xlu1 %2992 }
 0x43b   : > { %3073 = vst.msk [vmem:[#allocation5 + $0x100] sm:$0xff] %vm3056_vm1, %v2993_v63  ;;  %v3571_v60 = vpop.permute.xlu0 %3570  ;;  %v3954_v27 = vld [vmem:[#allocation5 + $0xe0] sm:$0xff] }
 0x43c   : > { %3652 = vst.msk [vmem:[#allocation5 + $0xf0] sm:$0xff] %vm3636_vm4, %v3571_v60  ;;  %3392 = vrot.lane.b32.xlu1 %v6236_v24, %s4727_s15  ;;  %4246 = vmatmul.mubr.f32.gmra.mrb[6].mxu1 %v3954_v27 }
 0x43d   : > { %3350 = vrot.lane.b32.xlu0 %v3284_v30, %s4727_s15  ;;  %4514 = vmatprep.mubr.msk.f32.mxu1 %vm2357_vm12, %v3957_v19  ;;  %v3969_v30 = vld [vmem:[#allocation5 + $0x158] sm:$0xff] }
 0x43e   : > { %v3186_v17 = vpop.permute.xlu1 %3185  ;;  %v7198_v19 = vld [vmem:[#allocation13_spill] sm:$0xff] }
 0x43f   : > { %3266 = vst.msk [vmem:[#allocation5 + $0x100] sm:$0xff] %vm3249_vm2, %v3186_v17  ;;  %v3764_v21 = vpop.permute.xlu0 %3763  ;;  %v3481_v17 = vld [vmem:[#allocation4 + $0x68] sm:$0xff] }
 0x440   : > { %3845 = vst.msk [vmem:[#allocation5 + $0xf0] sm:$0xff] %vm3829_vm5, %v3764_v21  ;;  %3544 = vrot.lane.b32.xlu1 %v3478_v29, %s4728_s16 }
 0x441   : > { %2815 = vrot.lane.b32.xlu0 %v6254_v40, %s4723_s17  ;;  %v3959_v40 = vld [vmem:[#allocation5 + $0x108] sm:$0xff] }
 0x442   : > { %v2802_v51 = vpop.permute.xlu1 %2801 }
 0x443   : > { %2881 = vst.msk [vmem:[#allocation5 + $0x110] sm:$0xff] %vm2863_vm15, %v2802_v51  ;;  %v3379_v14 = vpop.permute.xlu0 %3378 }
 0x444   : > { %3459 = vst.msk [vmem:[#allocation5 + $0x100] sm:$0xff] %vm3442_vm3, %v3379_v14  ;;  %2966 = vrot.lane.b32.xlu1 %v2899_v13, %s4726_s10  ;;  %v3695_v14 = vld [vmem:[#allocation4 + $0x169] sm:$0xff] }
 0x445   : > { %3586 = vrot.lane.b32.xlu0 %v6272_v37, %s4728_s16  ;;  %v3674_v13 = vld [vmem:[#allocation4 + $0x69] sm:$0xff] }
 0x446   : > { %v2995_v39 = vpop.permute.xlu1 %2994 }
 0x447   : > { %3074 = vst.msk [vmem:[#allocation5 + $0x110] sm:$0xff] %vm3056_vm1, %v2995_v39  ;;  %v3573_v15 = vpop.permute.xlu0 %3572  ;;  %v3956_v58 = vld [vmem:[#allocation5 + $0xf0] sm:$0xff] }
 0x448   : > { %3653 = vst.msk [vmem:[#allocation5 + $0x100] sm:$0xff] %vm3636_vm4, %v3573_v15  ;;  %3737 = vrot.lane.b32.xlu1 %v3671_v10, %s4729_s20  ;;  %4251 = vmatmul.mubr.f32.gmra.mrb[8].mxu1 %v3956_v58  ;;  %v7199_v58 = vld [vmem:[#allocation11_spill] sm:$0xff] }
 0x449   : > { %3008 = vrot.lane.b32.xlu0 %v6274_v7, %s4726_s10  ;;  %4515 = vmatprep.mubr.msk.f32.mxu1 %vm2357_vm12, %v3959_v40  ;;  %v7200_v40 = vld [vmem:[#allocation7_spill] sm:$0xff] }
 0x44a   : > { %v3188_v28 = vpop.permute.xlu1 %3187 }
 0x44b   : > { %3267 = vst.msk [vmem:[#allocation5 + $0x110] sm:$0xff] %vm3249_vm2, %v3188_v28  ;;  %v3766_v54 = vpop.permute.xlu0 %3765 }
 0x44c   : > { %3846 = vst.msk [vmem:[#allocation5 + $0x100] sm:$0xff] %vm3829_vm5, %v3766_v54  ;;  %3159 = vrot.lane.b32.xlu1 %v3670_v47, %s4725_s9  ;;  %v3967_v47 = vld [vmem:[#allocation5 + $0x148] sm:$0xff] }
 0x44d   : > { %3779 = vrot.lane.b32.xlu0 %v6264_v5, %s4729_s20  ;;  %v3961_v5 = vld [vmem:[#allocation5 + $0x118] sm:$0xff] }
 0x44e   : > { %v2804_v36 = vpop.permute.xlu1 %2803 }
 0x44f   : > { %2882 = vst.msk [vmem:[#allocation5 + $0x120] sm:$0xff] %vm2863_vm15, %v2804_v36  ;;  %v3381_v34 = vpop.permute.xlu0 %3380 }
 0x450   : > { %3460 = vst.msk [vmem:[#allocation5 + $0x110] sm:$0xff] %vm3442_vm3, %v3381_v34  ;;  %3352 = vrot.lane.b32.xlu1 %v6380_v62, %s4727_s15  ;;  %v6786_v34 = vld [vmem:[#allocation4 + $0x78] sm:$0xff] }
 0x451   : > { %3201 = vrot.lane.b32.xlu0 %v6270_v57, %s4725_s9 }
 0x452   : > { %v2997_v7 = vpop.permute.xlu1 %2996 }
 0x453   : > { %3075 = vst.msk [vmem:[#allocation5 + $0x120] sm:$0xff] %vm3056_vm1, %v2997_v7  ;;  %v3575_v11 = vpop.permute.xlu0 %3574  ;;  %v3958_v18 = vld [vmem:[#allocation5 + $0x100] sm:$0xff]  ;;  %v3929_v7 = vld [vmem:[#allocation5 + $0x18] sm:$0xff] }
 0x454   : > { %3654 = vst.msk [vmem:[#allocation5 + $0x110] sm:$0xff] %vm3636_vm4, %v3575_v11  ;;  %2817 = vrot.lane.b32.xlu1 %v6236_v24, %s4723_s17  ;;  %4256 = vmatmul.mubr.f32.gmra.mrb[10].mxu1 %v3958_v18 }
 0x455   : > { %3394 = vrot.lane.b32.xlu0 %v6285_v41, %s4727_s15  ;;  %4516 = vmatprep.mubr.msk.f32.mxu1 %vm2357_vm12, %v3961_v5 }
 0x456   : > { %v3190_v62 = vpop.permute.xlu1 %3189 }
 0x457   : > { %3268 = vst.msk [vmem:[#allocation5 + $0x120] sm:$0xff] %vm3249_vm2, %v3190_v62  ;;  %v3768_v57 = vpop.permute.xlu0 %3767  ;;  %v3971_v62 = vld [vmem:[#allocation5 + $0x168] sm:$0xff] }
 0x458   : > { %3847 = vst.msk [vmem:[#allocation5 + $0x110] sm:$0xff] %vm3829_vm5, %v3768_v57  ;;  %3588 = vrot.lane.b32.xlu1 %v6299_v59, %s4728_s16  ;;  %v7201_v57 = vld [vmem:[#allocation12_spill] sm:$0xff] }
 0x459   : > { %3546 = vrot.lane.b32.xlu0 %v3479_v1, %s4728_s16 }
 0x45a   : > { %v2806_v24 = vpop.permute.xlu1 %2805 }
 0x45b   : > { %2883 = vst.msk [vmem:[#allocation5 + $0x130] sm:$0xff] %vm2863_vm15, %v2806_v24  ;;  %v3383_v44 = vpop.permute.xlu0 %3382  ;;  %v3675_v24 = vld [vmem:[#allocation4 + $0x79] sm:$0xff] }
 0x45c   : > { %3461 = vst.msk [vmem:[#allocation5 + $0x120] sm:$0xff] %vm3442_vm3, %v3383_v44  ;;  %3010 = vrot.lane.b32.xlu1 %v6272_v37, %s4726_s10  ;;  %v2924_v44 = vld [vmem:[#allocation4 + $0x168] sm:$0xff] }
 0x45d   : > { %2968 = vrot.lane.b32.xlu0 %v3478_v29, %s4726_s10 }
 0x45e   : > { %v2999_v45 = vpop.permute.xlu1 %2998 }
 0x45f   : > { %3076 = vst.msk [vmem:[#allocation5 + $0x130] sm:$0xff] %vm3056_vm1, %v2999_v45  ;;  %v3577_v26 = vpop.permute.xlu0 %3576  ;;  %v3960_v43 = vld [vmem:[#allocation5 + $0x110] sm:$0xff] }
 0x460   : > { %3655 = vst.msk [vmem:[#allocation5 + $0x120] sm:$0xff] %vm3636_vm4, %v3577_v26  ;;  %3781 = vrot.lane.b32.xlu1 %v3693_v38, %s4729_s20  ;;  %4261 = vmatmul.mubr.f32.gmra.mrb[12].mxu1 %v3960_v43 }
 0x461   : > { %3739 = vrot.lane.b32.xlu0 %v3672_v32, %s4729_s20  ;;  %4517 = vmatprep.mubr.msk.f32.mxu1 %vm2357_vm12, %v3963_v22  ;;  %v7202_v22 = vld [vmem:[#allocation6_spill] sm:$0xff] }
 0x462   : > { %v3192_v37 = vpop.permute.xlu1 %3191 }
 0x463   : > { %3269 = vst.msk [vmem:[#allocation5 + $0x130] sm:$0xff] %vm3249_vm2, %v3192_v37  ;;  %v3770_v3 = vpop.permute.xlu0 %3769 }
 0x464   : > { %3848 = vst.msk [vmem:[#allocation5 + $0x120] sm:$0xff] %vm3829_vm5, %v3770_v3  ;;  %3203 = vrot.lane.b32.xlu1 %v3114_v0, %s4725_s9  ;;  %v7203_v0 = vld [vmem:[#allocation14_spill] sm:$0xff] }
 0x465   : > { %3161 = vrot.lane.b32.xlu0 %v3671_v10, %s4725_s9 }
 0x466   : > { %v2808_v49 = vpop.permute.xlu1 %2807 }
 0x467   : > { %2884 = vst.msk [vmem:[#allocation5 + $0x140] sm:$0xff] %vm2863_vm15, %v2808_v49  ;;  %v3385_v52 = vpop.permute.xlu0 %3384 }
 0x468   : > { %3462 = vst.msk [vmem:[#allocation5 + $0x130] sm:$0xff] %vm3442_vm3, %v3385_v52  ;;  %3396 = vrot.lane.b32.xlu1 %v6266_v33, %s4727_s15 }
 0x469   : > { %3354 = vrot.lane.b32.xlu0 %v6403_v2, %s4727_s15 }
 0x46a   : > { %v3001_v4 = vpop.permute.xlu1 %3000 }
 0x46b   : > { %3077 = vst.msk [vmem:[#allocation5 + $0x140] sm:$0xff] %vm3056_vm1, %v3001_v4  ;;  %v3579_v61 = vpop.permute.xlu0 %3578  ;;  %v3962_v35 = vld [vmem:[#allocation5 + $0x120] sm:$0xff] }
 0x46c   : > { %3656 = vst.msk [vmem:[#allocation5 + $0x130] sm:$0xff] %vm3636_vm4, %v3579_v61  ;;  %3548 = vrot.lane.b32.xlu1 %v3480_v9, %s4728_s16  ;;  %4266 = vmatmul.mubr.f32.gmra.mrb[14].mxu1 %v3962_v35  ;;  %v6820_v61 = vld [vmem:[#allocation4 + $0x180] sm:$0xff]  ;;  %v3973_v35 = vld [vmem:[#allocation5 + $0x178] sm:$0xff] }
 0x46d   : > { %2819 = vrot.lane.b32.xlu0 %v6285_v41, %s4723_s17  ;;  %4518 = vmatprep.mubr.msk.f32.mxu1 %vm2357_vm12, %v3965_v20  ;;  %v3483_v20 = vld [vmem:[#allocation4 + $0x80] sm:$0xff] }
 0x46e   : > { %v3194_v55 = vpop.permute.xlu1 %3193 }
 0x46f   : > { %3270 = vst.msk [vmem:[#allocation5 + $0x140] sm:$0xff] %vm3249_vm2, %v3194_v55  ;;  %v3772_v2 = vpop.permute.xlu0 %3771  ;;  %v3931_v55 = vld [vmem:[#allocation5 + $0x28] sm:$0xff] }
 0x470   : > { %3849 = vst.msk [vmem:[#allocation5 + $0x130] sm:$0xff] %vm3829_vm5, %v3772_v2  ;;  %2970 = vrot.lane.b32.xlu1 %v3479_v1, %s4726_s10 }
 0x471   : > { %3590 = vrot.lane.b32.xlu0 %v6297_v48, %s4728_s16 }
 0x472   : > { %v2810_v8 = vpop.permute.xlu1 %2809 }
 0x473   : > { %2885 = vst.msk [vmem:[#allocation5 + $0x150] sm:$0xff] %vm2863_vm15, %v2810_v8  ;;  %v3387_v6 = vpop.permute.xlu0 %3386 }
 0x474   : > { %3463 = vst.msk [vmem:[#allocation5 + $0x140] sm:$0xff] %vm3442_vm3, %v3387_v6  ;;  %3741 = vrot.lane.b32.xlu1 %v3673_v50, %s4729_s20  ;;  %v2925_v6 = vld [vmem:[#allocation4 + $0x170] sm:$0xff] }
 0x475   : > { %3012 = vrot.lane.b32.xlu0 %v6299_v59, %s4726_s10 }
 0x476   : > { %v2961_v41 = vpop.permute.xlu1 %2960 }
 0x477   : > { %3057 = vst.msk [vmem:[#allocation5] sm:$0xff] %vm3056_vm1, %v2961_v41  ;;  %v3581_v12 = vpop.permute.xlu0 %3580  ;;  %v3964_v16 = vld [vmem:[#allocation5 + $0x130] sm:$0xff] }
 0x478   : > { %3657 = vst.msk [vmem:[#allocation5 + $0x140] sm:$0xff] %vm3636_vm4, %v3581_v12  ;;  %3163 = vrot.lane.b32.xlu1 %v3672_v32, %s4725_s9  ;;  %4271 = vmatmul.mubr.f32.gmra.mrb[16].mxu1 %v3964_v16  ;;  %v3697_v12 = vld [vmem:[#allocation4 + $0x181] sm:$0xff] }
 0x479   : > { %3783 = vrot.lane.b32.xlu0 %v3694_v53, %s4729_s20  ;;  %4519 = vmatprep.mubr.msk.f32.mxu1 %vm2357_vm12, %v3967_v47  ;;  %v3676_v16 = vld [vmem:[#allocation4 + $0x81] sm:$0xff] }
 0x47a   : > { %v3774_v31 = vpop.permute.xlu1 %3773 }
 0x47b   : > { %3850 = vst.msk [vmem:[#allocation5 + $0x140] sm:$0xff] %vm3829_vm5, %v3774_v31  ;;  %v3003_v59 = vpop.permute.xlu0 %3002 }
 0x47c   : > { %3078 = vst.msk [vmem:[#allocation5 + $0x150] sm:$0xff] %vm3056_vm1, %v3003_v59  ;;  %3356 = vrot.lane.b32.xlu1 %v6030_v23, %s4727_s15 }
 0x47d   : > { %3205 = vrot.lane.b32.xlu0 %v3693_v38, %s4725_s9  ;;  %v3696_v38 = vld [vmem:[#allocation4 + $0x171] sm:$0xff] }
 0x47e   : > { %v3196_v25 = vpop.permute.xlu1 %3195 }
 0x47f   : > { %3271 = vst.msk [vmem:[#allocation5 + $0x150] sm:$0xff] %vm3249_vm2, %v3196_v25  ;;  %v3154_v63 = vpop.permute.xlu0 %3153  ;;  %v7204_v25 = vld [vmem:[#allocation15_spill] sm:$0xff] }
 0x480   : > { %3250 = vst.msk [vmem:[#allocation5] sm:$0xff] %vm3249_vm2, %v3154_v63  ;;  %2821 = vrot.lane.b32.xlu1 %v6266_v33, %s4723_s17  ;;  %v7205_v63 = vld [vmem:[#allocation8_spill] sm:$0xff] }
 0x481   : > { %3398 = vrot.lane.b32.xlu0 %v6309_v56, %s4727_s15 }
 0x482   : > { %v3389_v60 = vpop.permute.xlu1 %3388  ;;  %v3966_v27 = vld [vmem:[#allocation5 + $0x140] sm:$0xff] }
 0x483   : > { %3464 = vst.msk [vmem:[#allocation5 + $0x150] sm:$0xff] %vm3442_vm3, %v3389_v60  ;;  %4276 = vmatmul.mubr.f32.gmra.mrb[18].mxu1 %v3966_v27  ;;  %v3347_v23 = vpop.permute.xlu0 %3346 }
 0x484   : > { %3443 = vst.msk [vmem:[#allocation5] sm:$0xff] %vm3442_vm3, %v3347_v23  ;;  %3592 = vrot.lane.b32.xlu1 %v7198_v19, %s4728_s16  ;;  %4520 = vmatprep.mubr.msk.f32.mxu1 %vm2357_vm12, %v3969_v30  ;;  %v3933_v30 = vld [vmem:[#allocation5 + $0x38] sm:$0xff] }
 0x485   : > { %3550 = vrot.lane.b32.xlu0 %v3481_v17, %s4728_s16 }
 0x486   : > { %v3541_v33 = vpop.permute.xlu1 %3540 }
 0x487   : > { %3637 = vst.msk [vmem:[#allocation5] sm:$0xff] %vm3636_vm4, %v3541_v33  ;;  %v2812_v21 = vpop.permute.xlu0 %2811  ;;  %v6855_v33 = vld [vmem:[#allocation4 + $0x188] sm:$0xff] }
 0x488   : > { %2886 = vst.msk [vmem:[#allocation5 + $0x160] sm:$0xff] %vm2863_vm15, %v2812_v21  ;;  %3014 = vrot.lane.b32.xlu1 %v6297_v48, %s4726_s10 }
 0x489   : > { %2972 = vrot.lane.b32.xlu0 %v3480_v9, %s4726_s10 }
 0x48a   : > { %v2963_v29 = vpop.permute.xlu1 %2962 }
 0x48b   : > { %3058 = vst.msk [vmem:[#allocation5 + $0x10] sm:$0xff] %vm3056_vm1, %v2963_v29  ;;  %v3583_v51 = vpop.permute.xlu0 %3582  ;;  %v3484_v29 = vld [vmem:[#allocation4 + $0x90] sm:$0xff] }
 0x48c   : > { %3658 = vst.msk [vmem:[#allocation5 + $0x150] sm:$0xff] %vm3636_vm4, %v3583_v51  ;;  %3785 = vrot.lane.b32.xlu1 %v3695_v14, %s4729_s20  ;;  %v3975_v51 = vld [vmem:[#allocation5 + $0x188] sm:$0xff] }
 0x48d   : > { %3743 = vrot.lane.b32.xlu0 %v3674_v13, %s4729_s20 }
 0x48e   : > { %v3734_v39 = vpop.permute.xlu1 %3733 }
 0x48f   : > { %3830 = vst.msk [vmem:[#allocation5] sm:$0xff] %vm3829_vm5, %v3734_v39  ;;  %v3005_v15 = vpop.permute.xlu0 %3004 }
 0x490   : > { %3079 = vst.msk [vmem:[#allocation5 + $0x160] sm:$0xff] %vm3056_vm1, %v3005_v15  ;;  %3207 = vrot.lane.b32.xlu1 %v3694_v53, %s4725_s9 }
 0x491   : > { %3165 = vrot.lane.b32.xlu0 %v3673_v50, %s4725_s9 }
 0x492   : > { %v3156_v48 = vpop.permute.xlu1 %3155 }
 0x493   : > { %3251 = vst.msk [vmem:[#allocation5 + $0x10] sm:$0xff] %vm3249_vm2, %v3156_v48  ;;  %v3776_v10 = vpop.permute.xlu0 %3775  ;;  %v3698_v48 = vld [vmem:[#allocation4 + $0x189] sm:$0xff] }
 0x494   : > { %3851 = vst.msk [vmem:[#allocation5 + $0x150] sm:$0xff] %vm3829_vm5, %v3776_v10  ;;  %3400 = vrot.lane.b32.xlu1 %v7199_v58, %s4727_s15  ;;  %v3677_v10 = vld [vmem:[#allocation4 + $0x91] sm:$0xff] }
 0x495   : > { %3358 = vrot.lane.b32.xlu0 %v7200_v40, %s4727_s15 }
 0x496   : > { %v3349_v28 = vpop.permute.xlu1 %3348  ;;  %v3926_v54 = vld [vmem:[#allocation5] sm:$0xff] }
 0x497   : > { %3444 = vst.msk [vmem:[#allocation5 + $0x10] sm:$0xff] %vm3442_vm3, %v3349_v28  ;;  %4176 = vmatmul.mubr.f32.vlgmr.msra.gmra.mrb[32].mxu0 %v3926_v54  ;;  %v3198_v36 = vpop.permute.xlu0 %3197 }
 0x498   : > { %3272 = vst.msk [vmem:[#allocation5 + $0x160] sm:$0xff] %vm3249_vm2, %v3198_v36  ;;  %3552 = vrot.lane.b32.xlu1 %v6786_v34, %s4728_s16  ;;  %4500 = vmatprep.mubr.msk.f32.mxu0 %vm2357_vm12, %v3929_v7  ;;  %v7206_v36 = vld [vmem:[#allocation9_spill] sm:$0xff] }
 0x499   : > { %2823 = vrot.lane.b32.xlu0 %v6309_v56, %s4723_s17 }
 0x49a   : > { %v2814_v11 = vpop.permute.xlu1 %2813 }
 0x49b   : > { %2887 = vst.msk [vmem:[#allocation5 + $0x170] sm:$0xff] %vm2863_vm15, %v2814_v11  ;;  %v3391_v18 = vpop.permute.xlu0 %3390  ;;  %v3968_v5 = vld [vmem:[#allocation5 + $0x150] sm:$0xff] }
 0x49c   : > { %3465 = vst.msk [vmem:[#allocation5 + $0x160] sm:$0xff] %vm3442_vm3, %v3391_v18  ;;  %2974 = vrot.lane.b32.xlu1 %v3481_v17, %s4726_s10  ;;  %4281 = vmatmul.mubr.f32.gmra.mrb[20].mxu1 %v3968_v5  ;;  %v3977_v5 = vld [vmem:[#allocation5 + $0x198] sm:$0xff] }
 0x49d   : > { %3594 = vrot.lane.b32.xlu0 %v7201_v57, %s4728_s16  ;;  %4521 = vmatprep.mubr.msk.f32.mxu1 %vm2357_vm12, %v3971_v62  ;;  %v3506_v62 = vld [vmem:[#allocation4 + $0x198] sm:$0xff] }
 0x49e   : > { %v3585_v1 = vpop.permute.xlu1 %3584 }
 0x49f   : > { %3659 = vst.msk [vmem:[#allocation5 + $0x160] sm:$0xff] %vm3636_vm4, %v3585_v1  ;;  %v3543_v56 = vpop.permute.xlu0 %3542 }
 0x4a0   : > { %3638 = vst.msk [vmem:[#allocation5 + $0x10] sm:$0xff] %vm3636_vm4, %v3543_v56  ;;  %3745 = vrot.lane.b32.xlu1 %v3675_v24, %s4729_s20  ;;  %v3892_v56 = vld [vmem:[#allocation4 + $0x19a] sm:$0xff] }
 0x4a1   : > { %3016 = vrot.lane.b32.xlu0 %v2924_v44, %s4726_s10  ;;  %3924 = vst.msk [vmem:[#allocation5 + $0x1e8] sm:$0xff] %vm2357_vm12, %v3892_v56 }
 0x4a2   : > { %v3007_v45 = vpop.permute.xlu1 %3006 }
 0x4a3   : > { %3080 = vst.msk [vmem:[#allocation5 + $0x170] sm:$0xff] %vm3056_vm1, %v3007_v45  ;;  %v2965_v26 = vpop.permute.xlu0 %2964 }
 0x4a4   : > { %3059 = vst.msk [vmem:[#allocation5 + $0x20] sm:$0xff] %vm3056_vm1, %v2965_v26  ;;  %3167 = vrot.lane.b32.xlu1 %v3674_v13, %s4725_s9  ;;  %v3699_v26 = vld [vmem:[#allocation4 + $0x199] sm:$0xff] }
 0x4a5   : > { %3787 = vrot.lane.b32.xlu0 %v3696_v38, %s4729_s20 }
 0x4a6   : > { %v3778_v43 = vpop.permute.xlu1 %3777 }
 0x4a7   : > { %3852 = vst.msk [vmem:[#allocation5 + $0x160] sm:$0xff] %vm3829_vm5, %v3778_v43  ;;  %v3736_v32 = vpop.permute.xlu0 %3735 }
 0x4a8   : > { %3831 = vst.msk [vmem:[#allocation5 + $0x10] sm:$0xff] %vm3829_vm5, %v3736_v32  ;;  %3360 = vrot.lane.b32.xlu1 %v7202_v22, %s4727_s15  ;;  %v3678_v32 = vld [vmem:[#allocation4 + $0x99] sm:$0xff] }
 0x4a9   : > { %3209 = vrot.lane.b32.xlu0 %v3695_v14, %s4725_s9 }
 0x4aa   : > { %v3200_v37 = vpop.permute.xlu1 %3199 }
 0x4ab   : > { %3273 = vst.msk [vmem:[#allocation5 + $0x170] sm:$0xff] %vm3249_vm2, %v3200_v37  ;;  %v3158_v3 = vpop.permute.xlu0 %3157 }
 0x4ac   : > { %3252 = vst.msk [vmem:[#allocation5 + $0x20] sm:$0xff] %vm3249_vm2, %v3158_v3  ;;  %2825 = vrot.lane.b32.xlu1 %v7199_v58, %s4723_s17 }
 0x4ad   : > { %3402 = vrot.lane.b32.xlu0 %v7203_v0, %s4727_s15 }
 0x4ae   : > { %v3393_v49 = vpop.permute.xlu1 %3392  ;;  %v3970_v52 = vld [vmem:[#allocation5 + $0x160] sm:$0xff] }
 0x4af   : > { %3466 = vst.msk [vmem:[#allocation5 + $0x170] sm:$0xff] %vm3442_vm3, %v3393_v49  ;;  %4286 = vmatmul.mubr.f32.gmra.mrb[22].mxu1 %v3970_v52  ;;  %v3351_v4 = vpop.permute.xlu0 %3350  ;;  %v3928_v9 = vld [vmem:[#allocation5 + $0x10] sm:$0xff] }
 0x4b0   : > { %3445 = vst.msk [vmem:[#allocation5 + $0x20] sm:$0xff] %vm3442_vm3, %v3351_v4  ;;  %3596 = vrot.lane.b32.xlu1 %v6820_v61, %s4728_s16  ;;  %4181 = vmatmul.mubr.f32.gmra.mrb[34].mxu0 %v3928_v9 }
 0x4b1   : > { %4522 = vmatprep.mubr.msk.f32.mxu1 %vm2357_vm12, %v3973_v35  ;;  %3554 = vrot.lane.b32.xlu0 %v3483_v20, %s4728_s16 }
 0x4b2   : > { %4501 = vmatprep.mubr.msk.f32.mxu0 %vm2357_vm12, %v3931_v55  ;;  %v3545_v2 = vpop.permute.xlu1 %3544  ;;  %v3893_v55 = vld [vmem:[#allocation4 + $0x1a2] sm:$0xff] }
 0x4b3   : > { %3639 = vst.msk [vmem:[#allocation5 + $0x20] sm:$0xff] %vm3636_vm4, %v3545_v2  ;;  %v2816_v8 = vpop.permute.xlu0 %2815  ;;  %v7207_v2 = vld [vmem:[#allocation10_spill] sm:$0xff] }
 0x4b4   : > { %2888 = vst.msk [vmem:[#allocation5 + $0x180] sm:$0xff] %vm2863_vm15, %v2816_v8  ;;  %3018 = vrot.lane.b32.xlu1 %v2925_v6, %s4726_s10  ;;  %v3507_v8 = vld [vmem:[#allocation4 + $0x1a0] sm:$0xff] }
 0x4b5   : > { %2976 = vrot.lane.b32.xlu0 %v6786_v34, %s4726_s10  ;;  %3925 = vst.msk [vmem:[#allocation5 + $0x1f8] sm:$0xff] %vm2357_vm12, %v3893_v55 }
 0x4b6   : > { %v2967_v50 = vpop.permute.xlu1 %2966 }
 0x4b7   : > { %3060 = vst.msk [vmem:[#allocation5 + $0x30] sm:$0xff] %vm3056_vm1, %v2967_v50  ;;  %v3587_v41 = vpop.permute.xlu0 %3586 }
 0x4b8   : > { %3660 = vst.msk [vmem:[#allocation5 + $0x170] sm:$0xff] %vm3636_vm4, %v3587_v41  ;;  %3789 = vrot.lane.b32.xlu1 %v3697_v12, %s4729_s20 }
 0x4b9   : > { %3747 = vrot.lane.b32.xlu0 %v3676_v16, %s4729_s20 }
 0x4ba   : > { %v3738_v53 = vpop.permute.xlu1 %3737 }
 0x4bb   : > { %3832 = vst.msk [vmem:[#allocation5 + $0x20] sm:$0xff] %vm3829_vm5, %v3738_v53  ;;  %v3009_v47 = vpop.permute.xlu0 %3008 }
 0x4bc   : > { %3081 = vst.msk [vmem:[#allocation5 + $0x180] sm:$0xff] %vm3056_vm1, %v3009_v47  ;;  %3211 = vrot.lane.b32.xlu1 %v3696_v38, %s4725_s9 }
 0x4bd   : > { %3169 = vrot.lane.b32.xlu0 %v3675_v24, %s4725_s9  ;;  %v3485_v24 = vld [vmem:[#allocation4 + $0x98] sm:$0xff] }
 0x4be   : > { %v3160_v31 = vpop.permute.xlu1 %3159 }
 0x4bf   : > { %3253 = vst.msk [vmem:[#allocation5 + $0x30] sm:$0xff] %vm3249_vm2, %v3160_v31  ;;  %v3780_v59 = vpop.permute.xlu0 %3779 }
 0x4c0   : > { %3853 = vst.msk [vmem:[#allocation5 + $0x170] sm:$0xff] %vm3829_vm5, %v3780_v59  ;;  %3404 = vrot.lane.b32.xlu1 %v7204_v25, %s4727_s15 }
 0x4c1   : > { %3362 = vrot.lane.b32.xlu0 %v7205_v63, %s4727_s15 }
 0x4c2   : > { %v3353_v60 = vpop.permute.xlu1 %3352  ;;  %v3930_v27 = vld [vmem:[#allocation5 + $0x20] sm:$0xff] }
 0x4c3   : > { %3446 = vst.msk [vmem:[#allocation5 + $0x30] sm:$0xff] %vm3442_vm3, %v3353_v60  ;;  %4186 = vmatmul.mubr.f32.gmra.mrb[36].mxu0 %v3930_v27  ;;  %v3202_v23 = vpop.permute.xlu0 %3201 }
 0x4c4   : > { %3274 = vst.msk [vmem:[#allocation5 + $0x180] sm:$0xff] %vm3249_vm2, %v3202_v23  ;;  %2827 = vrot.lane.b32.xlu1 %v7203_v0, %s4723_s17  ;;  %4502 = vmatprep.mubr.msk.f32.mxu0 %vm2357_vm12, %v3933_v30 }
 0x4c5   : > { %2785 = vrot.lane.b32.xlu0 %v7202_v22, %s4723_s17  ;;  %v6906_v22 = vld [vmem:[%s7107_s4] ss:$0 sm:$0xff] }
 0x4c6   : > { %v2818_v19 = vpop.permute.xlu1 %2817 }
 0x4c7   : > { %2889 = vst.msk [vmem:[#allocation5 + $0x190] sm:$0xff] %vm2863_vm15, %v2818_v19  ;;  %v3395_v17 = vpop.permute.xlu0 %3394  ;;  %v3972_v21 = vld [vmem:[#allocation5 + $0x170] sm:$0xff] }
 0x4c8   : > { %3467 = vst.msk [vmem:[#allocation5 + $0x180] sm:$0xff] %vm3442_vm3, %v3395_v17  ;;  %3598 = vrot.lane.b32.xlu1 %v6855_v33, %s4728_s16  ;;  %4291 = vmatmul.mubr.f32.gmra.mrb[24].mxu1 %v3972_v21 }
 0x4c9   : > { %3556 = vrot.lane.b32.xlu0 %v3484_v29, %s4728_s16  ;;  %4523 = vmatprep.mubr.msk.f32.mxu1 %vm2357_vm12, %v3975_v51 }
 0x4ca   : > { %v3589_v14 = vpop.permute.xlu1 %3588 }
 0x4cb   : > { %3661 = vst.msk [vmem:[#allocation5 + $0x180] sm:$0xff] %vm3636_vm4, %v3589_v14  ;;  %v3547_v13 = vpop.permute.xlu0 %3546 }
 0x4cc   : > { %3640 = vst.msk [vmem:[#allocation5 + $0x30] sm:$0xff] %vm3636_vm4, %v3547_v13  ;;  %3020 = vrot.lane.b32.xlu1 %v6820_v61, %s4726_s10 }
 0x4cd   : > { %2978 = vrot.lane.b32.xlu0 %v3483_v20, %s4726_s10  ;;  %v3937_v20 = vld [vmem:[#allocation5 + $0x58] sm:$0xff] }
 0x4ce   : > { %v3011_v39 = vpop.permute.xlu1 %3010 }
 0x4cf   : > { %3082 = vst.msk [vmem:[#allocation5 + $0x190] sm:$0xff] %vm3056_vm1, %v3011_v39  ;;  %v2969_v15 = vpop.permute.xlu0 %2968 }
 0x4d0   : > { %3061 = vst.msk [vmem:[#allocation5 + $0x40] sm:$0xff] %vm3056_vm1, %v2969_v15  ;;  %3791 = vrot.lane.b32.xlu1 %v3698_v48, %s4729_s20 }
 0x4d1   : > { %3749 = vrot.lane.b32.xlu0 %v3677_v10, %s4729_s20 }
 0x4d2   : > { %v3782_v58 = vpop.permute.xlu1 %3781 }
 0x4d3   : > { %3854 = vst.msk [vmem:[#allocation5 + $0x180] sm:$0xff] %vm3829_vm5, %v3782_v58  ;;  %v3740_v40 = vpop.permute.xlu0 %3739  ;;  %v3939_v58 = vld [vmem:[#allocation5 + $0x68] sm:$0xff] }
 0x4d4   : > { %3833 = vst.msk [vmem:[#allocation5 + $0x30] sm:$0xff] %vm3829_vm5, %v3740_v40  ;;  %3213 = vrot.lane.b32.xlu1 %v3697_v12, %s4725_s9  ;;  %v3486_v12 = vld [vmem:[#allocation4 + $0xa8] sm:$0xff] }
 0x4d5   : > { %3171 = vrot.lane.b32.xlu0 %v3676_v16, %s4725_s9  ;;  %v3700_v16 = vld [vmem:[#allocation4 + $0x1a1] sm:$0xff] }
 0x4d6   : > { %v3204_v28 = vpop.permute.xlu1 %3203 }
 0x4d7   : > { %3275 = vst.msk [vmem:[#allocation5 + $0x190] sm:$0xff] %vm3249_vm2, %v3204_v28  ;;  %v3162_v54 = vpop.permute.xlu0 %3161 }
 0x4d8   : > { %3254 = vst.msk [vmem:[#allocation5 + $0x40] sm:$0xff] %vm3249_vm2, %v3162_v54  ;;  %3406 = vrot.lane.b32.xlu1 %v6603_v42, %s4727_s15  ;;  %v3935_v42 = vld [vmem:[#allocation5 + $0x48] sm:$0xff] }
 0x4d9   : > { %3364 = vrot.lane.b32.xlu0 %v7206_v36, %s4727_s15 }
 0x4da   : > { %v3397_v34 = vpop.permute.xlu1 %3396  ;;  %v3974_v7 = vld [vmem:[#allocation5 + $0x180] sm:$0xff] }
 0x4db   : > { %3468 = vst.msk [vmem:[#allocation5 + $0x190] sm:$0xff] %vm3442_vm3, %v3397_v34  ;;  %4296 = vmatmul.mubr.f32.gmra.mrb[26].mxu1 %v3974_v7  ;;  %v3355_v11 = vpop.permute.xlu0 %3354  ;;  %v3932_v18 = vld [vmem:[#allocation5 + $0x30] sm:$0xff] }
 0x4dc   : > { %3447 = vst.msk [vmem:[#allocation5 + $0x40] sm:$0xff] %vm3442_vm3, %v3355_v11  ;;  %2829 = vrot.lane.b32.xlu1 %v7204_v25, %s4723_s17  ;;  %4191 = vmatmul.mubr.f32.gmra.mrb[38].mxu0 %v3932_v18 }
 0x4dd   : > { %4524 = vmatprep.mubr.msk.f32.mxu1 %vm2357_vm12, %v3977_v5  ;;  %2787 = vrot.lane.b32.xlu0 %v7205_v63, %s4723_s17  ;;  %v3679_v63 = vld [vmem:[#allocation4 + $0xa9] sm:$0xff] }
 0x4de   : > { %4503 = vmatprep.mubr.msk.f32.mxu0 %vm2357_vm12, %v3935_v42  ;;  %v3549_v57 = vpop.permute.xlu1 %3548 }
 0x4df   : > { %3641 = vst.msk [vmem:[#allocation5 + $0x40] sm:$0xff] %vm3636_vm4, %v3549_v57  ;;  %v2820_v1 = vpop.permute.xlu0 %2819 }
 0x4e0   : > { %2890 = vst.msk [vmem:[#allocation5 + $0x1a0] sm:$0xff] %vm2863_vm15, %v2820_v1  ;;  %3600 = vrot.lane.b32.xlu1 %v3506_v62, %s4728_s16 }
 0x4e1   : > { %3558 = vrot.lane.b32.xlu0 %v3485_v24, %s4728_s16 }
 0x4e2   : > { %v2971_v44 = vpop.permute.xlu1 %2970 }
 0x4e3   : > { %3062 = vst.msk [vmem:[#allocation5 + $0x50] sm:$0xff] %vm3056_vm1, %v2971_v44  ;;  %v3591_v45 = vpop.permute.xlu0 %3590 }
 0x4e4   : > { %3662 = vst.msk [vmem:[#allocation5 + $0x190] sm:$0xff] %vm3636_vm4, %v3591_v45  ;;  %3022 = vrot.lane.b32.xlu1 %v6855_v33, %s4726_s10  ;;  %v3941_v45 = vld [vmem:[#allocation5 + $0x78] sm:$0xff] }
 0x4e5   : > { %2980 = vrot.lane.b32.xlu0 %v3484_v29, %s4726_s10 }
 0x4e6   : > { %v3742_v38 = vpop.permute.xlu1 %3741 }
 0x4e7   : > { %3834 = vst.msk [vmem:[#allocation5 + $0x40] sm:$0xff] %vm3829_vm5, %v3742_v38  ;;  %v3013_v43 = vpop.permute.xlu0 %3012 }
 0x4e8   : > { %3083 = vst.msk [vmem:[#allocation5 + $0x1a0] sm:$0xff] %vm3056_vm1, %v3013_v43  ;;  %3793 = vrot.lane.b32.xlu1 %v3699_v26, %s4729_s20 }
 0x4e9   : > { %3751 = vrot.lane.b32.xlu0 %v3678_v32, %s4729_s20 }
 0x4ea   : > { %v3164_v37 = vpop.permute.xlu1 %3163 }
 0x4eb   : > { %3255 = vst.msk [vmem:[#allocation5 + $0x50] sm:$0xff] %vm3249_vm2, %v3164_v37  ;;  %v4232_v3 = vpop.f32.mrb[0].mxu1  ;;  %v3784_v0 = vpop.permute.xlu0 %3783 }
 0x4ec   : > { %v4233_v49 = vadd.f32 %v6906_v22, %v4232_v3  ;;  %3855 = vst.msk [vmem:[#allocation5 + $0x190] sm:$0xff] %vm3829_vm5, %v3784_v0  ;;  %3215 = vrot.lane.b32.xlu1 %v3698_v48, %s4725_s9  ;;  %v4234_v52 = vpop.f32.mrb[1].mxu1  ;;  %v3983_v0 = vld [vmem:[#allocation5 + $0x1c8] sm:$0xff] }
 0x4ed   : > { %3173 = vrot.lane.b32.xlu0 %v3677_v10, %s4725_s9  ;;  %v3981_v10 = vld [vmem:[#allocation5 + $0x1b8] sm:$0xff] }
 0x4ee   : > { %v4347_v4 = vmax.f32 %v4233_v49, 0.0  ;;  %v3357_v61 = vpop.permute.xlu1 %3356  ;;  %v3934_v9 = vld [vmem:[#allocation5 + $0x40] sm:$0xff] }
 0x4ef   : > { %3448 = vst.msk [vmem:[#allocation5 + $0x50] sm:$0xff] %vm3442_vm3, %v3357_v61  ;;  %v3206_v35 = vpop.permute.xlu0 %3205  ;;  %4196 = vmatmul.mubr.f32.gmra.mrb[40].mxu0 %v3934_v9 }
 0x4f0   : > { %4379 = vst.msk [vmem:[%s6917_s27 + $0x58] sm:$0xff] %vm225_vm0, %v4347_v4  ;;  %3408 = vrot.lane.b32.xlu1 %v6608_v46, %s4727_s15  ;;  %4504 = vmatprep.mubr.msk.f32.mxu0 %vm2357_vm12, %v3937_v20  ;;  %v3979_v46 = vld [vmem:[#allocation5 + $0x1a8] sm:$0xff] }
 0x4f1   : > { %3276 = vst.msk [vmem:[#allocation5 + $0x1a0] sm:$0xff] %vm3249_vm2, %v3206_v35  ;;  %3366 = vrot.lane.b32.xlu0 %v7207_v2, %s4727_s15 }
 0x4f2   : > { %v2822_v6 = vpop.permute.xlu1 %2821 }
 0x4f3   : > { %2891 = vst.msk [vmem:[#allocation5 + $0x1b0] sm:$0xff] %vm2863_vm15, %v2822_v6  ;;  %v3399_v50 = vpop.permute.xlu0 %3398  ;;  %v3976_v41 = vld [vmem:[#allocation5 + $0x190] sm:$0xff] }
 0x4f4   : > { %3469 = vst.msk [vmem:[#allocation5 + $0x1a0] sm:$0xff] %vm3442_vm3, %v3399_v50  ;;  %3602 = vrot.lane.b32.xlu1 %v3507_v8, %s4728_s16  ;;  %4301 = vmatmul.mubr.f32.gmra.mrb[28].mxu1 %v3976_v41 }
 0x4f5   : > { %3560 = vrot.lane.b32.xlu0 %v3486_v12, %s4728_s16  ;;  %4525 = vmatprep.mubr.msk.f32.mxu1 %vm2357_vm12, %v3979_v46 }
 0x4f6   : > { %v3593_v53 = vpop.permute.xlu1 %3592 }
 0x4f7   : > { %3663 = vst.msk [vmem:[#allocation5 + $0x1a0] sm:$0xff] %vm3636_vm4, %v3593_v53  ;;  %v4237_v47 = vpop.f32.mrb[2].mxu1  ;;  %v3551_v31 = vpop.permute.xlu0 %3550 }
 0x4f8   : > { %v4238_v59 = vadd.f32 %v6906_v22, %v4237_v47  ;;  %3642 = vst.msk [vmem:[#allocation5 + $0x50] sm:$0xff] %vm3636_vm4, %v3551_v31  ;;  %3795 = vrot.lane.b32.xlu1 %v3700_v16, %s4729_s20  ;;  %v4239_v25 = vpop.f32.mrb[3].mxu1  ;;  %v3985_v47 = vld [vmem:[#allocation5 + $0x1d8] sm:$0xff] }
 0x4f9   : > { %3753 = vrot.lane.b32.xlu0 %v3679_v63, %s4729_s20  ;;  %v3943_v25 = vld [vmem:[#allocation5 + $0x88] sm:$0xff] }
 0x4fa   : > { %v4348_v60 = vmax.f32 %v4238_v59, 0.0  ;;  %v3015_v27 = vpop.permute.xlu1 %3014 }
 0x4fb   : > { %3084 = vst.msk [vmem:[#allocation5 + $0x1b0] sm:$0xff] %vm3056_vm1, %v3015_v27  ;;  %v2973_v23 = vpop.permute.xlu0 %2972 }
 0x4fc   : > { %4380 = vst.msk [vmem:[%s6917_s27 + $0x60] sm:$0xff] %vm225_vm0, %v4348_v60 }
 0x4fd   : > { %3063 = vst.msk [vmem:[#allocation5 + $0x60] sm:$0xff] %vm3056_vm1, %v2973_v23 }
 0x4fe   : > { %v3786_v30 = vpop.permute.xlu1 %3785 }
 0x4ff   : > { %3856 = vst.msk [vmem:[#allocation5 + $0x1a0] sm:$0xff] %vm3829_vm5, %v3786_v30  ;;  %v3744_v19 = vpop.permute.xlu0 %3743 }
 0x500   : > { %3835 = vst.msk [vmem:[#allocation5 + $0x50] sm:$0xff] %vm3829_vm5, %v3744_v19 }
 0x502   : > { %v3208_v17 = vpop.permute.xlu1 %3207 }
 0x503   : > { %3277 = vst.msk [vmem:[#allocation5 + $0x1b0] sm:$0xff] %vm3249_vm2, %v3208_v17  ;;  %v4242_v33 = vpop.f32.mrb[4].mxu1  ;;  %v3166_v21 = vpop.permute.xlu0 %3165 }
 0x504   : > { %v4243_v29 = vadd.f32 %v6906_v22, %v4242_v33  ;;  %3256 = vst.msk [vmem:[#allocation5 + $0x60] sm:$0xff] %vm3249_vm2, %v3166_v21  ;;  %v4244_v51 = vpop.f32.mrb[5].mxu1 }
 0x506   : > { %v4349_v14 = vmax.f32 %v4243_v29, 0.0  ;;  %v3401_v13 = vpop.permute.xlu1 %3400  ;;  %v3978_v39 = vld [vmem:[#allocation5 + $0x1a0] sm:$0xff] }
 0x507   : > { %3470 = vst.msk [vmem:[#allocation5 + $0x1b0] sm:$0xff] %vm3442_vm3, %v3401_v13  ;;  %4306 = vmatmul.mubr.f32.gmra.mrb[30].mxu1 %v3978_v39  ;;  %v3359_v15 = vpop.permute.xlu0 %3358  ;;  %v3936_v48 = vld [vmem:[#allocation5 + $0x50] sm:$0xff] }
 0x508   : > { %4381 = vst.msk [vmem:[%s6917_s27 + $0x68] sm:$0xff] %vm225_vm0, %v4349_v14  ;;  %4201 = vmatmul.mubr.f32.gmra.mrb[42].mxu0 %v3936_v48  ;;  %4526 = vmatprep.mubr.msk.f32.mxu1 %vm2357_vm12, %v3981_v10  ;;  %v3987_v48 = vld [vmem:[#allocation5 + $0x1e8] sm:$0xff] }
 0x509   : > { %3449 = vst.msk [vmem:[#allocation5 + $0x60] sm:$0xff] %vm3442_vm3, %v3359_v15  ;;  %4505 = vmatprep.mubr.msk.f32.mxu0 %vm2357_vm12, %v3939_v58 }
 0x50a   : > { %v3553_v40 = vpop.permute.xlu1 %3552 }
 0x50b   : > { %3643 = vst.msk [vmem:[#allocation5 + $0x60] sm:$0xff] %vm3636_vm4, %v3553_v40  ;;  %v2824_v28 = vpop.permute.xlu0 %2823 }
 0x50c   : > { %2892 = vst.msk [vmem:[#allocation5 + $0x1c0] sm:$0xff] %vm2863_vm15, %v2824_v28 }
 0x50e   : > { %v2975_v54 = vpop.permute.xlu1 %2974 }
 0x50f   : > { %3064 = vst.msk [vmem:[#allocation5 + $0x70] sm:$0xff] %vm3056_vm1, %v2975_v54  ;;  %v4247_v36 = vpop.f32.mrb[6].mxu1  ;;  %v3595_v34 = vpop.permute.xlu0 %3594 }
 0x510   : > { %v4248_v7 = vadd.f32 %v6906_v22, %v4247_v36  ;;  %3664 = vst.msk [vmem:[#allocation5 + $0x1b0] sm:$0xff] %vm3636_vm4, %v3595_v34  ;;  %v4249_v11 = vpop.f32.mrb[7].mxu1 }
 0x512   : > { %v4350_v18 = vmax.f32 %v4248_v7, 0.0  ;;  %v3746_v5 = vpop.permute.xlu1 %3745  ;;  %v3945_v7 = vld [vmem:[#allocation5 + $0x98] sm:$0xff] }
 0x513   : > { %3836 = vst.msk [vmem:[#allocation5 + $0x60] sm:$0xff] %vm3829_vm5, %v3746_v5  ;;  %v3017_v42 = vpop.permute.xlu0 %3016 }
 0x514   : > { %4382 = vst.msk [vmem:[%s6917_s27 + $0x70] sm:$0xff] %vm225_vm0, %v4350_v18 }
 0x515   : > { %3085 = vst.msk [vmem:[#allocation5 + $0x1c0] sm:$0xff] %vm3056_vm1, %v3017_v42 }
 0x516   : > { %v3168_v62 = vpop.permute.xlu1 %3167 }
 0x517   : > { %3257 = vst.msk [vmem:[#allocation5 + $0x70] sm:$0xff] %vm3249_vm2, %v3168_v62  ;;  %v3788_v57 = vpop.permute.xlu0 %3787 }
 0x518   : > { %3857 = vst.msk [vmem:[#allocation5 + $0x1b0] sm:$0xff] %vm3829_vm5, %v3788_v57 }
 0x51a   : > { %v3361_v1 = vpop.permute.xlu1 %3360  ;;  %v3938_v56 = vld [vmem:[#allocation5 + $0x60] sm:$0xff] }
 0x51b   : > { %3450 = vst.msk [vmem:[#allocation5 + $0x70] sm:$0xff] %vm3442_vm3, %v3361_v1  ;;  %v4252_v24 = vpop.f32.mrb[8].mxu1  ;;  %v3210_v44 = vpop.permute.xlu0 %3209  ;;  %4206 = vmatmul.mubr.f32.gmra.mrb[44].mxu0 %v3938_v56 }
 0x51c   : > { %v4253_v26 = vadd.f32 %v6906_v22, %v4252_v24  ;;  %3278 = vst.msk [vmem:[#allocation5 + $0x1c0] sm:$0xff] %vm3249_vm2, %v3210_v44  ;;  %4506 = vmatprep.mubr.msk.f32.mxu0 %vm2357_vm12, %v3941_v45  ;;  %v4254_v38 = vpop.f32.mrb[9].mxu1 }
 0x51e   : > { %v4351_v43 = vmax.f32 %v4253_v26, 0.0  ;;  %v2826_v32 = vpop.permute.xlu1 %2825 }
 0x51f   : > { %2893 = vst.msk [vmem:[#allocation5 + $0x1d0] sm:$0xff] %vm2863_vm15, %v2826_v32  ;;  %v3403_v37 = vpop.permute.xlu0 %3402  ;;  %v3980_v3 = vld [vmem:[#allocation5 + $0x1b0] sm:$0xff] }
 0x520   : > { %4383 = vst.msk [vmem:[%s6917_s27 + $0x78] sm:$0xff] %vm225_vm0, %v4351_v43  ;;  %4311 = vmatmul.mubr.f32.gmra.mrb[32].mxu1 %v3980_v3 }
 0x521   : > { %3471 = vst.msk [vmem:[#allocation5 + $0x1c0] sm:$0xff] %vm3442_vm3, %v3403_v37  ;;  %4527 = vmatprep.mubr.msk.f32.mxu1 %vm2357_vm12, %v3983_v0  ;;  %v3989_v37 = vld [vmem:[#allocation5 + $0x1f8] sm:$0xff] }
 0x522   : > { %v3597_v49 = vpop.permute.xlu1 %3596 }
 0x523   : > { %3665 = vst.msk [vmem:[#allocation5 + $0x1c0] sm:$0xff] %vm3636_vm4, %v3597_v49  ;;  %v3555_v52 = vpop.permute.xlu0 %3554 }
 0x524   : > { %3644 = vst.msk [vmem:[#allocation5 + $0x70] sm:$0xff] %vm3636_vm4, %v3555_v52 }
 0x526   : > { %v3019_v4 = vpop.permute.xlu1 %3018 }
 0x527   : > { %3086 = vst.msk [vmem:[#allocation5 + $0x1d0] sm:$0xff] %vm3056_vm1, %v3019_v4  ;;  %v4257_v61 = vpop.f32.mrb[10].mxu1  ;;  %v2977_v9 = vpop.permute.xlu0 %2976  ;;  %v3947_v4 = vld [vmem:[#allocation5 + $0xa8] sm:$0xff] }
 0x528   : > { %v4258_v35 = vadd.f32 %v6906_v22, %v4257_v61  ;;  %3065 = vst.msk [vmem:[#allocation5 + $0x80] sm:$0xff] %vm3056_vm1, %v2977_v9  ;;  %v4259_v20 = vpop.f32.mrb[11].mxu1 }
 0x52a   : > { %v4352_v55 = vmax.f32 %v4258_v35, 0.0  ;;  %v3790_v2 = vpop.permute.xlu1 %3789 }
 0x52b   : > { %3858 = vst.msk [vmem:[#allocation5 + $0x1c0] sm:$0xff] %vm3829_vm5, %v3790_v2  ;;  %v3748_v8 = vpop.permute.xlu0 %3747 }
 0x52c   : > { %4384 = vst.msk [vmem:[%s6917_s27 + $0x80] sm:$0xff] %vm225_vm0, %v4352_v55 }
 0x52d   : > { %3837 = vst.msk [vmem:[#allocation5 + $0x70] sm:$0xff] %vm3829_vm5, %v3748_v8 }
 0x52e   : > { %v3212_v6 = vpop.permute.xlu1 %3211 }
 0x52f   : > { %3279 = vst.msk [vmem:[#allocation5 + $0x1d0] sm:$0xff] %vm3249_vm2, %v3212_v6  ;;  %v3170_v50 = vpop.permute.xlu0 %3169 }
 0x530   : > { %3258 = vst.msk [vmem:[#allocation5 + $0x80] sm:$0xff] %vm3249_vm2, %v3170_v50 }
 0x532   : > { %v3405_v41 = vpop.permute.xlu1 %3404  ;;  %v3982_v12 = vld [vmem:[#allocation5 + $0x1c0] sm:$0xff] }
 0x533   : > { %3472 = vst.msk [vmem:[#allocation5 + $0x1d0] sm:$0xff] %vm3442_vm3, %v3405_v41  ;;  %v4262_v46 = vpop.f32.mrb[12].mxu1  ;;  %4316 = vmatmul.mubr.f32.gmra.mrb[34].mxu1 %v3982_v12  ;;  %v3363_v16 = vpop.permute.xlu0 %3362 }
 0x534   : > { %v3940_v53 = vld [vmem:[#allocation5 + $0x70] sm:$0xff]  ;;  %v4263_v31 = vadd.f32 %v6906_v22, %v4262_v46  ;;  %3451 = vst.msk [vmem:[#allocation5 + $0x80] sm:$0xff] %vm3442_vm3, %v3363_v16  ;;  %v4264_v59 = vpop.f32.mrb[13].mxu1  ;;  %4528 = vmatprep.mubr.msk.f32.mxu1 %vm2357_vm12, %v3985_v47 }
 0x535   : > { %4211 = vmatmul.mubr.f32.gmra.mrb[46].mxu0 %v3940_v53 }
 0x536   : > { %4507 = vmatprep.mubr.msk.f32.mxu0 %vm2357_vm12, %v3943_v25  ;;  %v4353_v63 = vmax.f32 %v4263_v31, 0.0  ;;  %v2828_v60 = vpop.permute.xlu1 %2827 }
 0x537   : > { %2894 = vst.msk [vmem:[#allocation5 + $0x1e0] sm:$0xff] %vm2863_vm15, %v2828_v60  ;;  %v2786_v27 = vpop.permute.xlu0 %2785 }
 0x538   : > { %4385 = vst.msk [vmem:[%s6917_s27 + $0x88] sm:$0xff] %vm225_vm0, %v4353_v63 }
 0x539   : > { %2873 = vst.msk [vmem:[#allocation5 + $0x90] sm:$0xff] %vm2863_vm15, %v2786_v27 }
 0x53a   : > { %v3599_v23 = vpop.permute.xlu1 %3598 }
 0x53b   : > { %3666 = vst.msk [vmem:[#allocation5 + $0x1d0] sm:$0xff] %vm3636_vm4, %v3599_v23  ;;  %v3557_v30 = vpop.permute.xlu0 %3556 }
 0x53c   : > { %3645 = vst.msk [vmem:[#allocation5 + $0x80] sm:$0xff] %vm3636_vm4, %v3557_v30 }
 0x53e   : > { %v3021_v19 = vpop.permute.xlu1 %3020 }
 0x53f   : > { %3087 = vst.msk [vmem:[#allocation5 + $0x1e0] sm:$0xff] %vm3056_vm1, %v3021_v19  ;;  %v4267_v17 = vpop.f32.mrb[14].mxu1  ;;  %v2979_v33 = vpop.permute.xlu0 %2978 }
 0x540   : > { %v4268_v21 = vadd.f32 %v6906_v22, %v4267_v17  ;;  %3066 = vst.msk [vmem:[#allocation5 + $0x90] sm:$0xff] %vm3056_vm1, %v2979_v33  ;;  %v4269_v29 = vpop.f32.mrb[15].mxu1 }
 0x542   : > { %v4354_v51 = vmax.f32 %v4268_v21, 0.0  ;;  %v3792_v14 = vpop.permute.xlu1 %3791 }
 0x543   : > { %3859 = vst.msk [vmem:[#allocation5 + $0x1d0] sm:$0xff] %vm3829_vm5, %v3792_v14  ;;  %v3750_v13 = vpop.permute.xlu0 %3749 }
 0x544   : > { %4386 = vst.msk [vmem:[%s6917_s27 + $0x90] sm:$0xff] %vm225_vm0, %v4354_v51 }
 0x545   : > { %3838 = vst.msk [vmem:[#allocation5 + $0x80] sm:$0xff] %vm3829_vm5, %v3750_v13 }
 0x546   : > { %v3214_v39 = vpop.permute.xlu1 %3213 }
 0x547   : > { %3280 = vst.msk [vmem:[#allocation5 + $0x1e0] sm:$0xff] %vm3249_vm2, %v3214_v39  ;;  %v3172_v15 = vpop.permute.xlu0 %3171 }
 0x548   : > { %3259 = vst.msk [vmem:[#allocation5 + $0x90] sm:$0xff] %vm3249_vm2, %v3172_v15 }
 0x54a   : > { %v3407_v10 = vpop.permute.xlu1 %3406  ;;  %v3984_v58 = vld [vmem:[#allocation5 + $0x1d0] sm:$0xff] }
 0x54b   : > { %3473 = vst.msk [vmem:[#allocation5 + $0x1e0] sm:$0xff] %vm3442_vm3, %v3407_v10  ;;  %v4272_v40 = vpop.f32.mrb[16].mxu1  ;;  %4321 = vmatmul.mubr.f32.gmra.mrb[36].mxu1 %v3984_v58  ;;  %v3365_v28 = vpop.permute.xlu0 %3364 }
 0x54c   : > { %v3942_v54 = vld [vmem:[#allocation5 + $0x80] sm:$0xff]  ;;  %v4273_v36 = vadd.f32 %v6906_v22, %v4272_v40  ;;  %3452 = vst.msk [vmem:[#allocation5 + $0x90] sm:$0xff] %vm3442_vm3, %v3365_v28  ;;  %v4274_v34 = vpop.f32.mrb[17].mxu1  ;;  %4529 = vmatprep.mubr.msk.f32.mxu1 %vm2357_vm12, %v3987_v48 }
 0x54d   : > { %4216 = vmatmul.mubr.f32.gmra.mrb[48].mxu0 %v3942_v54 }
 0x54e   : > { %4508 = vmatprep.mubr.msk.f32.mxu0 %vm2357_vm12, %v3945_v7  ;;  %v4355_v11 = vmax.f32 %v4273_v36, 0.0  ;;  %v2830_v18 = vpop.permute.xlu1 %2829 }
 0x54f   : > { %2895 = vst.msk [vmem:[#allocation5 + $0x1f0] sm:$0xff] %vm2863_vm15, %v2830_v18  ;;  %v2788_v5 = vpop.permute.xlu0 %2787 }
 0x550   : > { %4387 = vst.msk [vmem:[%s6917_s27 + $0x98] sm:$0xff] %vm225_vm0, %v4355_v11 }
 0x551   : > { %2874 = vst.msk [vmem:[#allocation5 + $0xa0] sm:$0xff] %vm2863_vm15, %v2788_v5 }
 0x552   : > { %v3601_v42 = vpop.permute.xlu1 %3600 }
 0x553   : > { %3667 = vst.msk [vmem:[#allocation5 + $0x1e0] sm:$0xff] %vm3636_vm4, %v3601_v42  ;;  %v3559_v62 = vpop.permute.xlu0 %3558 }
 0x554   : > { %3646 = vst.msk [vmem:[#allocation5 + $0x90] sm:$0xff] %vm3636_vm4, %v3559_v62 }
 0x556   : > { %v3023_v57 = vpop.permute.xlu1 %3022  ;;  %v4277_v1 = vpop.f32.mrb[18].mxu1 }
 0x557   : > { %3088 = vst.msk [vmem:[#allocation5 + $0x1f0] sm:$0xff] %vm3056_vm1, %v3023_v57  ;;  %v4278_v56 = vadd.f32 %v6906_v22, %v4277_v1  ;;  %v4279_v24 = vpop.f32.mrb[19].mxu1  ;;  %v2981_v44 = vpop.permute.xlu0 %2980 }
 0x558   : > { %3067 = vst.msk [vmem:[#allocation5 + $0xa0] sm:$0xff] %vm3056_vm1, %v2981_v44 }
 0x559   : > { %v4356_v45 = vmax.f32 %v4278_v56, 0.0 }
 0x55a   : > { %v3794_v26 = vpop.permute.xlu1 %3793 }
 0x55b   : > { %4388 = vst.msk [vmem:[%s6917_s27 + $0xa0] sm:$0xff] %vm225_vm0, %v4356_v45  ;;  %v3752_v38 = vpop.permute.xlu0 %3751 }
 0x55c   : > { %3860 = vst.msk [vmem:[#allocation5 + $0x1e0] sm:$0xff] %vm3829_vm5, %v3794_v26  ;;  %3839 = vst.msk [vmem:[#allocation5 + $0x90] sm:$0xff] %vm3829_vm5, %v3752_v38 }
 0x55e   : > { %v3216_v43 = vpop.permute.xlu1 %3215 }
 0x55f   : > { %3281 = vst.msk [vmem:[#allocation5 + $0x1f0] sm:$0xff] %vm3249_vm2, %v3216_v43  ;;  %v3174_v32 = vpop.permute.xlu0 %3173 }
 0x560   : > { %3260 = vst.msk [vmem:[#allocation5 + $0xa0] sm:$0xff] %vm3249_vm2, %v3174_v32 }
 0x562   : > { %v3409_v3 = vpop.permute.xlu1 %3408 }
 0x563   : > { %v3986_v0 = vld [vmem:[#allocation5 + $0x1e0] sm:$0xff]  ;;  %3474 = vst.msk [vmem:[#allocation5 + $0x1f0] sm:$0xff] %vm3442_vm3, %v3409_v3  ;;  %v3367_v49 = vpop.permute.xlu0 %3366  ;;  %v3944_v52 = vld [vmem:[#allocation5 + $0x90] sm:$0xff] }
 0x564   : > { %4326 = vmatmul.mubr.f32.gmra.mrb[38].mxu1 %v3986_v0  ;;  %3453 = vst.msk [vmem:[#allocation5 + $0xa0] sm:$0xff] %vm3442_vm3, %v3367_v49  ;;  %4221 = vmatmul.mubr.f32.gmra.mrb[50].mxu0 %v3944_v52 }
 0x565   : > { %4530 = vmatprep.mubr.msk.f32.mxu1 %vm2357_vm12, %v3989_v37  ;;  %4509 = vmatprep.mubr.msk.f32.mxu0 %vm2357_vm12, %v3947_v4 }
 0x566   : > { %v3603_v61 = vpop.permute.xlu1 %3602 }
 0x567   : > { %3668 = vst.msk [vmem:[#allocation5 + $0x1f0] sm:$0xff] %vm3636_vm4, %v3603_v61  ;;  %v3561_v9 = vpop.permute.xlu0 %3560 }
 0x568   : > { %3647 = vst.msk [vmem:[#allocation5 + $0xa0] sm:$0xff] %vm3636_vm4, %v3561_v9 }
 0x56a   : > { %v3796_v35 = vpop.permute.xlu1 %3795  ;;  %v4177_v20 = vpop.f32.mrb[32].mxu0 }
 0x56b   : > { %3861 = vst.msk [vmem:[#allocation5 + $0x1f0] sm:$0xff] %vm3829_vm5, %v3796_v35  ;;  %v4178_v55 = vadd.f32 %v6906_v22, %v4177_v20  ;;  %v4179_v2 = vpop.f32.mrb[33].mxu0  ;;  %v3754_v8 = vpop.permute.xlu0 %3753 }
 0x56c   : > { %3840 = vst.msk [vmem:[#allocation5 + $0xa0] sm:$0xff] %vm3829_vm5, %v3754_v8 }
 0x56d   : > { %v4336_v6 = vmax.f32 %v4178_v55, 0.0 }
 0x56f   : > { %4368 = vst.msk [vmem:[%s6917_s27] sm:$0xff] %vm225_vm0, %v4336_v6  ;;  %v4282_v50 = vpop.f32.mrb[20].mxu1 }
 0x570   : > { %v4283_v41 = vadd.f32 %v6906_v22, %v4282_v50  ;;  %v4284_v12 = vpop.f32.mrb[21].mxu1 }
 0x572   : > { %v4357_v46 = vmax.f32 %v4283_v41, 0.0  ;;  %v3988_v16 = vld [vmem:[#allocation5 + $0x1f0] sm:$0xff] }
 0x573   : > { %4331 = vmatmul.mubr.f32.gmra.mrb[40].mxu1 %v3988_v16  ;;  %v3946_v53 = vld [vmem:[#allocation5 + $0xa0] sm:$0xff] }
 0x574   : > { %4389 = vst.msk [vmem:[%s6917_s27 + $0xa8] sm:$0xff] %vm225_vm0, %v4357_v46  ;;  %4226 = vmatmul.mubr.f32.gmra.mrb[52].mxu0 %v3946_v53 }
 0x582   : > { %v4287_v47 = vpop.f32.mrb[22].mxu1 }
 0x583   : > { %v4288_v31 = vadd.f32 %v6906_v22, %v4287_v47  ;;  %v4182_v59 = vpop.f32.mrb[34].mxu0  ;;  %v4289_v25 = vpop.f32.mrb[23].mxu1 }
 0x584   : > { %v4183_v63 = vadd.f32 %v6906_v22, %v4182_v59  ;;  %v4184_v60 = vpop.f32.mrb[35].mxu0 }
 0x585   : > { %v4358_v27 = vmax.f32 %v4288_v31, 0.0 }
 0x586   : > { %v4337_v23 = vmax.f32 %v4183_v63, 0.0 }
 0x587   : > { %4390 = vst.msk [vmem:[%s6917_s27 + $0xb0] sm:$0xff] %vm225_vm0, %v4358_v27 }
 0x588   : > { %4369 = vst.msk [vmem:[%s6917_s27 + $0x8] sm:$0xff] %vm225_vm0, %v4337_v23 }
 0x596   : > { %v4187_v30 = vpop.f32.mrb[36].mxu0 }
 0x597   : > { %v4188_v19 = vadd.f32 %v6906_v22, %v4187_v30  ;;  %v4189_v17 = vpop.f32.mrb[37].mxu0 }
 0x599   : > { %v4338_v33 = vmax.f32 %v4188_v19, 0.0 }
 0x59b   : > { %4370 = vst.msk [vmem:[%s6917_s27 + $0x10] sm:$0xff] %vm225_vm0, %v4338_v33  ;;  %v4292_v21 = vpop.f32.mrb[24].mxu1 }
 0x59c   : > { %v4293_v29 = vadd.f32 %v6906_v22, %v4292_v21  ;;  %v4294_v51 = vpop.f32.mrb[25].mxu1 }
 0x59e   : > { %v4359_v14 = vmax.f32 %v4293_v29, 0.0 }
 0x5a0   : > { %4391 = vst.msk [vmem:[%s6917_s27 + $0xb8] sm:$0xff] %vm225_vm0, %v4359_v14 }
 0x5ae   : > { %v4297_v13 = vpop.f32.mrb[26].mxu1 }
 0x5af   : > { %v4298_v39 = vadd.f32 %v6906_v22, %v4297_v13  ;;  %v4192_v15 = vpop.f32.mrb[38].mxu0  ;;  %v4299_v48 = vpop.f32.mrb[27].mxu1 }
 0x5b0   : > { %v4193_v10 = vadd.f32 %v6906_v22, %v4192_v15  ;;  %v4194_v58 = vpop.f32.mrb[39].mxu0 }
 0x5b1   : > { %v4360_v40 = vmax.f32 %v4298_v39, 0.0 }
 0x5b2   : > { %v4339_v28 = vmax.f32 %v4193_v10, 0.0 }
 0x5b3   : > { %4392 = vst.msk [vmem:[%s6917_s27 + $0xc0] sm:$0xff] %vm225_vm0, %v4360_v40 }
 0x5b4   : > { %4371 = vst.msk [vmem:[%s6917_s27 + $0x18] sm:$0xff] %vm225_vm0, %v4339_v28 }
 0x5c2   : > { %v4197_v54 = vpop.f32.mrb[40].mxu0 }
 0x5c3   : > { %v4198_v36 = vadd.f32 %v6906_v22, %v4197_v54  ;;  %v4199_v34 = vpop.f32.mrb[41].mxu0 }
 0x5c5   : > { %v4340_v7 = vmax.f32 %v4198_v36, 0.0 }
 0x5c7   : > { %4372 = vst.msk [vmem:[%s6917_s27 + $0x20] sm:$0xff] %vm225_vm0, %v4340_v7  ;;  %v4302_v11 = vpop.f32.mrb[28].mxu1 }
 0x5c8   : > { %v4303_v18 = vadd.f32 %v6906_v22, %v4302_v11  ;;  %v4304_v5 = vpop.f32.mrb[29].mxu1 }
 0x5ca   : > { %v4361_v42 = vmax.f32 %v4303_v18, 0.0 }
 0x5cc   : > { %4393 = vst.msk [vmem:[%s6917_s27 + $0xc8] sm:$0xff] %vm225_vm0, %v4361_v42 }
 0x5da   : > { %v4307_v62 = vpop.f32.mrb[30].mxu1 }
 0x5db   : > { %v4308_v57 = vadd.f32 %v6906_v22, %v4307_v62  ;;  %v4202_v1 = vpop.f32.mrb[42].mxu0  ;;  %v4309_v56 = vpop.f32.mrb[31].mxu1 }
 0x5dc   : > { %v4203_v24 = vadd.f32 %v6906_v22, %v4202_v1  ;;  %v4204_v44 = vpop.f32.mrb[43].mxu0 }
 0x5dd   : > { %v4362_v45 = vmax.f32 %v4308_v57, 0.0 }
 0x5de   : > { %v4341_v26 = vmax.f32 %v4203_v24, 0.0 }
 0x5df   : > { %4394 = vst.msk [vmem:[%s6917_s27 + $0xd0] sm:$0xff] %vm225_vm0, %v4362_v45 }
 0x5e0   : > { %4373 = vst.msk [vmem:[%s6917_s27 + $0x28] sm:$0xff] %vm225_vm0, %v4341_v26 }
 0x5ee   : > { %v4207_v38 = vpop.f32.mrb[44].mxu0 }
 0x5ef   : > { %v4208_v43 = vadd.f32 %v6906_v22, %v4207_v38  ;;  %v4209_v32 = vpop.f32.mrb[45].mxu0 }
 0x5f1   : > { %v4342_v37 = vmax.f32 %v4208_v43, 0.0 }
 0x5f3   : > { %4374 = vst.msk [vmem:[%s6917_s27 + $0x30] sm:$0xff] %vm225_vm0, %v4342_v37  ;;  %v4312_v3 = vpop.f32.mrb[32].mxu1 }
 0x5f4   : > { %v4313_v0 = vadd.f32 %v6906_v22, %v4312_v3  ;;  %v4314_v49 = vpop.f32.mrb[33].mxu1 }
 0x5f6   : > { %v4363_v52 = vmax.f32 %v4313_v0, 0.0 }
 0x5f8   : > { %4395 = vst.msk [vmem:[%s6917_s27 + $0xd8] sm:$0xff] %vm225_vm0, %v4363_v52 }
 0x606   : > { %v4317_v4 = vpop.f32.mrb[34].mxu1 }
 0x607   : > { %v4318_v61 = vadd.f32 %v6906_v22, %v4317_v4  ;;  %v4319_v35 = vpop.f32.mrb[35].mxu1 }
 0x608   : > { %v4212_v9 = vpop.f32.mrb[46].mxu0 }
 0x609   : > { %v4213_v20 = vadd.f32 %v6906_v22, %v4212_v9  ;;  %v4214_v55 = vpop.f32.mrb[47].mxu0  ;;  %v4364_v2 = vmax.f32 %v4318_v61, 0.0 }
 0x60b   : > { %v4343_v8 = vmax.f32 %v4213_v20, 0.0  ;;  %4396 = vst.msk [vmem:[%s6917_s27 + $0xe0] sm:$0xff] %vm225_vm0, %v4364_v2 }
 0x60d   : > { %4375 = vst.msk [vmem:[%s6917_s27 + $0x38] sm:$0xff] %vm225_vm0, %v4343_v8 }
 0x61e   : > { %v4322_v6 = vpop.f32.mrb[36].mxu1 }
 0x61f   : > { %v4323_v50 = vadd.f32 %v6906_v22, %v4322_v6  ;;  %v4324_v12 = vpop.f32.mrb[37].mxu1 }
 0x620   : > { %v4217_v41 = vpop.f32.mrb[48].mxu0 }
 0x621   : > { %v4218_v46 = vadd.f32 %v6906_v22, %v4217_v41  ;;  %v4219_v16 = vpop.f32.mrb[49].mxu0  ;;  %v4365_v53 = vmax.f32 %v4323_v50, 0.0 }
 0x623   : > { %v4344_v47 = vmax.f32 %v4218_v46, 0.0  ;;  %4397 = vst.msk [vmem:[%s6917_s27 + $0xe8] sm:$0xff] %vm225_vm0, %v4365_v53 }
 0x625   : > { %4376 = vst.msk [vmem:[%s6917_s27 + $0x40] sm:$0xff] %vm225_vm0, %v4344_v47 }
 0x637   : > { %v4327_v31 = vpop.f32.mrb[38].mxu1  ;;  %v4222_v25 = vpop.f32.mrb[50].mxu0 }
 0x638   : > { %v4328_v59 = vadd.f32 %v6906_v22, %v4327_v31  ;;  %v4329_v63 = vpop.f32.mrb[39].mxu1  ;;  %v4223_v60 = vadd.f32 %v6906_v22, %v4222_v25  ;;  %v4224_v27 = vpop.f32.mrb[51].mxu0 }
 0x63a   : > { %v4366_v23 = vmax.f32 %v4328_v59, 0.0  ;;  %v4345_v30 = vmax.f32 %v4223_v60, 0.0 }
 0x63c   : > { %4398 = vst.msk [vmem:[%s6917_s27 + $0xf0] sm:$0xff] %vm225_vm0, %v4366_v23  ;;  %4377 = vst.msk [vmem:[%s6917_s27 + $0x48] sm:$0xff] %vm225_vm0, %v4345_v30 }
 0x646   : > { %v4332_v19 = vpop.f32.mrb[40].mxu1 }
 0x647   : > { %v4333_v17 = vadd.f32 %v6906_v22, %v4332_v19  ;;  %v4227_v33 = vpop.f32.mrb[52].mxu0  ;;  %v4334_v21 = vpop.f32.mrb[41].mxu1 }
 0x648   : > { %v4228_v29 = vadd.f32 %v6906_v22, %v4227_v33  ;;  %v4229_v51 = vpop.f32.mrb[53].mxu0 }
 0x649   : > { %v4367_v14 = vmax.f32 %v4333_v17, 0.0 }
 0x64a   : > { %v4346_v13 = vmax.f32 %v4228_v29, 0.0 }
 0x64b   : > { %4399 = vst.msk [vmem:[%s6917_s27 + $0xf8] sm:$0xff] %vm225_vm0, %v4367_v14 }
 0x64c   : > { %4378 = vst.msk [vmem:[%s6917_s27 + $0x50] sm:$0xff] %vm225_vm0, %v4346_v13 }
 0x64d PF: > { %s15_s18 = sadd.s32 1, %s4713_s18  }
 0x64e   : > { %p12_p4 = scmp.ge.s32.totalorder %s15_s18, 4  }
 0x650   :  { %14 = sbr.rel (!%p12_p4) target bundleno = 1 (0x1), region = 74 }

</bundles_post_ra>
